<compile_context>
chip_gen: v5e
topology: v5e:2x2
jax: 0.10.0
libtpu: 0.0.40
codegen_flags: <defaults>
</compile_context>

<pallas_src>
import functools
import math

import jax
import jax.numpy as jnp
from jax import lax
from jax.experimental import pallas as pl
from jax.experimental.pallas import tpu as pltpu


# ----------------------------- in-kernel helpers --------------------------- #

def _layer_norm_f32(x, gamma, beta, eps=1e-6):
    xf = x.astype(jnp.float32)
    mean = jnp.mean(xf, axis=-1, keepdims=True)
    var = jnp.mean((xf - mean) ** 2, axis=-1, keepdims=True)
    inv = lax.rsqrt(var + eps)
    return (xf - mean) * inv * gamma.astype(jnp.float32) + beta.astype(jnp.float32)


def _split_heads(x2d, num_heads, dk):
    """[T, H*dk] -> [H, T, dk] via static lane slices stacked on a leading
    (batch) axis (no in-kernel minor-dim reshape)."""
    # TODO(synk): for real deployments pick dk a multiple of 128 so these lane
    # slices are aligned and the score/context matmuls use full MXU depth.
    return jnp.stack([x2d[:, h * dk:(h + 1) * dk] for h in range(num_heads)],
                     axis=0)


def _attention_sublayer(x_f32, kv_src, mask_bool,
                        g_ref, b_ref, wq_ref, bq_ref, wk_ref, bk_ref,
                        wv_ref, bv_ref, wo_ref, bo_ref,
                        kc_ref, vc_ref, *, num_heads, tk_chunk):
    """Pre-norm residual multi-head attention on one batch element.

    x_f32:  [Tq, D] f32 residual stream.
    kv_src: None for self-attention (keys/values come from LN(x)); otherwise
            the raw encoder memory [Tk, D] (memory is NOT layer-normed).
    wo_ref: [H, dk, D] output projection, pre-split per head (wrapper-side).
    Writes lane-dense K/V projections ([Tk, D]) to kc_ref / vc_ref.
    Returns x + MHA(LN(x), kv, kv, mask)  (dropout = identity).
    """
    Tq, D = x_f32.shape
    dk = D // num_heads
    mm_dtype = wq_ref.dtype                      # MXU operand dtype (bf16)

    h = _layer_norm_f32(x_f32, g_ref[...], b_ref[...])       # [Tq, D] f32
    h_mm = h.astype(mm_dtype)
    kv_mm = h_mm if kv_src is None else kv_src.astype(mm_dtype)

    # Dense projections: full-D contraction, full-D output (good MXU shapes).
    q = jnp.dot(h_mm, wq_ref[...], preferred_element_type=jnp.float32) + bq_ref[...]
    k = jnp.dot(kv_mm, wk_ref[...], preferred_element_type=jnp.float32) + bk_ref[...]
    v = jnp.dot(kv_mm, wv_ref[...], preferred_element_type=jnp.float32) + bv_ref[...]

    # Lane-dense cache write-back; the wrapper reshapes to [B, H, Tk, dk].
    kc_ref[0] = k.astype(kc_ref.dtype)
    vc_ref[0] = v.astype(vc_ref.dtype)

    # Fold softmax scale into q ([Tq, D] VPU mul instead of [H, Tq, Tk]).
    q = q * jnp.float32(1.0 / math.sqrt(dk))

    qh = _split_heads(q.astype(mm_dtype), num_heads, dk)     # [H, Tq, dk]
    kh = _split_heads(k.astype(mm_dtype), num_heads, dk)     # [H, Tk, dk]
    vh = _split_heads(v.astype(mm_dtype), num_heads, dk)     # [H, Tk, dk]
    Tk = kh.shape[1]

    # Flash-style online softmax over Tk chunks: only a [H, Tq, tk_chunk]
    # score/prob tile is live at any point (bounded VMEM at long sequences).
    neg = jnp.float32(-1e9)
    m_i = jnp.full((num_heads, Tq, 1), -jnp.inf, jnp.float32)
    l_i = jnp.zeros((num_heads, Tq, 1), jnp.float32)
    acc = jnp.zeros((num_heads, Tq, dk), jnp.float32)
    for c0 in range(0, Tk, tk_chunk):
        c1 = min(c0 + tk_chunk, Tk)
        s = jnp.einsum('hqd,hkd->hqk', qh, kh[:, c0:c1, :],
                       preferred_element_type=jnp.float32)   # [H,Tq,chunk]
        s = jnp.where(mask_bool[None, :, c0:c1], s, neg)
        m_new = jnp.maximum(m_i, jnp.max(s, axis=-1, keepdims=True))
        alpha = jnp.exp(m_i - m_new)
        p = jnp.exp(s - m_new)
        l_i = alpha * l_i + jnp.sum(p, axis=-1, keepdims=True)
        acc = alpha * acc + jnp.einsum('hqk,hkd->hqd', p.astype(mm_dtype),
                                       vh[:, c0:c1, :],
                                       preferred_element_type=jnp.float32)
        m_i = m_new

    ctx = (acc * pl.reciprocal(l_i, approx=True)).astype(mm_dtype)  # [H,Tq,dk]

    # Head-merge folded into the output projection: accumulate per-head
    # [Tq,dk] x [dk,D] matmuls in registers (no VMEM scratch / readback).
    out = jnp.zeros((Tq, D), jnp.float32)
    for hd in range(num_heads):
        out = out + jnp.dot(ctx[hd], wo_ref[hd],
                            preferred_element_type=jnp.float32)
    return x_f32 + out + bo_ref[...]


def _ffn_sublayer(x_f32, g_ref, b_ref, w1_ref, b1_ref, w2_ref, b2_ref,
                  *, dff_chunk):
    """x + W2 @ relu(W1 @ LN(x) + b1) + b2, chunked over Dff so only a
    [Tq, dff_chunk] activation tile is live."""
    Tq, D = x_f32.shape
    Dff = w1_ref.shape[1]
    mm_dtype = w1_ref.dtype
    h_mm = _layer_norm_f32(x_f32, g_ref[...], b_ref[...]).astype(mm_dtype)
    y = jnp.zeros((Tq, D), jnp.float32)
    # TODO(synk): for very large Dff on v7x (64 MiB VMEM), stream w1/w2 tiles
    # from HBM via pltpu.emit_pipeline instead of keeping them fully resident.
    for c0 in range(0, Dff, dff_chunk):
        c1 = min(c0 + dff_chunk, Dff)
        a = jnp.dot(h_mm, w1_ref[:, c0:c1],
                    preferred_element_type=jnp.float32) + b1_ref[:, c0:c1]
        a = jnp.maximum(a, 0.0)
        y = y + jnp.dot(a.astype(mm_dtype), w2_ref[c0:c1, :],
                        preferred_element_type=jnp.float32)
    return x_f32 + y + b2_ref[...]


# ----------------------------- fused kernel -------------------------------- #

def decoder_layer_kernel(
        # inputs (per batch element)
        x_ref, mem_ref, trg_mask_ref, src_mask_ref,
        # self-attn params
        s_g, s_b, s_wq, s_bq, s_wk, s_bk, s_wv, s_bv, s_wo, s_bo,
        # cross-attn params
        c_g, c_b, c_wq, c_bq, c_wk, c_bk, c_wv, c_bv, c_wo, c_bo,
        # ffn params
        f_g, f_b, f_w1, f_b1, f_w2, f_b2,
        # outputs
        out_ref, skc_ref, svc_ref, ekc_ref, evc_ref,
        *, num_heads, tk_chunk, dff_chunk):
    x = x_ref[0].astype(jnp.float32)            # [Tq, D] resident in VMEM
    mem = mem_ref[0]                            # [Ts, D]
    trg_mask = trg_mask_ref[0] != 0             # int8 -> bool, hoisted
    src_mask = src_mask_ref[0] != 0

    # Sublayer 1: pre-norm masked self-attention + residual (self K/V cache).
    x = _attention_sublayer(x, None, trg_mask,
                            s_g, s_b, s_wq, s_bq, s_wk, s_bk, s_wv, s_bv,
                            s_wo, s_bo, skc_ref, svc_ref,
                            num_heads=num_heads, tk_chunk=tk_chunk)
    # Sublayer 2: pre-norm cross-attention over memory + residual (enc cache).
    x = _attention_sublayer(x, mem, src_mask,
                            c_g, c_b, c_wq, c_bq, c_wk, c_bk, c_wv, c_bv,
                            c_wo, c_bo, ekc_ref, evc_ref,
                            num_heads=num_heads, tk_chunk=tk_chunk)
    # Sublayer 3: pre-norm position-wise feed-forward + residual.
    x = _ffn_sublayer(x, f_g, f_b, f_w1, f_b1, f_w2, f_b2,
                      dff_chunk=dff_chunk)

    out_ref[0] = x.astype(out_ref.dtype)


# ----------------------------- wrapper -------------------------------------- #

def _const_spec(shape):
    """Grid-invariant param: constant index_map + single buffer (no dead
    double-buffer VMEM for weights)."""
    n = len(shape)
    return pl.BlockSpec(shape, lambda b, _n=n: (0,) * _n,
                        pipeline_mode=pl.Buffered(1))


def _batch_spec(rows, cols):
    return pl.BlockSpec((1, rows, cols), lambda b: (b, 0, 0))


def _vmem_limit_bytes(Tq, Ts, D, Dff, H, tk_chunk, dff_chunk,
                      compute_dtype, x_dtype, cache_dtype):
    """Rough weights + activations VMEM estimate (with 2x margin)."""
    cdt = jnp.dtype(compute_dtype).itemsize
    xdt = jnp.dtype(x_dtype).itemsize
    kdt = jnp.dtype(cache_dtype).itemsize
    Tmax = max(Tq, Ts)
    weights = (8 * D * D + 2 * D * Dff) * cdt               # single-buffered
    small = (12 * D + 2 * Dff) * 4                          # biases / LN params
    io = 2 * ((Tq + Ts) * D * xdt                           # x, memory (2-buf)
              + (Tq * Tq + Tq * Ts)                         # int8 masks
              + Tq * D * xdt                                # out
              + 2 * (Tq + Ts) * D * kdt)                    # K/V caches
    live = (4 * H * Tq * min(tk_chunk, Tmax) * 4            # score/prob tiles
            + 10 * Tmax * D * 4                             # q/k/v/h/residuals
            + 2 * Tq * min(dff_chunk, Dff) * 4)             # FFN chunk
    return int(min(128 * 1024 * 1024,
                   2 * (weights + small + io + live) + (8 << 20)))


def transformer_decoder_layer(x, memory, src_mask, trg_mask, params, *,
                              num_heads, compute_dtype=jnp.bfloat16,
                              cache_dtype=jnp.bfloat16,
                              tk_chunk=512, dff_chunk=512):
    """Mirrors TransformerDecoderLayer.forward (shared-sublayer branch).

    Returns (x, new_enc_attn_cache, new_self_attn_cache); each cache is a
    (key, value) pair of per-head projections, shape [B, H, T_kv, d_k].
    """
    # TODO(synk): incoming enc_attn_cache / self_attn_cache are assumed None
    # (first decode step); concatenation with a prior cache is not modelled.
    # TODO(synk): the domain-specific Houlsby-adapter branch is not implemented.
    # TODO(synk): add a second parallel grid axis over Tq tiles so B=1 decode
    # still shards across both v7x TensorCores.
    B, Tq, D = x.shape
    Ts = memory.shape[1]
    dk = D // num_heads
    sa, ca, ff = params["self_attn"], params["cross_attn"], params["ffn"]
    Dff = ff["w1"].shape[1]

    cw = lambda w: w.astype(compute_dtype)          # bf16 MXU operands
    cb = lambda b: b.astype(jnp.float32)            # f32 bias / LN params
    wo_h = lambda wo: wo.reshape(num_heads, dk, D).astype(compute_dtype)

    # Masks shipped as int8 (4x less DMA/VMEM than f32); nonzero = keep.
    trg_i8 = (trg_mask != 0).astype(jnp.int8)
    src_i8 = (src_mask != 0).astype(jnp.int8)

    kernel = functools.partial(decoder_layer_kernel, num_heads=num_heads,
                               tk_chunk=tk_chunk, dff_chunk=dff_chunk)

    attn_param_specs = [
        _const_spec((1, D)), _const_spec((1, D)),            # ln gamma / beta
        _const_spec((D, D)), _const_spec((1, D)),            # Wq, bq
        _const_spec((D, D)), _const_spec((1, D)),            # Wk, bk
        _const_spec((D, D)), _const_spec((1, D)),            # Wv, bv
        _const_spec((num_heads, dk, D)), _const_spec((1, D)),  # Wo (per-head), bo
    ]
    ffn_param_specs = [
        _const_spec((1, D)), _const_spec((1, D)),
        _const_spec((D, Dff)), _const_spec((1, Dff)),
        _const_spec((Dff, D)), _const_spec((1, D)),
    ]
    in_specs = ([_batch_spec(Tq, D), _batch_spec(Ts, D),
                 _batch_spec(Tq, Tq), _batch_spec(Tq, Ts)]
                + attn_param_specs + attn_param_specs + ffn_param_specs)

    out_specs = [
        _batch_spec(Tq, D),     # x out
        _batch_spec(Tq, D),     # self-attn K cache (lane-dense)
        _batch_spec(Tq, D),     # self-attn V cache
        _batch_spec(Ts, D),     # cross-attn K cache
        _batch_spec(Ts, D),     # cross-attn V cache
    ]
    out_shapes = (
        jax.ShapeDtypeStruct((B, Tq, D), x.dtype),
        jax.ShapeDtypeStruct((B, Tq, D), cache_dtype),
        jax.ShapeDtypeStruct((B, Tq, D), cache_dtype),
        jax.ShapeDtypeStruct((B, Ts, D), cache_dtype),
        jax.ShapeDtypeStruct((B, Ts, D), cache_dtype),
    )

    vmem_bytes = _vmem_limit_bytes(Tq, Ts, D, Dff, num_heads, tk_chunk,
                                   dff_chunk, compute_dtype, x.dtype,
                                   cache_dtype)

    out, sk, sv, ek, ev = pl.pallas_call(
        kernel,
        out_shape=out_shapes,
        grid_spec=pltpu.PrefetchScalarGridSpec(
            num_scalar_prefetch=0, grid=(B,),
            in_specs=in_specs, out_specs=out_specs),
        compiler_params=pltpu.CompilerParams(
            dimension_semantics=("parallel",),
            vmem_limit_bytes=vmem_bytes),
    )(x, memory, trg_i8, src_i8,
      cb(sa["ln_g"]), cb(sa["ln_b"]), cw(sa["wq"]), cb(sa["bq"]),
      cw(sa["wk"]), cb(sa["bk"]), cw(sa["wv"]), cb(sa["bv"]),
      wo_h(sa["wo"]), cb(sa["bo"]),
      cb(ca["ln_g"]), cb(ca["ln_b"]), cw(ca["wq"]), cb(ca["bq"]),
      cw(ca["wk"]), cb(ca["bk"]), cw(ca["wv"]), cb(ca["bv"]),
      wo_h(ca["wo"]), cb(ca["bo"]),
      cb(ff["ln_g"]), cb(ff["ln_b"]), cw(ff["w1"]), cb(ff["b1"]),
      cw(ff["w2"]), cb(ff["b2"]))

    def to_head_layout(c, T):   # [B, T, D] -> [B, H, T, dk] (wrapper-side)
        return c.reshape(B, T, num_heads, dk).transpose(0, 2, 1, 3)

    enc_cache = (to_head_layout(ek, Ts), to_head_layout(ev, Ts))
    self_cache = (to_head_layout(sk, Tq), to_head_layout(sv, Tq))
    return out, enc_cache, self_cache


# ----------------------------- parameter init ------------------------------ #

def init_params(key, d_model, d_ff):
    def dense(k, fan_in, fan_out):
        return (jax.random.normal(k, (fan_in, fan_out), jnp.float32) * 0.02,
                jnp.zeros((1, fan_out), jnp.float32))

    keys = jax.random.split(key, 12)

    def attn_params(ks):
        wq, bq = dense(ks[0], d_model, d_model)
        wk, bk = dense(ks[1], d_model, d_model)
        wv, bv = dense(ks[2], d_model, d_model)
        wo, bo = dense(ks[3], d_model, d_model)
        return dict(wq=wq, bq=bq, wk=wk, bk=bk, wv=wv, bv=bv, wo=wo, bo=bo,
                    ln_g=jnp.ones((1, d_model), jnp.float32),
                    ln_b=jnp.zeros((1, d_model), jnp.float32))

    w1, b1 = dense(keys[8], d_model, d_ff)
    w2, b2 = dense(keys[9], d_ff, d_model)
    return dict(
        self_attn=attn_params(keys[0:4]),
        cross_attn=attn_params(keys[4:8]),
        ffn=dict(w1=w1, b1=b1, w2=w2, b2=b2,
                 ln_g=jnp.ones((1, d_model), jnp.float32),
                 ln_b=jnp.zeros((1, d_model), jnp.float32)),
    )


# ----------------------------- main ----------------------------------------- #

if __name__ == "__main__":
    B, Tq, Ts, D, H, Dff = 2, 8, 16, 32, 4, 64

    key = jax.random.PRNGKey(0)
    k_x, k_m, k_p = jax.random.split(key, 3)
    x = jax.random.normal(k_x, (B, Tq, D), jnp.float32)
    memory = jax.random.normal(k_m, (B, Ts, D), jnp.float32)
    params = init_params(k_p, D, Dff)

    # causal target mask [B, Tq, Tq]; full source mask [B, Tq, Ts]
    trg_mask = jnp.broadcast_to(
        jnp.tril(jnp.ones((Tq, Tq), jnp.float32)), (B, Tq, Tq))
    src_mask = jnp.ones((B, Tq, Ts), jnp.float32)

    out, enc_cache, self_cache = transformer_decoder_layer(
        x, memory, src_mask, trg_mask, params, num_heads=H)

    jax.block_until_ready((out, enc_cache, self_cache))
    assert out.shape == (B, Tq, D)
    assert enc_cache[0].shape == (B, H, Ts, D // H)
    assert self_cache[0].shape == (B, H, Tq, D // H)
    print("KERNEL_OK")
</pallas_src>

<mosaic_0001>
module attributes {stable_mosaic.version = 11 : i64} {
  func.func @decoder_layer_kernel(%arg0: i32, %arg1: memref<1x8x32xf32, #tpu.memory_space<vmem>>, %arg2: memref<1x16x32xf32, #tpu.memory_space<vmem>>, %arg3: memref<1x8x8xi8, #tpu.memory_space<vmem>>, %arg4: memref<1x8x16xi8, #tpu.memory_space<vmem>>, %arg5: memref<1x32xf32, #tpu.memory_space<vmem>>, %arg6: memref<1x32xf32, #tpu.memory_space<vmem>>, %arg7: memref<32x32xbf16, #tpu.memory_space<vmem>>, %arg8: memref<1x32xf32, #tpu.memory_space<vmem>>, %arg9: memref<32x32xbf16, #tpu.memory_space<vmem>>, %arg10: memref<1x32xf32, #tpu.memory_space<vmem>>, %arg11: memref<32x32xbf16, #tpu.memory_space<vmem>>, %arg12: memref<1x32xf32, #tpu.memory_space<vmem>>, %arg13: memref<4x8x32xbf16, #tpu.memory_space<vmem>>, %arg14: memref<1x32xf32, #tpu.memory_space<vmem>>, %arg15: memref<1x32xf32, #tpu.memory_space<vmem>>, %arg16: memref<1x32xf32, #tpu.memory_space<vmem>>, %arg17: memref<32x32xbf16, #tpu.memory_space<vmem>>, %arg18: memref<1x32xf32, #tpu.memory_space<vmem>>, %arg19: memref<32x32xbf16, #tpu.memory_space<vmem>>, %arg20: memref<1x32xf32, #tpu.memory_space<vmem>>, %arg21: memref<32x32xbf16, #tpu.memory_space<vmem>>, %arg22: memref<1x32xf32, #tpu.memory_space<vmem>>, %arg23: memref<4x8x32xbf16, #tpu.memory_space<vmem>>, %arg24: memref<1x32xf32, #tpu.memory_space<vmem>>, %arg25: memref<1x32xf32, #tpu.memory_space<vmem>>, %arg26: memref<1x32xf32, #tpu.memory_space<vmem>>, %arg27: memref<32x64xbf16, #tpu.memory_space<vmem>>, %arg28: memref<1x64xf32, #tpu.memory_space<vmem>>, %arg29: memref<64x32xbf16, #tpu.memory_space<vmem>>, %arg30: memref<1x32xf32, #tpu.memory_space<vmem>>, %arg31: memref<1x8x32xf32, #tpu.memory_space<vmem>>, %arg32: memref<1x8x32xbf16, #tpu.memory_space<vmem>>, %arg33: memref<1x8x32xbf16, #tpu.memory_space<vmem>>, %arg34: memref<1x16x32xbf16, #tpu.memory_space<vmem>>, %arg35: memref<1x16x32xbf16, #tpu.memory_space<vmem>>) attributes {dimension_semantics = [#tpu.dimension_semantics<parallel>], iteration_bounds = array<i64: 2>, scalar_prefetch = 0 : i64, scratch_operands = 0 : i64, tpu.core_type = #tpu.core_type<tc>, window_params = [{transform_indices = @transform_0, window_bounds = array<i64: 1, 8, 32>}, {transform_indices = @transform_1, window_bounds = array<i64: 1, 16, 32>}, {transform_indices = @transform_2, window_bounds = array<i64: 1, 8, 8>}, {transform_indices = @transform_3, window_bounds = array<i64: 1, 8, 16>}, {pipeline_mode = #tpu.pipeline_mode<synchronous>, transform_indices = @transform_4, window_bounds = array<i64: 1, 32>}, {pipeline_mode = #tpu.pipeline_mode<synchronous>, transform_indices = @transform_5, window_bounds = array<i64: 1, 32>}, {pipeline_mode = #tpu.pipeline_mode<synchronous>, transform_indices = @transform_6, window_bounds = array<i64: 32, 32>}, {pipeline_mode = #tpu.pipeline_mode<synchronous>, transform_indices = @transform_7, window_bounds = array<i64: 1, 32>}, {pipeline_mode = #tpu.pipeline_mode<synchronous>, transform_indices = @transform_8, window_bounds = array<i64: 32, 32>}, {pipeline_mode = #tpu.pipeline_mode<synchronous>, transform_indices = @transform_9, window_bounds = array<i64: 1, 32>}, {pipeline_mode = #tpu.pipeline_mode<synchronous>, transform_indices = @transform_10, window_bounds = array<i64: 32, 32>}, {pipeline_mode = #tpu.pipeline_mode<synchronous>, transform_indices = @transform_11, window_bounds = array<i64: 1, 32>}, {pipeline_mode = #tpu.pipeline_mode<synchronous>, transform_indices = @transform_12, window_bounds = array<i64: 4, 8, 32>}, {pipeline_mode = #tpu.pipeline_mode<synchronous>, transform_indices = @transform_13, window_bounds = array<i64: 1, 32>}, {pipeline_mode = #tpu.pipeline_mode<synchronous>, transform_indices = @transform_14, window_bounds = array<i64: 1, 32>}, {pipeline_mode = #tpu.pipeline_mode<synchronous>, transform_indices = @transform_15, window_bounds = array<i64: 1, 32>}, {pipeline_mode = #tpu.pipeline_mode<synchronous>, transform_indices = @transform_16, window_bounds = array<i64: 32, 32>}, {pipeline_mode = #tpu.pipeline_mode<synchronous>, transform_indices = @transform_17, window_bounds = array<i64: 1, 32>}, {pipeline_mode = #tpu.pipeline_mode<synchronous>, transform_indices = @transform_18, window_bounds = array<i64: 32, 32>}, {pipeline_mode = #tpu.pipeline_mode<synchronous>, transform_indices = @transform_19, window_bounds = array<i64: 1, 32>}, {pipeline_mode = #tpu.pipeline_mode<synchronous>, transform_indices = @transform_20, window_bounds = array<i64: 32, 32>}, {pipeline_mode = #tpu.pipeline_mode<synchronous>, transform_indices = @transform_21, window_bounds = array<i64: 1, 32>}, {pipeline_mode = #tpu.pipeline_mode<synchronous>, transform_indices = @transform_22, window_bounds = array<i64: 4, 8, 32>}, {pipeline_mode = #tpu.pipeline_mode<synchronous>, transform_indices = @transform_23, window_bounds = array<i64: 1, 32>}, {pipeline_mode = #tpu.pipeline_mode<synchronous>, transform_indices = @transform_24, window_bounds = array<i64: 1, 32>}, {pipeline_mode = #tpu.pipeline_mode<synchronous>, transform_indices = @transform_25, window_bounds = array<i64: 1, 32>}, {pipeline_mode = #tpu.pipeline_mode<synchronous>, transform_indices = @transform_26, window_bounds = array<i64: 32, 64>}, {pipeline_mode = #tpu.pipeline_mode<synchronous>, transform_indices = @transform_27, window_bounds = array<i64: 1, 64>}, {pipeline_mode = #tpu.pipeline_mode<synchronous>, transform_indices = @transform_28, window_bounds = array<i64: 64, 32>}, {pipeline_mode = #tpu.pipeline_mode<synchronous>, transform_indices = @transform_29, window_bounds = array<i64: 1, 32>}, {transform_indices = @transform_30, window_bounds = array<i64: 1, 8, 32>}, {transform_indices = @transform_31, window_bounds = array<i64: 1, 8, 32>}, {transform_indices = @transform_32, window_bounds = array<i64: 1, 8, 32>}, {transform_indices = @transform_33, window_bounds = array<i64: 1, 16, 32>}, {transform_indices = @transform_34, window_bounds = array<i64: 1, 16, 32>}]} {
    %c0 = arith.constant 0 : index
    %c0_0 = arith.constant 0 : index
    %c0_1 = arith.constant 0 : index
    %0 = vector.load %arg1[%c0, %c0_0, %c0_1] : memref<1x8x32xf32, #tpu.memory_space<vmem>>, vector<1x8x32xf32>
    %1 = vector.shape_cast %0 : vector<1x8x32xf32> to vector<8x32xf32>
    %c0_2 = arith.constant 0 : index
    %c0_3 = arith.constant 0 : index
    %c0_4 = arith.constant 0 : index
    %2 = vector.load %arg2[%c0_2, %c0_3, %c0_4] : memref<1x16x32xf32, #tpu.memory_space<vmem>>, vector<1x16x32xf32>
    %3 = vector.shape_cast %2 : vector<1x16x32xf32> to vector<16x32xf32>
    %c0_5 = arith.constant 0 : index
    %c0_6 = arith.constant 0 : index
    %c0_7 = arith.constant 0 : index
    %4 = vector.load %arg3[%c0_5, %c0_6, %c0_7] : memref<1x8x8xi8, #tpu.memory_space<vmem>>, vector<1x8x8xi8>
    %5 = vector.shape_cast %4 : vector<1x8x8xi8> to vector<8x8xi8>
    %c0_i8 = arith.constant 0 : i8
    %6 = vector.broadcast %c0_i8 : i8 to vector<8x8xi8>
    %7 = arith.cmpi ne, %5, %6 : vector<8x8xi8>
    %c0_8 = arith.constant 0 : index
    %c0_9 = arith.constant 0 : index
    %c0_10 = arith.constant 0 : index
    %8 = vector.load %arg4[%c0_8, %c0_9, %c0_10] : memref<1x8x16xi8, #tpu.memory_space<vmem>>, vector<1x8x16xi8>
    %9 = vector.shape_cast %8 : vector<1x8x16xi8> to vector<8x16xi8>
    %c0_i8_11 = arith.constant 0 : i8
    %10 = vector.broadcast %c0_i8_11 : i8 to vector<8x16xi8>
    %11 = arith.cmpi ne, %9, %10 : vector<8x16xi8>
    %c0_12 = arith.constant 0 : index
    %c0_13 = arith.constant 0 : index
    %12 = vector.load %arg5[%c0_12, %c0_13] : memref<1x32xf32, #tpu.memory_space<vmem>>, vector<1x32xf32>
    %c0_14 = arith.constant 0 : index
    %c0_15 = arith.constant 0 : index
    %13 = vector.load %arg6[%c0_14, %c0_15] : memref<1x32xf32, #tpu.memory_space<vmem>>, vector<1x32xf32>
    %cst = arith.constant dense<0.000000e+00> : vector<8xf32>
    %14 = vector.multi_reduction <add>, %1, %cst [1] : vector<8x32xf32> to vector<8xf32>
    %15 = vector.shape_cast %14 : vector<8xf32> to vector<8x1xf32>
    %cst_16 = arith.constant 3.200000e+01 : f32
    %16 = vector.broadcast %cst_16 : f32 to vector<8x1xf32>
    %17 = arith.divf %15, %16 : vector<8x1xf32>
    %18 = vector.broadcast %17 : vector<8x1xf32> to vector<8x32xf32>
    %19 = arith.subf %1, %18 : vector<8x32xf32>
    %20 = arith.mulf %19, %19 : vector<8x32xf32>
    %cst_17 = arith.constant dense<0.000000e+00> : vector<8xf32>
    %21 = vector.multi_reduction <add>, %20, %cst_17 [1] : vector<8x32xf32> to vector<8xf32>
    %22 = vector.shape_cast %21 : vector<8xf32> to vector<8x1xf32>
    %cst_18 = arith.constant 3.200000e+01 : f32
    %23 = vector.broadcast %cst_18 : f32 to vector<8x1xf32>
    %24 = arith.divf %22, %23 : vector<8x1xf32>
    %cst_19 = arith.constant 9.99999997E-7 : f32
    %25 = vector.broadcast %cst_19 : f32 to vector<8x1xf32>
    %26 = arith.addf %24, %25 : vector<8x1xf32>
    %27 = math.rsqrt %26 : vector<8x1xf32>
    %28 = vector.broadcast %17 : vector<8x1xf32> to vector<8x32xf32>
    %29 = arith.subf %1, %28 : vector<8x32xf32>
    %30 = vector.broadcast %27 : vector<8x1xf32> to vector<8x32xf32>
    %31 = arith.mulf %29, %30 : vector<8x32xf32>
    %32 = vector.broadcast %12 : vector<1x32xf32> to vector<8x32xf32>
    %33 = arith.mulf %31, %32 : vector<8x32xf32>
    %34 = vector.broadcast %13 : vector<1x32xf32> to vector<8x32xf32>
    %35 = arith.addf %33, %34 : vector<8x32xf32>
    %36 = arith.truncf %35 : vector<8x32xf32> to vector<8x32xbf16>
    %c0_20 = arith.constant 0 : index
    %c0_21 = arith.constant 0 : index
    %37 = vector.load %arg7[%c0_20, %c0_21] : memref<32x32xbf16, #tpu.memory_space<vmem>>, vector<32x32xbf16>
    %cst_22 = arith.constant dense<0.000000e+00> : vector<8x32xf32>
    %38 = tpu.matmul %36, %37, %cst_22 {dimension_numbers = #tpu.dot_dimension_numbers<[1], [0], [0], [1], [0, 0, 1, 1], [], []>} : vector<8x32xbf16>, vector<32x32xbf16>, vector<8x32xf32> -> vector<8x32xf32>
    %c0_23 = arith.constant 0 : index
    %c0_24 = arith.constant 0 : index
    %39 = vector.load %arg8[%c0_23, %c0_24] : memref<1x32xf32, #tpu.memory_space<vmem>>, vector<1x32xf32>
    %40 = vector.broadcast %39 : vector<1x32xf32> to vector<8x32xf32>
    %41 = arith.addf %38, %40 : vector<8x32xf32>
    %c0_25 = arith.constant 0 : index
    %c0_26 = arith.constant 0 : index
    %42 = vector.load %arg9[%c0_25, %c0_26] : memref<32x32xbf16, #tpu.memory_space<vmem>>, vector<32x32xbf16>
    %cst_27 = arith.constant dense<0.000000e+00> : vector<8x32xf32>
    %43 = tpu.matmul %36, %42, %cst_27 {dimension_numbers = #tpu.dot_dimension_numbers<[1], [0], [0], [1], [0, 0, 1, 1], [], []>} : vector<8x32xbf16>, vector<32x32xbf16>, vector<8x32xf32> -> vector<8x32xf32>
    %c0_28 = arith.constant 0 : index
    %c0_29 = arith.constant 0 : index
    %44 = vector.load %arg10[%c0_28, %c0_29] : memref<1x32xf32, #tpu.memory_space<vmem>>, vector<1x32xf32>
    %45 = vector.broadcast %44 : vector<1x32xf32> to vector<8x32xf32>
    %46 = arith.addf %43, %45 : vector<8x32xf32>
    %c0_30 = arith.constant 0 : index
    %c0_31 = arith.constant 0 : index
    %47 = vector.load %arg11[%c0_30, %c0_31] : memref<32x32xbf16, #tpu.memory_space<vmem>>, vector<32x32xbf16>
    %cst_32 = arith.constant dense<0.000000e+00> : vector<8x32xf32>
    %48 = tpu.matmul %36, %47, %cst_32 {dimension_numbers = #tpu.dot_dimension_numbers<[1], [0], [0], [1], [0, 0, 1, 1], [], []>} : vector<8x32xbf16>, vector<32x32xbf16>, vector<8x32xf32> -> vector<8x32xf32>
    %c0_33 = arith.constant 0 : index
    %c0_34 = arith.constant 0 : index
    %49 = vector.load %arg12[%c0_33, %c0_34] : memref<1x32xf32, #tpu.memory_space<vmem>>, vector<1x32xf32>
    %50 = vector.broadcast %49 : vector<1x32xf32> to vector<8x32xf32>
    %51 = arith.addf %48, %50 : vector<8x32xf32>
    %52 = arith.truncf %46 : vector<8x32xf32> to vector<8x32xbf16>
    %c0_35 = arith.constant 0 : index
    %c0_36 = arith.constant 0 : index
    %c0_37 = arith.constant 0 : index
    %53 = vector.load %arg32[%c0_35, %c0_36, %c0_37] : memref<1x8x32xbf16, #tpu.memory_space<vmem>>, vector<1x8x32xbf16>
    %54 = vector.shape_cast %53 : vector<1x8x32xbf16> to vector<8x32xbf16>
    %55 = vector.shape_cast %52 : vector<8x32xbf16> to vector<1x8x32xbf16>
    tpu.vector_store %arg32[%c0_35, %c0_36, %c0_37], %55 {strides = array<i32>} : memref<1x8x32xbf16, #tpu.memory_space<vmem>>, vector<1x8x32xbf16>,
    %56 = arith.truncf %51 : vector<8x32xf32> to vector<8x32xbf16>
    %c0_38 = arith.constant 0 : index
    %c0_39 = arith.constant 0 : index
    %c0_40 = arith.constant 0 : index
    %57 = vector.load %arg33[%c0_38, %c0_39, %c0_40] : memref<1x8x32xbf16, #tpu.memory_space<vmem>>, vector<1x8x32xbf16>
    %58 = vector.shape_cast %57 : vector<1x8x32xbf16> to vector<8x32xbf16>
    %59 = vector.shape_cast %56 : vector<8x32xbf16> to vector<1x8x32xbf16>
    tpu.vector_store %arg33[%c0_38, %c0_39, %c0_40], %59 {strides = array<i32>} : memref<1x8x32xbf16, #tpu.memory_space<vmem>>, vector<1x8x32xbf16>,
    %cst_41 = arith.constant 0.353553385 : f32
    %60 = vector.broadcast %cst_41 : f32 to vector<8x32xf32>
    %61 = arith.mulf %41, %60 : vector<8x32xf32>
    %62 = arith.truncf %61 : vector<8x32xf32> to vector<8x32xbf16>
    %63 = vector.extract_strided_slice %62 {offsets = [0, 0], sizes = [8, 8], strides = [1, 1]} : vector<8x32xbf16> to vector<8x8xbf16>
    %64 = vector.extract_strided_slice %62 {offsets = [0, 8], sizes = [8, 8], strides = [1, 1]} : vector<8x32xbf16> to vector<8x8xbf16>
    %65 = vector.extract_strided_slice %62 {offsets = [0, 16], sizes = [8, 8], strides = [1, 1]} : vector<8x32xbf16> to vector<8x8xbf16>
    %66 = vector.extract_strided_slice %62 {offsets = [0, 24], sizes = [8, 8], strides = [1, 1]} : vector<8x32xbf16> to vector<8x8xbf16>
    %67 = vector.shape_cast %63 : vector<8x8xbf16> to vector<1x8x8xbf16>
    %68 = vector.shape_cast %64 : vector<8x8xbf16> to vector<1x8x8xbf16>
    %69 = vector.shape_cast %65 : vector<8x8xbf16> to vector<1x8x8xbf16>
    %70 = vector.shape_cast %66 : vector<8x8xbf16> to vector<1x8x8xbf16>
    %71 = tpu.concatenate %67, %68, %69, %70 in 0 : vector<1x8x8xbf16>, vector<1x8x8xbf16>, vector<1x8x8xbf16>, vector<1x8x8xbf16> -> vector<4x8x8xbf16>
    %72 = arith.truncf %46 : vector<8x32xf32> to vector<8x32xbf16>
    %73 = vector.extract_strided_slice %72 {offsets = [0, 0], sizes = [8, 8], strides = [1, 1]} : vector<8x32xbf16> to vector<8x8xbf16>
    %74 = vector.extract_strided_slice %72 {offsets = [0, 8], sizes = [8, 8], strides = [1, 1]} : vector<8x32xbf16> to vector<8x8xbf16>
    %75 = vector.extract_strided_slice %72 {offsets = [0, 16], sizes = [8, 8], strides = [1, 1]} : vector<8x32xbf16> to vector<8x8xbf16>
    %76 = vector.extract_strided_slice %72 {offsets = [0, 24], sizes = [8, 8], strides = [1, 1]} : vector<8x32xbf16> to vector<8x8xbf16>
    %77 = vector.shape_cast %73 : vector<8x8xbf16> to vector<1x8x8xbf16>
    %78 = vector.shape_cast %74 : vector<8x8xbf16> to vector<1x8x8xbf16>
    %79 = vector.shape_cast %75 : vector<8x8xbf16> to vector<1x8x8xbf16>
    %80 = vector.shape_cast %76 : vector<8x8xbf16> to vector<1x8x8xbf16>
    %81 = tpu.concatenate %77, %78, %79, %80 in 0 : vector<1x8x8xbf16>, vector<1x8x8xbf16>, vector<1x8x8xbf16>, vector<1x8x8xbf16> -> vector<4x8x8xbf16>
    %82 = arith.truncf %51 : vector<8x32xf32> to vector<8x32xbf16>
    %83 = vector.extract_strided_slice %82 {offsets = [0, 0], sizes = [8, 8], strides = [1, 1]} : vector<8x32xbf16> to vector<8x8xbf16>
    %84 = vector.extract_strided_slice %82 {offsets = [0, 8], sizes = [8, 8], strides = [1, 1]} : vector<8x32xbf16> to vector<8x8xbf16>
    %85 = vector.extract_strided_slice %82 {offsets = [0, 16], sizes = [8, 8], strides = [1, 1]} : vector<8x32xbf16> to vector<8x8xbf16>
    %86 = vector.extract_strided_slice %82 {offsets = [0, 24], sizes = [8, 8], strides = [1, 1]} : vector<8x32xbf16> to vector<8x8xbf16>
    %87 = vector.shape_cast %83 : vector<8x8xbf16> to vector<1x8x8xbf16>
    %88 = vector.shape_cast %84 : vector<8x8xbf16> to vector<1x8x8xbf16>
    %89 = vector.shape_cast %85 : vector<8x8xbf16> to vector<1x8x8xbf16>
    %90 = vector.shape_cast %86 : vector<8x8xbf16> to vector<1x8x8xbf16>
    %91 = tpu.concatenate %87, %88, %89, %90 in 0 : vector<1x8x8xbf16>, vector<1x8x8xbf16>, vector<1x8x8xbf16>, vector<1x8x8xbf16> -> vector<4x8x8xbf16>
    %cst_42 = arith.constant 0xFF800000 : f32
    %92 = vector.broadcast %cst_42 : f32 to vector<4x8x1xf32>
    %cst_43 = arith.constant 0.000000e+00 : f32
    %93 = vector.broadcast %cst_43 : f32 to vector<4x8x1xf32>
    %cst_44 = arith.constant 0.000000e+00 : f32
    %94 = vector.broadcast %cst_44 : f32 to vector<4x8x8xf32>
    "tpu.trace_start"() <{level = 10 : i32, message = "hqd,hkd->hqk"}> : () -> ()
    %cst_45 = arith.constant dense<0.000000e+00> : vector<4x8x8xf32>
    %95 = tpu.matmul %71, %81, %cst_45 {dimension_numbers = #tpu.dot_dimension_numbers<[2], [2], [1], [1], [0, 0, 0, 1, 1, 1], [0], [0]>} : vector<4x8x8xbf16>, vector<4x8x8xbf16>, vector<4x8x8xf32> -> vector<4x8x8xf32>
    "tpu.trace_stop"() : () -> ()
    %96 = vector.shape_cast %7 : vector<8x8xi1> to vector<1x8x8xi1>
    %cst_46 = arith.constant -1.000000e+09 : f32
    %97 = vector.shape_cast %96 : vector<1x8x8xi1> to vector<1x8x8xi1>
    %98 = vector.broadcast %97 : vector<1x8x8xi1> to vector<4x8x8xi1>
    %99 = vector.broadcast %cst_46 : f32 to vector<4x8x8xf32>
    %100 = arith.select %98, %95, %99 : vector<4x8x8xi1>, vector<4x8x8xf32>
    %cst_47 = arith.constant dense<0xFF800000> : vector<4x8xf32>
    %101 = vector.multi_reduction <maximumf>, %100, %cst_47 [2] : vector<4x8x8xf32> to vector<4x8xf32>
    %102 = vector.shape_cast %101 : vector<4x8xf32> to vector<4x8x1xf32>
    %103 = arith.maximumf %92, %102 : vector<4x8x1xf32>
    %104 = arith.subf %92, %103 : vector<4x8x1xf32>
    %105 = math.exp %104 : vector<4x8x1xf32>
    %106 = vector.broadcast %103 : vector<4x8x1xf32> to vector<4x8x8xf32>
    %107 = arith.subf %100, %106 : vector<4x8x8xf32>
    %108 = math.exp %107 : vector<4x8x8xf32>
    %109 = arith.mulf %105, %93 : vector<4x8x1xf32>
    %cst_48 = arith.constant dense<0.000000e+00> : vector<4x8xf32>
    %110 = vector.multi_reduction <add>, %108, %cst_48 [2] : vector<4x8x8xf32> to vector<4x8xf32>
    %111 = vector.shape_cast %110 : vector<4x8xf32> to vector<4x8x1xf32>
    %112 = arith.addf %109, %111 : vector<4x8x1xf32>
    %113 = vector.broadcast %105 : vector<4x8x1xf32> to vector<4x8x8xf32>
    %114 = arith.mulf %113, %94 : vector<4x8x8xf32>
    %115 = arith.truncf %108 : vector<4x8x8xf32> to vector<4x8x8xbf16>
    "tpu.trace_start"() <{level = 10 : i32, message = "hqk,hkd->hqd"}> : () -> ()
    %cst_49 = arith.constant dense<0.000000e+00> : vector<4x8x8xf32>
    %116 = tpu.matmul %115, %91, %cst_49 {dimension_numbers = #tpu.dot_dimension_numbers<[2], [1], [1], [2], [0, 0, 0, 1, 1, 2], [0], [0]>} : vector<4x8x8xbf16>, vector<4x8x8xbf16>, vector<4x8x8xf32> -> vector<4x8x8xf32>
    "tpu.trace_stop"() : () -> ()
    %117 = arith.addf %114, %116 : vector<4x8x8xf32>
    %118 = tpu.reciprocal %112 {approx = true} : vector<4x8x1xf32> -> vector<4x8x1xf32>
    %119 = vector.broadcast %118 : vector<4x8x1xf32> to vector<4x8x8xf32>
    %120 = arith.mulf %117, %119 : vector<4x8x8xf32>
    %121 = arith.truncf %120 : vector<4x8x8xf32> to vector<4x8x8xbf16>
    %cst_50 = arith.constant 0.000000e+00 : f32
    %122 = vector.broadcast %cst_50 : f32 to vector<8x32xf32>
    %123 = vector.extract_strided_slice %121 {offsets = [0, 0, 0], sizes = [1, 8, 8], strides = [1, 1, 1]} : vector<4x8x8xbf16> to vector<1x8x8xbf16>
    %124 = vector.shape_cast %123 : vector<1x8x8xbf16> to vector<8x8xbf16>
    %c0_51 = arith.constant 0 : index
    %c0_52 = arith.constant 0 : index
    %c0_53 = arith.constant 0 : index
    %125 = vector.load %arg13[%c0_51, %c0_52, %c0_53] : memref<4x8x32xbf16, #tpu.memory_space<vmem>>, vector<1x8x32xbf16>
    %126 = vector.shape_cast %125 : vector<1x8x32xbf16> to vector<8x32xbf16>
    %cst_54 = arith.constant dense<0.000000e+00> : vector<8x32xf32>
    %127 = tpu.matmul %124, %126, %cst_54 {dimension_numbers = #tpu.dot_dimension_numbers<[1], [0], [0], [1], [0, 0, 1, 1], [], []>} : vector<8x8xbf16>, vector<8x32xbf16>, vector<8x32xf32> -> vector<8x32xf32>
    %128 = arith.addf %122, %127 : vector<8x32xf32>
    %129 = vector.extract_strided_slice %121 {offsets = [1, 0, 0], sizes = [1, 8, 8], strides = [1, 1, 1]} : vector<4x8x8xbf16> to vector<1x8x8xbf16>
    %130 = vector.shape_cast %129 : vector<1x8x8xbf16> to vector<8x8xbf16>
    %c1 = arith.constant 1 : index
    %c0_55 = arith.constant 0 : index
    %c0_56 = arith.constant 0 : index
    %131 = vector.load %arg13[%c1, %c0_55, %c0_56] : memref<4x8x32xbf16, #tpu.memory_space<vmem>>, vector<1x8x32xbf16>
    %132 = vector.shape_cast %131 : vector<1x8x32xbf16> to vector<8x32xbf16>
    %cst_57 = arith.constant dense<0.000000e+00> : vector<8x32xf32>
    %133 = tpu.matmul %130, %132, %cst_57 {dimension_numbers = #tpu.dot_dimension_numbers<[1], [0], [0], [1], [0, 0, 1, 1], [], []>} : vector<8x8xbf16>, vector<8x32xbf16>, vector<8x32xf32> -> vector<8x32xf32>
    %134 = arith.addf %128, %133 : vector<8x32xf32>
    %135 = vector.extract_strided_slice %121 {offsets = [2, 0, 0], sizes = [1, 8, 8], strides = [1, 1, 1]} : vector<4x8x8xbf16> to vector<1x8x8xbf16>
    %136 = vector.shape_cast %135 : vector<1x8x8xbf16> to vector<8x8xbf16>
    %c2 = arith.constant 2 : index
    %c0_58 = arith.constant 0 : index
    %c0_59 = arith.constant 0 : index
    %137 = vector.load %arg13[%c2, %c0_58, %c0_59] : memref<4x8x32xbf16, #tpu.memory_space<vmem>>, vector<1x8x32xbf16>
    %138 = vector.shape_cast %137 : vector<1x8x32xbf16> to vector<8x32xbf16>
    %cst_60 = arith.constant dense<0.000000e+00> : vector<8x32xf32>
    %139 = tpu.matmul %136, %138, %cst_60 {dimension_numbers = #tpu.dot_dimension_numbers<[1], [0], [0], [1], [0, 0, 1, 1], [], []>} : vector<8x8xbf16>, vector<8x32xbf16>, vector<8x32xf32> -> vector<8x32xf32>
    %140 = arith.addf %134, %139 : vector<8x32xf32>
    %141 = vector.extract_strided_slice %121 {offsets = [3, 0, 0], sizes = [1, 8, 8], strides = [1, 1, 1]} : vector<4x8x8xbf16> to vector<1x8x8xbf16>
    %142 = vector.shape_cast %141 : vector<1x8x8xbf16> to vector<8x8xbf16>
    %c3 = arith.constant 3 : index
    %c0_61 = arith.constant 0 : index
    %c0_62 = arith.constant 0 : index
    %143 = vector.load %arg13[%c3, %c0_61, %c0_62] : memref<4x8x32xbf16, #tpu.memory_space<vmem>>, vector<1x8x32xbf16>
    %144 = vector.shape_cast %143 : vector<1x8x32xbf16> to vector<8x32xbf16>
    %cst_63 = arith.constant dense<0.000000e+00> : vector<8x32xf32>
    %145 = tpu.matmul %142, %144, %cst_63 {dimension_numbers = #tpu.dot_dimension_numbers<[1], [0], [0], [1], [0, 0, 1, 1], [], []>} : vector<8x8xbf16>, vector<8x32xbf16>, vector<8x32xf32> -> vector<8x32xf32>
    %146 = arith.addf %140, %145 : vector<8x32xf32>
    %147 = arith.addf %1, %146 : vector<8x32xf32>
    %c0_64 = arith.constant 0 : index
    %c0_65 = arith.constant 0 : index
    %148 = vector.load %arg14[%c0_64, %c0_65] : memref<1x32xf32, #tpu.memory_space<vmem>>, vector<1x32xf32>
    %149 = vector.broadcast %148 : vector<1x32xf32> to vector<8x32xf32>
    %150 = arith.addf %147, %149 : vector<8x32xf32>
    %c0_66 = arith.constant 0 : index
    %c0_67 = arith.constant 0 : index
    %151 = vector.load %arg15[%c0_66, %c0_67] : memref<1x32xf32, #tpu.memory_space<vmem>>, vector<1x32xf32>
    %c0_68 = arith.constant 0 : index
    %c0_69 = arith.constant 0 : index
    %152 = vector.load %arg16[%c0_68, %c0_69] : memref<1x32xf32, #tpu.memory_space<vmem>>, vector<1x32xf32>
    %cst_70 = arith.constant dense<0.000000e+00> : vector<8xf32>
    %153 = vector.multi_reduction <add>, %150, %cst_70 [1] : vector<8x32xf32> to vector<8xf32>
    %154 = vector.shape_cast %153 : vector<8xf32> to vector<8x1xf32>
    %cst_71 = arith.constant 3.200000e+01 : f32
    %155 = vector.broadcast %cst_71 : f32 to vector<8x1xf32>
    %156 = arith.divf %154, %155 : vector<8x1xf32>
    %157 = vector.broadcast %156 : vector<8x1xf32> to vector<8x32xf32>
    %158 = arith.subf %150, %157 : vector<8x32xf32>
    %159 = arith.mulf %158, %158 : vector<8x32xf32>
    %cst_72 = arith.constant dense<0.000000e+00> : vector<8xf32>
    %160 = vector.multi_reduction <add>, %159, %cst_72 [1] : vector<8x32xf32> to vector<8xf32>
    %161 = vector.shape_cast %160 : vector<8xf32> to vector<8x1xf32>
    %cst_73 = arith.constant 3.200000e+01 : f32
    %162 = vector.broadcast %cst_73 : f32 to vector<8x1xf32>
    %163 = arith.divf %161, %162 : vector<8x1xf32>
    %cst_74 = arith.constant 9.99999997E-7 : f32
    %164 = vector.broadcast %cst_74 : f32 to vector<8x1xf32>
    %165 = arith.addf %163, %164 : vector<8x1xf32>
    %166 = math.rsqrt %165 : vector<8x1xf32>
    %167 = vector.broadcast %156 : vector<8x1xf32> to vector<8x32xf32>
    %168 = arith.subf %150, %167 : vector<8x32xf32>
    %169 = vector.broadcast %166 : vector<8x1xf32> to vector<8x32xf32>
    %170 = arith.mulf %168, %169 : vector<8x32xf32>
    %171 = vector.broadcast %151 : vector<1x32xf32> to vector<8x32xf32>
    %172 = arith.mulf %170, %171 : vector<8x32xf32>
    %173 = vector.broadcast %152 : vector<1x32xf32> to vector<8x32xf32>
    %174 = arith.addf %172, %173 : vector<8x32xf32>
    %175 = arith.truncf %174 : vector<8x32xf32> to vector<8x32xbf16>
    %176 = arith.truncf %3 : vector<16x32xf32> to vector<16x32xbf16>
    %c0_75 = arith.constant 0 : index
    %c0_76 = arith.constant 0 : index
    %177 = vector.load %arg17[%c0_75, %c0_76] : memref<32x32xbf16, #tpu.memory_space<vmem>>, vector<32x32xbf16>
    %cst_77 = arith.constant dense<0.000000e+00> : vector<8x32xf32>
    %178 = tpu.matmul %175, %177, %cst_77 {dimension_numbers = #tpu.dot_dimension_numbers<[1], [0], [0], [1], [0, 0, 1, 1], [], []>} : vector<8x32xbf16>, vector<32x32xbf16>, vector<8x32xf32> -> vector<8x32xf32>
    %c0_78 = arith.constant 0 : index
    %c0_79 = arith.constant 0 : index
    %179 = vector.load %arg18[%c0_78, %c0_79] : memref<1x32xf32, #tpu.memory_space<vmem>>, vector<1x32xf32>
    %180 = vector.broadcast %179 : vector<1x32xf32> to vector<8x32xf32>
    %181 = arith.addf %178, %180 : vector<8x32xf32>
    %c0_80 = arith.constant 0 : index
    %c0_81 = arith.constant 0 : index
    %182 = vector.load %arg19[%c0_80, %c0_81] : memref<32x32xbf16, #tpu.memory_space<vmem>>, vector<32x32xbf16>
    %cst_82 = arith.constant dense<0.000000e+00> : vector<16x32xf32>
    %183 = tpu.matmul %176, %182, %cst_82 {dimension_numbers = #tpu.dot_dimension_numbers<[1], [0], [0], [1], [0, 0, 1, 1], [], []>} : vector<16x32xbf16>, vector<32x32xbf16>, vector<16x32xf32> -> vector<16x32xf32>
    %c0_83 = arith.constant 0 : index
    %c0_84 = arith.constant 0 : index
    %184 = vector.load %arg20[%c0_83, %c0_84] : memref<1x32xf32, #tpu.memory_space<vmem>>, vector<1x32xf32>
    %185 = vector.broadcast %184 : vector<1x32xf32> to vector<16x32xf32>
    %186 = arith.addf %183, %185 : vector<16x32xf32>
    %c0_85 = arith.constant 0 : index
    %c0_86 = arith.constant 0 : index
    %187 = vector.load %arg21[%c0_85, %c0_86] : memref<32x32xbf16, #tpu.memory_space<vmem>>, vector<32x32xbf16>
    %cst_87 = arith.constant dense<0.000000e+00> : vector<16x32xf32>
    %188 = tpu.matmul %176, %187, %cst_87 {dimension_numbers = #tpu.dot_dimension_numbers<[1], [0], [0], [1], [0, 0, 1, 1], [], []>} : vector<16x32xbf16>, vector<32x32xbf16>, vector<16x32xf32> -> vector<16x32xf32>
    %c0_88 = arith.constant 0 : index
    %c0_89 = arith.constant 0 : index
    %189 = vector.load %arg22[%c0_88, %c0_89] : memref<1x32xf32, #tpu.memory_space<vmem>>, vector<1x32xf32>
    %190 = vector.broadcast %189 : vector<1x32xf32> to vector<16x32xf32>
    %191 = arith.addf %188, %190 : vector<16x32xf32>
    %192 = arith.truncf %186 : vector<16x32xf32> to vector<16x32xbf16>
    %c0_90 = arith.constant 0 : index
    %c0_91 = arith.constant 0 : index
    %c0_92 = arith.constant 0 : index
    %193 = vector.load %arg34[%c0_90, %c0_91, %c0_92] : memref<1x16x32xbf16, #tpu.memory_space<vmem>>, vector<1x16x32xbf16>
    %194 = vector.shape_cast %193 : vector<1x16x32xbf16> to vector<16x32xbf16>
    %195 = vector.shape_cast %192 : vector<16x32xbf16> to vector<1x16x32xbf16>
    tpu.vector_store %arg34[%c0_90, %c0_91, %c0_92], %195 {strides = array<i32>} : memref<1x16x32xbf16, #tpu.memory_space<vmem>>, vector<1x16x32xbf16>,
    %196 = arith.truncf %191 : vector<16x32xf32> to vector<16x32xbf16>
    %c0_93 = arith.constant 0 : index
    %c0_94 = arith.constant 0 : index
    %c0_95 = arith.constant 0 : index
    %197 = vector.load %arg35[%c0_93, %c0_94, %c0_95] : memref<1x16x32xbf16, #tpu.memory_space<vmem>>, vector<1x16x32xbf16>
    %198 = vector.shape_cast %197 : vector<1x16x32xbf16> to vector<16x32xbf16>
    %199 = vector.shape_cast %196 : vector<16x32xbf16> to vector<1x16x32xbf16>
    tpu.vector_store %arg35[%c0_93, %c0_94, %c0_95], %199 {strides = array<i32>} : memref<1x16x32xbf16, #tpu.memory_space<vmem>>, vector<1x16x32xbf16>,
    %cst_96 = arith.constant 0.353553385 : f32
    %200 = vector.broadcast %cst_96 : f32 to vector<8x32xf32>
    %201 = arith.mulf %181, %200 : vector<8x32xf32>
    %202 = arith.truncf %201 : vector<8x32xf32> to vector<8x32xbf16>
    %203 = vector.extract_strided_slice %202 {offsets = [0, 0], sizes = [8, 8], strides = [1, 1]} : vector<8x32xbf16> to vector<8x8xbf16>
    %204 = vector.extract_strided_slice %202 {offsets = [0, 8], sizes = [8, 8], strides = [1, 1]} : vector<8x32xbf16> to vector<8x8xbf16>
    %205 = vector.extract_strided_slice %202 {offsets = [0, 16], sizes = [8, 8], strides = [1, 1]} : vector<8x32xbf16> to vector<8x8xbf16>
    %206 = vector.extract_strided_slice %202 {offsets = [0, 24], sizes = [8, 8], strides = [1, 1]} : vector<8x32xbf16> to vector<8x8xbf16>
    %207 = vector.shape_cast %203 : vector<8x8xbf16> to vector<1x8x8xbf16>
    %208 = vector.shape_cast %204 : vector<8x8xbf16> to vector<1x8x8xbf16>
    %209 = vector.shape_cast %205 : vector<8x8xbf16> to vector<1x8x8xbf16>
    %210 = vector.shape_cast %206 : vector<8x8xbf16> to vector<1x8x8xbf16>
    %211 = tpu.concatenate %207, %208, %209, %210 in 0 : vector<1x8x8xbf16>, vector<1x8x8xbf16>, vector<1x8x8xbf16>, vector<1x8x8xbf16> -> vector<4x8x8xbf16>
    %212 = arith.truncf %186 : vector<16x32xf32> to vector<16x32xbf16>
    %213 = vector.extract_strided_slice %212 {offsets = [0, 0], sizes = [16, 8], strides = [1, 1]} : vector<16x32xbf16> to vector<16x8xbf16>
    %214 = vector.extract_strided_slice %212 {offsets = [0, 8], sizes = [16, 8], strides = [1, 1]} : vector<16x32xbf16> to vector<16x8xbf16>
    %215 = vector.extract_strided_slice %212 {offsets = [0, 16], sizes = [16, 8], strides = [1, 1]} : vector<16x32xbf16> to vector<16x8xbf16>
    %216 = vector.extract_strided_slice %212 {offsets = [0, 24], sizes = [16, 8], strides = [1, 1]} : vector<16x32xbf16> to vector<16x8xbf16>
    %217 = vector.shape_cast %213 : vector<16x8xbf16> to vector<1x16x8xbf16>
    %218 = vector.shape_cast %214 : vector<16x8xbf16> to vector<1x16x8xbf16>
    %219 = vector.shape_cast %215 : vector<16x8xbf16> to vector<1x16x8xbf16>
    %220 = vector.shape_cast %216 : vector<16x8xbf16> to vector<1x16x8xbf16>
    %221 = tpu.concatenate %217, %218, %219, %220 in 0 : vector<1x16x8xbf16>, vector<1x16x8xbf16>, vector<1x16x8xbf16>, vector<1x16x8xbf16> -> vector<4x16x8xbf16>
    %222 = arith.truncf %191 : vector<16x32xf32> to vector<16x32xbf16>
    %223 = vector.extract_strided_slice %222 {offsets = [0, 0], sizes = [16, 8], strides = [1, 1]} : vector<16x32xbf16> to vector<16x8xbf16>
    %224 = vector.extract_strided_slice %222 {offsets = [0, 8], sizes = [16, 8], strides = [1, 1]} : vector<16x32xbf16> to vector<16x8xbf16>
    %225 = vector.extract_strided_slice %222 {offsets = [0, 16], sizes = [16, 8], strides = [1, 1]} : vector<16x32xbf16> to vector<16x8xbf16>
    %226 = vector.extract_strided_slice %222 {offsets = [0, 24], sizes = [16, 8], strides = [1, 1]} : vector<16x32xbf16> to vector<16x8xbf16>
    %227 = vector.shape_cast %223 : vector<16x8xbf16> to vector<1x16x8xbf16>
    %228 = vector.shape_cast %224 : vector<16x8xbf16> to vector<1x16x8xbf16>
    %229 = vector.shape_cast %225 : vector<16x8xbf16> to vector<1x16x8xbf16>
    %230 = vector.shape_cast %226 : vector<16x8xbf16> to vector<1x16x8xbf16>
    %231 = tpu.concatenate %227, %228, %229, %230 in 0 : vector<1x16x8xbf16>, vector<1x16x8xbf16>, vector<1x16x8xbf16>, vector<1x16x8xbf16> -> vector<4x16x8xbf16>
    %cst_97 = arith.constant 0xFF800000 : f32
    %232 = vector.broadcast %cst_97 : f32 to vector<4x8x1xf32>
    %cst_98 = arith.constant 0.000000e+00 : f32
    %233 = vector.broadcast %cst_98 : f32 to vector<4x8x1xf32>
    %cst_99 = arith.constant 0.000000e+00 : f32
    %234 = vector.broadcast %cst_99 : f32 to vector<4x8x8xf32>
    "tpu.trace_start"() <{level = 10 : i32, message = "hqd,hkd->hqk"}> : () -> ()
    %cst_100 = arith.constant dense<0.000000e+00> : vector<4x8x16xf32>
    %235 = tpu.matmul %211, %221, %cst_100 {dimension_numbers = #tpu.dot_dimension_numbers<[2], [2], [1], [1], [0, 0, 0, 1, 1, 1], [0], [0]>} : vector<4x8x8xbf16>, vector<4x16x8xbf16>, vector<4x8x16xf32> -> vector<4x8x16xf32>
    "tpu.trace_stop"() : () -> ()
    %236 = vector.shape_cast %11 : vector<8x16xi1> to vector<1x8x16xi1>
    %cst_101 = arith.constant -1.000000e+09 : f32
    %237 = vector.shape_cast %236 : vector<1x8x16xi1> to vector<1x8x16xi1>
    %238 = vector.broadcast %237 : vector<1x8x16xi1> to vector<4x8x16xi1>
    %239 = vector.broadcast %cst_101 : f32 to vector<4x8x16xf32>
    %240 = arith.select %238, %235, %239 : vector<4x8x16xi1>, vector<4x8x16xf32>
    %cst_102 = arith.constant dense<0xFF800000> : vector<4x8xf32>
    %241 = vector.multi_reduction <maximumf>, %240, %cst_102 [2] : vector<4x8x16xf32> to vector<4x8xf32>
    %242 = vector.shape_cast %241 : vector<4x8xf32> to vector<4x8x1xf32>
    %243 = arith.maximumf %232, %242 : vector<4x8x1xf32>
    %244 = arith.subf %232, %243 : vector<4x8x1xf32>
    %245 = math.exp %244 : vector<4x8x1xf32>
    %246 = vector.broadcast %243 : vector<4x8x1xf32> to vector<4x8x16xf32>
    %247 = arith.subf %240, %246 : vector<4x8x16xf32>
    %248 = math.exp %247 : vector<4x8x16xf32>
    %249 = arith.mulf %245, %233 : vector<4x8x1xf32>
    %cst_103 = arith.constant dense<0.000000e+00> : vector<4x8xf32>
    %250 = vector.multi_reduction <add>, %248, %cst_103 [2] : vector<4x8x16xf32> to vector<4x8xf32>
    %251 = vector.shape_cast %250 : vector<4x8xf32> to vector<4x8x1xf32>
    %252 = arith.addf %249, %251 : vector<4x8x1xf32>
    %253 = vector.broadcast %245 : vector<4x8x1xf32> to vector<4x8x8xf32>
    %254 = arith.mulf %253, %234 : vector<4x8x8xf32>
    %255 = arith.truncf %248 : vector<4x8x16xf32> to vector<4x8x16xbf16>
    "tpu.trace_start"() <{level = 10 : i32, message = "hqk,hkd->hqd"}> : () -> ()
    %cst_104 = arith.constant dense<0.000000e+00> : vector<4x8x8xf32>
    %256 = tpu.matmul %255, %231, %cst_104 {dimension_numbers = #tpu.dot_dimension_numbers<[2], [1], [1], [2], [0, 0, 0, 1, 1, 2], [0], [0]>} : vector<4x8x16xbf16>, vector<4x16x8xbf16>, vector<4x8x8xf32> -> vector<4x8x8xf32>
    "tpu.trace_stop"() : () -> ()
    %257 = arith.addf %254, %256 : vector<4x8x8xf32>
    %258 = tpu.reciprocal %252 {approx = true} : vector<4x8x1xf32> -> vector<4x8x1xf32>
    %259 = vector.broadcast %258 : vector<4x8x1xf32> to vector<4x8x8xf32>
    %260 = arith.mulf %257, %259 : vector<4x8x8xf32>
    %261 = arith.truncf %260 : vector<4x8x8xf32> to vector<4x8x8xbf16>
    %cst_105 = arith.constant 0.000000e+00 : f32
    %262 = vector.broadcast %cst_105 : f32 to vector<8x32xf32>
    %263 = vector.extract_strided_slice %261 {offsets = [0, 0, 0], sizes = [1, 8, 8], strides = [1, 1, 1]} : vector<4x8x8xbf16> to vector<1x8x8xbf16>
    %264 = vector.shape_cast %263 : vector<1x8x8xbf16> to vector<8x8xbf16>
    %c0_106 = arith.constant 0 : index
    %c0_107 = arith.constant 0 : index
    %c0_108 = arith.constant 0 : index
    %265 = vector.load %arg23[%c0_106, %c0_107, %c0_108] : memref<4x8x32xbf16, #tpu.memory_space<vmem>>, vector<1x8x32xbf16>
    %266 = vector.shape_cast %265 : vector<1x8x32xbf16> to vector<8x32xbf16>
    %cst_109 = arith.constant dense<0.000000e+00> : vector<8x32xf32>
    %267 = tpu.matmul %264, %266, %cst_109 {dimension_numbers = #tpu.dot_dimension_numbers<[1], [0], [0], [1], [0, 0, 1, 1], [], []>} : vector<8x8xbf16>, vector<8x32xbf16>, vector<8x32xf32> -> vector<8x32xf32>
    %268 = arith.addf %262, %267 : vector<8x32xf32>
    %269 = vector.extract_strided_slice %261 {offsets = [1, 0, 0], sizes = [1, 8, 8], strides = [1, 1, 1]} : vector<4x8x8xbf16> to vector<1x8x8xbf16>
    %270 = vector.shape_cast %269 : vector<1x8x8xbf16> to vector<8x8xbf16>
    %c1_110 = arith.constant 1 : index
    %c0_111 = arith.constant 0 : index
    %c0_112 = arith.constant 0 : index
    %271 = vector.load %arg23[%c1_110, %c0_111, %c0_112] : memref<4x8x32xbf16, #tpu.memory_space<vmem>>, vector<1x8x32xbf16>
    %272 = vector.shape_cast %271 : vector<1x8x32xbf16> to vector<8x32xbf16>
    %cst_113 = arith.constant dense<0.000000e+00> : vector<8x32xf32>
    %273 = tpu.matmul %270, %272, %cst_113 {dimension_numbers = #tpu.dot_dimension_numbers<[1], [0], [0], [1], [0, 0, 1, 1], [], []>} : vector<8x8xbf16>, vector<8x32xbf16>, vector<8x32xf32> -> vector<8x32xf32>
    %274 = arith.addf %268, %273 : vector<8x32xf32>
    %275 = vector.extract_strided_slice %261 {offsets = [2, 0, 0], sizes = [1, 8, 8], strides = [1, 1, 1]} : vector<4x8x8xbf16> to vector<1x8x8xbf16>
    %276 = vector.shape_cast %275 : vector<1x8x8xbf16> to vector<8x8xbf16>
    %c2_114 = arith.constant 2 : index
    %c0_115 = arith.constant 0 : index
    %c0_116 = arith.constant 0 : index
    %277 = vector.load %arg23[%c2_114, %c0_115, %c0_116] : memref<4x8x32xbf16, #tpu.memory_space<vmem>>, vector<1x8x32xbf16>
    %278 = vector.shape_cast %277 : vector<1x8x32xbf16> to vector<8x32xbf16>
    %cst_117 = arith.constant dense<0.000000e+00> : vector<8x32xf32>
    %279 = tpu.matmul %276, %278, %cst_117 {dimension_numbers = #tpu.dot_dimension_numbers<[1], [0], [0], [1], [0, 0, 1, 1], [], []>} : vector<8x8xbf16>, vector<8x32xbf16>, vector<8x32xf32> -> vector<8x32xf32>
    %280 = arith.addf %274, %279 : vector<8x32xf32>
    %281 = vector.extract_strided_slice %261 {offsets = [3, 0, 0], sizes = [1, 8, 8], strides = [1, 1, 1]} : vector<4x8x8xbf16> to vector<1x8x8xbf16>
    %282 = vector.shape_cast %281 : vector<1x8x8xbf16> to vector<8x8xbf16>
    %c3_118 = arith.constant 3 : index
    %c0_119 = arith.constant 0 : index
    %c0_120 = arith.constant 0 : index
    %283 = vector.load %arg23[%c3_118, %c0_119, %c0_120] : memref<4x8x32xbf16, #tpu.memory_space<vmem>>, vector<1x8x32xbf16>
    %284 = vector.shape_cast %283 : vector<1x8x32xbf16> to vector<8x32xbf16>
    %cst_121 = arith.constant dense<0.000000e+00> : vector<8x32xf32>
    %285 = tpu.matmul %282, %284, %cst_121 {dimension_numbers = #tpu.dot_dimension_numbers<[1], [0], [0], [1], [0, 0, 1, 1], [], []>} : vector<8x8xbf16>, vector<8x32xbf16>, vector<8x32xf32> -> vector<8x32xf32>
    %286 = arith.addf %280, %285 : vector<8x32xf32>
    %287 = arith.addf %150, %286 : vector<8x32xf32>
    %c0_122 = arith.constant 0 : index
    %c0_123 = arith.constant 0 : index
    %288 = vector.load %arg24[%c0_122, %c0_123] : memref<1x32xf32, #tpu.memory_space<vmem>>, vector<1x32xf32>
    %289 = vector.broadcast %288 : vector<1x32xf32> to vector<8x32xf32>
    %290 = arith.addf %287, %289 : vector<8x32xf32>
    %c0_124 = arith.constant 0 : index
    %c0_125 = arith.constant 0 : index
    %291 = vector.load %arg25[%c0_124, %c0_125] : memref<1x32xf32, #tpu.memory_space<vmem>>, vector<1x32xf32>
    %c0_126 = arith.constant 0 : index
    %c0_127 = arith.constant 0 : index
    %292 = vector.load %arg26[%c0_126, %c0_127] : memref<1x32xf32, #tpu.memory_space<vmem>>, vector<1x32xf32>
    %cst_128 = arith.constant dense<0.000000e+00> : vector<8xf32>
    %293 = vector.multi_reduction <add>, %290, %cst_128 [1] : vector<8x32xf32> to vector<8xf32>
    %294 = vector.shape_cast %293 : vector<8xf32> to vector<8x1xf32>
    %cst_129 = arith.constant 3.200000e+01 : f32
    %295 = vector.broadcast %cst_129 : f32 to vector<8x1xf32>
    %296 = arith.divf %294, %295 : vector<8x1xf32>
    %297 = vector.broadcast %296 : vector<8x1xf32> to vector<8x32xf32>
    %298 = arith.subf %290, %297 : vector<8x32xf32>
    %299 = arith.mulf %298, %298 : vector<8x32xf32>
    %cst_130 = arith.constant dense<0.000000e+00> : vector<8xf32>
    %300 = vector.multi_reduction <add>, %299, %cst_130 [1] : vector<8x32xf32> to vector<8xf32>
    %301 = vector.shape_cast %300 : vector<8xf32> to vector<8x1xf32>
    %cst_131 = arith.constant 3.200000e+01 : f32
    %302 = vector.broadcast %cst_131 : f32 to vector<8x1xf32>
    %303 = arith.divf %301, %302 : vector<8x1xf32>
    %cst_132 = arith.constant 9.99999997E-7 : f32
    %304 = vector.broadcast %cst_132 : f32 to vector<8x1xf32>
    %305 = arith.addf %303, %304 : vector<8x1xf32>
    %306 = math.rsqrt %305 : vector<8x1xf32>
    %307 = vector.broadcast %296 : vector<8x1xf32> to vector<8x32xf32>
    %308 = arith.subf %290, %307 : vector<8x32xf32>
    %309 = vector.broadcast %306 : vector<8x1xf32> to vector<8x32xf32>
    %310 = arith.mulf %308, %309 : vector<8x32xf32>
    %311 = vector.broadcast %291 : vector<1x32xf32> to vector<8x32xf32>
    %312 = arith.mulf %310, %311 : vector<8x32xf32>
    %313 = vector.broadcast %292 : vector<1x32xf32> to vector<8x32xf32>
    %314 = arith.addf %312, %313 : vector<8x32xf32>
    %315 = arith.truncf %314 : vector<8x32xf32> to vector<8x32xbf16>
    %cst_133 = arith.constant 0.000000e+00 : f32
    %316 = vector.broadcast %cst_133 : f32 to vector<8x32xf32>
    %c0_134 = arith.constant 0 : index
    %c0_135 = arith.constant 0 : index
    %317 = vector.load %arg27[%c0_134, %c0_135] : memref<32x64xbf16, #tpu.memory_space<vmem>>, vector<32x64xbf16>
    %cst_136 = arith.constant dense<0.000000e+00> : vector<8x64xf32>
    %318 = tpu.matmul %315, %317, %cst_136 {dimension_numbers = #tpu.dot_dimension_numbers<[1], [0], [0], [1], [0, 0, 1, 1], [], []>} : vector<8x32xbf16>, vector<32x64xbf16>, vector<8x64xf32> -> vector<8x64xf32>
    %c0_137 = arith.constant 0 : index
    %c0_138 = arith.constant 0 : index
    %319 = vector.load %arg28[%c0_137, %c0_138] : memref<1x64xf32, #tpu.memory_space<vmem>>, vector<1x64xf32>
    %320 = vector.broadcast %319 : vector<1x64xf32> to vector<8x64xf32>
    %321 = arith.addf %318, %320 : vector<8x64xf32>
    %cst_139 = arith.constant 0.000000e+00 : f32
    %322 = vector.broadcast %cst_139 : f32 to vector<8x64xf32>
    %323 = arith.maximumf %321, %322 : vector<8x64xf32>
    %324 = arith.truncf %323 : vector<8x64xf32> to vector<8x64xbf16>
    %c0_140 = arith.constant 0 : index
    %c0_141 = arith.constant 0 : index
    %325 = vector.load %arg29[%c0_140, %c0_141] : memref<64x32xbf16, #tpu.memory_space<vmem>>, vector<64x32xbf16>
    %cst_142 = arith.constant dense<0.000000e+00> : vector<8x32xf32>
    %326 = tpu.matmul %324, %325, %cst_142 {dimension_numbers = #tpu.dot_dimension_numbers<[1], [0], [0], [1], [0, 0, 1, 1], [], []>} : vector<8x64xbf16>, vector<64x32xbf16>, vector<8x32xf32> -> vector<8x32xf32>
    %327 = arith.addf %316, %326 : vector<8x32xf32>
    %328 = arith.addf %290, %327 : vector<8x32xf32>
    %c0_143 = arith.constant 0 : index
    %c0_144 = arith.constant 0 : index
    %329 = vector.load %arg30[%c0_143, %c0_144] : memref<1x32xf32, #tpu.memory_space<vmem>>, vector<1x32xf32>
    %330 = vector.broadcast %329 : vector<1x32xf32> to vector<8x32xf32>
    %331 = arith.addf %328, %330 : vector<8x32xf32>
    %c0_145 = arith.constant 0 : index
    %c0_146 = arith.constant 0 : index
    %c0_147 = arith.constant 0 : index
    %332 = vector.load %arg31[%c0_145, %c0_146, %c0_147] : memref<1x8x32xf32, #tpu.memory_space<vmem>>, vector<1x8x32xf32>
    %333 = vector.shape_cast %332 : vector<1x8x32xf32> to vector<8x32xf32>
    %334 = vector.shape_cast %331 : vector<8x32xf32> to vector<1x8x32xf32>
    tpu.vector_store %arg31[%c0_145, %c0_146, %c0_147], %334 {strides = array<i32>} : memref<1x8x32xf32, #tpu.memory_space<vmem>>, vector<1x8x32xf32>,
    return
  }
  func.func @transform_0(%arg0: i32) -> (i32, i32, i32) {
    %c0_i32 = arith.constant 0 : i32
    %c0_i32_0 = arith.constant 0 : i32
    %c0_i32_1 = arith.constant 0 : i32
    return %arg0, %c0_i32, %c0_i32_0 : i32, i32, i32
  }
  func.func @transform_1(%arg0: i32) -> (i32, i32, i32) {
    %c0_i32 = arith.constant 0 : i32
    %c0_i32_0 = arith.constant 0 : i32
    %c0_i32_1 = arith.constant 0 : i32
    return %arg0, %c0_i32, %c0_i32_0 : i32, i32, i32
  }
  func.func @transform_2(%arg0: i32) -> (i32, i32, i32) {
    %c0_i32 = arith.constant 0 : i32
    %c0_i32_0 = arith.constant 0 : i32
    %c0_i32_1 = arith.constant 0 : i32
    return %arg0, %c0_i32, %c0_i32_0 : i32, i32, i32
  }
  func.func @transform_3(%arg0: i32) -> (i32, i32, i32) {
    %c0_i32 = arith.constant 0 : i32
    %c0_i32_0 = arith.constant 0 : i32
    %c0_i32_1 = arith.constant 0 : i32
    return %arg0, %c0_i32, %c0_i32_0 : i32, i32, i32
  }
  func.func @transform_4(%arg0: i32) -> (i32, i32) {
    %c0_i32 = arith.constant 0 : i32
    %c0_i32_0 = arith.constant 0 : i32
    %c0_i32_1 = arith.constant 0 : i32
    return %c0_i32, %c0_i32_0 : i32, i32
  }
  func.func @transform_5(%arg0: i32) -> (i32, i32) {
    %c0_i32 = arith.constant 0 : i32
    %c0_i32_0 = arith.constant 0 : i32
    %c0_i32_1 = arith.constant 0 : i32
    return %c0_i32, %c0_i32_0 : i32, i32
  }
  func.func @transform_6(%arg0: i32) -> (i32, i32) {
    %c0_i32 = arith.constant 0 : i32
    %c0_i32_0 = arith.constant 0 : i32
    %c0_i32_1 = arith.constant 0 : i32
    return %c0_i32, %c0_i32_0 : i32, i32
  }
  func.func @transform_7(%arg0: i32) -> (i32, i32) {
    %c0_i32 = arith.constant 0 : i32
    %c0_i32_0 = arith.constant 0 : i32
    %c0_i32_1 = arith.constant 0 : i32
    return %c0_i32, %c0_i32_0 : i32, i32
  }
  func.func @transform_8(%arg0: i32) -> (i32, i32) {
    %c0_i32 = arith.constant 0 : i32
    %c0_i32_0 = arith.constant 0 : i32
    %c0_i32_1 = arith.constant 0 : i32
    return %c0_i32, %c0_i32_0 : i32, i32
  }
  func.func @transform_9(%arg0: i32) -> (i32, i32) {
    %c0_i32 = arith.constant 0 : i32
    %c0_i32_0 = arith.constant 0 : i32
    %c0_i32_1 = arith.constant 0 : i32
    return %c0_i32, %c0_i32_0 : i32, i32
  }
  func.func @transform_10(%arg0: i32) -> (i32, i32) {
    %c0_i32 = arith.constant 0 : i32
    %c0_i32_0 = arith.constant 0 : i32
    %c0_i32_1 = arith.constant 0 : i32
    return %c0_i32, %c0_i32_0 : i32, i32
  }
  func.func @transform_11(%arg0: i32) -> (i32, i32) {
    %c0_i32 = arith.constant 0 : i32
    %c0_i32_0 = arith.constant 0 : i32
    %c0_i32_1 = arith.constant 0 : i32
    return %c0_i32, %c0_i32_0 : i32, i32
  }
  func.func @transform_12(%arg0: i32) -> (i32, i32, i32) {
    %c0_i32 = arith.constant 0 : i32
    %c0_i32_0 = arith.constant 0 : i32
    %c0_i32_1 = arith.constant 0 : i32
    %c0_i32_2 = arith.constant 0 : i32
    return %c0_i32, %c0_i32_0, %c0_i32_1 : i32, i32, i32
  }
  func.func @transform_13(%arg0: i32) -> (i32, i32) {
    %c0_i32 = arith.constant 0 : i32
    %c0_i32_0 = arith.constant 0 : i32
    %c0_i32_1 = arith.constant 0 : i32
    return %c0_i32, %c0_i32_0 : i32, i32
  }
  func.func @transform_14(%arg0: i32) -> (i32, i32) {
    %c0_i32 = arith.constant 0 : i32
    %c0_i32_0 = arith.constant 0 : i32
    %c0_i32_1 = arith.constant 0 : i32
    return %c0_i32, %c0_i32_0 : i32, i32
  }
  func.func @transform_15(%arg0: i32) -> (i32, i32) {
    %c0_i32 = arith.constant 0 : i32
    %c0_i32_0 = arith.constant 0 : i32
    %c0_i32_1 = arith.constant 0 : i32
    return %c0_i32, %c0_i32_0 : i32, i32
  }
  func.func @transform_16(%arg0: i32) -> (i32, i32) {
    %c0_i32 = arith.constant 0 : i32
    %c0_i32_0 = arith.constant 0 : i32
    %c0_i32_1 = arith.constant 0 : i32
    return %c0_i32, %c0_i32_0 : i32, i32
  }
  func.func @transform_17(%arg0: i32) -> (i32, i32) {
    %c0_i32 = arith.constant 0 : i32
    %c0_i32_0 = arith.constant 0 : i32
    %c0_i32_1 = arith.constant 0 : i32
    return %c0_i32, %c0_i32_0 : i32, i32
  }
  func.func @transform_18(%arg0: i32) -> (i32, i32) {
    %c0_i32 = arith.constant 0 : i32
    %c0_i32_0 = arith.constant 0 : i32
    %c0_i32_1 = arith.constant 0 : i32
    return %c0_i32, %c0_i32_0 : i32, i32
  }
  func.func @transform_19(%arg0: i32) -> (i32, i32) {
    %c0_i32 = arith.constant 0 : i32
    %c0_i32_0 = arith.constant 0 : i32
    %c0_i32_1 = arith.constant 0 : i32
    return %c0_i32, %c0_i32_0 : i32, i32
  }
  func.func @transform_20(%arg0: i32) -> (i32, i32) {
    %c0_i32 = arith.constant 0 : i32
    %c0_i32_0 = arith.constant 0 : i32
    %c0_i32_1 = arith.constant 0 : i32
    return %c0_i32, %c0_i32_0 : i32, i32
  }
  func.func @transform_21(%arg0: i32) -> (i32, i32) {
    %c0_i32 = arith.constant 0 : i32
    %c0_i32_0 = arith.constant 0 : i32
    %c0_i32_1 = arith.constant 0 : i32
    return %c0_i32, %c0_i32_0 : i32, i32
  }
  func.func @transform_22(%arg0: i32) -> (i32, i32, i32) {
    %c0_i32 = arith.constant 0 : i32
    %c0_i32_0 = arith.constant 0 : i32
    %c0_i32_1 = arith.constant 0 : i32
    %c0_i32_2 = arith.constant 0 : i32
    return %c0_i32, %c0_i32_0, %c0_i32_1 : i32, i32, i32
  }
  func.func @transform_23(%arg0: i32) -> (i32, i32) {
    %c0_i32 = arith.constant 0 : i32
    %c0_i32_0 = arith.constant 0 : i32
    %c0_i32_1 = arith.constant 0 : i32
    return %c0_i32, %c0_i32_0 : i32, i32
  }
  func.func @transform_24(%arg0: i32) -> (i32, i32) {
    %c0_i32 = arith.constant 0 : i32
    %c0_i32_0 = arith.constant 0 : i32
    %c0_i32_1 = arith.constant 0 : i32
    return %c0_i32, %c0_i32_0 : i32, i32
  }
  func.func @transform_25(%arg0: i32) -> (i32, i32) {
    %c0_i32 = arith.constant 0 : i32
    %c0_i32_0 = arith.constant 0 : i32
    %c0_i32_1 = arith.constant 0 : i32
    return %c0_i32, %c0_i32_0 : i32, i32
  }
  func.func @transform_26(%arg0: i32) -> (i32, i32) {
    %c0_i32 = arith.constant 0 : i32
    %c0_i32_0 = arith.constant 0 : i32
    %c0_i32_1 = arith.constant 0 : i32
    return %c0_i32, %c0_i32_0 : i32, i32
  }
  func.func @transform_27(%arg0: i32) -> (i32, i32) {
    %c0_i32 = arith.constant 0 : i32
    %c0_i32_0 = arith.constant 0 : i32
    %c0_i32_1 = arith.constant 0 : i32
    return %c0_i32, %c0_i32_0 : i32, i32
  }
  func.func @transform_28(%arg0: i32) -> (i32, i32) {
    %c0_i32 = arith.constant 0 : i32
    %c0_i32_0 = arith.constant 0 : i32
    %c0_i32_1 = arith.constant 0 : i32
    return %c0_i32, %c0_i32_0 : i32, i32
  }
  func.func @transform_29(%arg0: i32) -> (i32, i32) {
    %c0_i32 = arith.constant 0 : i32
    %c0_i32_0 = arith.constant 0 : i32
    %c0_i32_1 = arith.constant 0 : i32
    return %c0_i32, %c0_i32_0 : i32, i32
  }
  func.func @transform_30(%arg0: i32) -> (i32, i32, i32) {
    %c0_i32 = arith.constant 0 : i32
    %c0_i32_0 = arith.constant 0 : i32
    %c0_i32_1 = arith.constant 0 : i32
    return %arg0, %c0_i32, %c0_i32_0 : i32, i32, i32
  }
  func.func @transform_31(%arg0: i32) -> (i32, i32, i32) {
    %c0_i32 = arith.constant 0 : i32
    %c0_i32_0 = arith.constant 0 : i32
    %c0_i32_1 = arith.constant 0 : i32
    return %arg0, %c0_i32, %c0_i32_0 : i32, i32, i32
  }
  func.func @transform_32(%arg0: i32) -> (i32, i32, i32) {
    %c0_i32 = arith.constant 0 : i32
    %c0_i32_0 = arith.constant 0 : i32
    %c0_i32_1 = arith.constant 0 : i32
    return %arg0, %c0_i32, %c0_i32_0 : i32, i32, i32
  }
  func.func @transform_33(%arg0: i32) -> (i32, i32, i32) {
    %c0_i32 = arith.constant 0 : i32
    %c0_i32_0 = arith.constant 0 : i32
    %c0_i32_1 = arith.constant 0 : i32
    return %arg0, %c0_i32, %c0_i32_0 : i32, i32, i32
  }
  func.func @transform_34(%arg0: i32) -> (i32, i32, i32) {
    %c0_i32 = arith.constant 0 : i32
    %c0_i32_0 = arith.constant 0 : i32
    %c0_i32_1 = arith.constant 0 : i32
    return %arg0, %c0_i32, %c0_i32_0 : i32, i32, i32
  }
}

</mosaic_0001>

<bundles_post_ra>
// kernel: tpu_custom_call.1
= control target key start
LH: loop header
LB: loop body
LE: loop exit
PB: predicated region body
PF: predicated region fallthrough
CT: control target
= control target key end

     0   :  { %s4285_s6 = smov 1   ;;  %s4286_s10 = smov 2   ;;  %s5171_s0 = inlined_call_operand.smem [shape: u32[35], index: -1, kind: input, shape index: {}] }
   0x1   :  { %s4350_s5 = sld [smem:[%s5171_s0]]   ;;  %s4287_s14 = smov 3  }
   0x2   :  { %s4355_s9 = sld [smem:[%s5171_s0 + %s4285_s6]]   ;;  %s4288_s18 = smov 4  }
   0x3   :  { %s4360_s13 = sld [smem:[%s5171_s0 + %s4286_s10]]   ;;  %s4289_s22 = smov 5  }
   0x4   :  { %s4365_s17 = sld [smem:[%s5171_s0 + %s4287_s14]]   ;;  %s4290_s26 = smov 6  }
   0x5   :  { %s4370_s21 = sld [smem:[%s5171_s0 + %s4288_s18]]   ;;  %s4291_s30 = smov 7  }
   0x6   :  { %s4375_s25 = sld [smem:[%s5171_s0 + %s4289_s22]]   ;;  %s4292_s4 = smov 8  }
   0x7   :  { %5198 = sst [smem:[#allocation48_spill]] %s4350_s5  ;;  %s4293_s10 = smov 9  }
   0x8   :  { %5199 = sst [smem:[#allocation49_spill]] %s4355_s9  ;;  %s4294_s15 = smov 10  }
   0x9   :  { %5200 = sst [smem:[#allocation50_spill]] %s4360_s13  ;;  %s4295_s20 = smov 11  }
   0xa   :  { %5201 = sst [smem:[#allocation51_spill]] %s4365_s17  ;;  %s4297_s1 = smov 13  }
   0xb   :  { %5202 = sst [smem:[#allocation52_spill]] %s4370_s21  ;;  %s4298_s7 = smov 14  }
   0xc   :  { %5203 = sst [smem:[#allocation53_spill]] %s4375_s25  ;;  %s4300_s22 = smov 16  }
   0xd   :  { %s4380_s29 = sld [smem:[%s5171_s0 + %s4290_s26]]   ;;  %s4296_s26 = smov 12  }
   0xe   :  { %s4385_s3 = sld [smem:[%s5171_s0 + %s4291_s30]]   ;;  %s4301_s28 = smov 17  }
   0xf   :  { %s4390_s8 = sld [smem:[%s5171_s0 + %s4292_s4]]  }
  0x10   :  { %s4395_s14 = sld [smem:[%s5171_s0 + %s4293_s10]]  }
  0x11   :  { %s4400_s19 = sld [smem:[%s5171_s0 + %s4294_s15]]   ;;  %s4299_s15 = smov 15  }
  0x12   :  { %s4405_s24 = sld [smem:[%s5171_s0 + %s4295_s20]]  }
  0x13   :  { %5204 = sst [smem:[#allocation54_spill]] %s4380_s29 }
  0x14   :  { %5205 = sst [smem:[#allocation55_spill]] %s4385_s3 }
  0x15   :  { %5206 = sst [smem:[#allocation56_spill]] %s4390_s8 }
  0x16   :  { %5207 = sst [smem:[#allocation57_spill]] %s4395_s14 }
  0x17   :  { %5208 = sst [smem:[#allocation58_spill]] %s4400_s19 }
  0x18   :  { %5209 = sst [smem:[#allocation59_spill]] %s4405_s24 }
  0x19   :  { %s4410_s30 = sld [smem:[%s5171_s0 + %s4296_s26]]  }
  0x1a   :  { %s4415_s6 = sld [smem:[%s5171_s0 + %s4297_s1]]  }
  0x1b   :  { %s4420_s12 = sld [smem:[%s5171_s0 + %s4298_s7]]   ;;  %s4302_s7 = smov 18  }
  0x1c   :  { %s4425_s20 = sld [smem:[%s5171_s0 + %s4299_s15]]   ;;  %s4303_s15 = smov 19  }
  0x1d   :  { %s4430_s27 = sld [smem:[%s5171_s0 + %s4300_s22]]   ;;  %s4304_s22 = smov 20  }
  0x1e   :  { %s4435_s4 = sld [smem:[%s5171_s0 + %s4301_s28]]   ;;  %s4305_s28 = smov 21  }
  0x1f   :  { %s4450_s9 = sld [smem:[%s5171_s0 + %s4304_s22]]   ;;  %s4308_s22 = smov 24  }
  0x20   :  { %5210 = sst [smem:[#allocation60_spill]] %s4415_s6 }
  0x21   :  { %5211 = sst [smem:[#allocation61_spill]] %s4420_s12 }
  0x22   :  { %5212 = sst [smem:[#allocation62_spill]] %s4425_s20 }
  0x23   :  { %5213 = sst [smem:[#allocation63_spill]] %s4430_s27 }
  0x24   :  { %5214 = sst [smem:[#allocation64_spill]] %s4435_s4 }
  0x25   :  { %s4440_s12 = sld [smem:[%s5171_s0 + %s4302_s7]]   ;;  %s4306_s7 = smov 22  }
  0x26   :  { %s4445_s20 = sld [smem:[%s5171_s0 + %s4303_s15]]   ;;  %s4307_s15 = smov 23  }
  0x27   :  { %5217 = sst [smem:[#allocation67_spill]] %s4450_s9 }
  0x28   :  { %s4455_s4 = sld [smem:[%s5171_s0 + %s4305_s28]]   ;;  %s4309_s28 = smov 25  }
  0x29   :  { %s4460_s6 = sld [smem:[%s5171_s0 + %s4306_s7]]   ;;  %s4310_s7 = smov 26  }
  0x2a   :  { %s4470_s24 = sld [smem:[%s5171_s0 + %s4308_s22]]   ;;  %s4312_s22 = smov 28  }
  0x2b   :  { %5215 = sst [smem:[#allocation65_spill]] %s4440_s12 }
  0x2c   :  { %5216 = sst [smem:[#allocation66_spill]] %s4445_s20 }
  0x2d   :  { %s4465_s20 = sld [smem:[%s5171_s0 + %s4307_s15]]   ;;  %s4311_s15 = smov 27  }
  0x2e   :  { %5218 = sst [smem:[#allocation68_spill]] %s4455_s4 }
  0x2f   :  { %5219 = sst [smem:[#allocation69_spill]] %s4460_s6 }
  0x30   :  { %5221 = sst [smem:[#allocation71_spill]] %s4470_s24 }
  0x31   :  { %s4475_s3 = sld [smem:[%s5171_s0 + %s4309_s28]]   ;;  %s4313_s28 = smov 29  }
  0x32   :  { %s4480_s14 = sld [smem:[%s5171_s0 + %s4310_s7]]   ;;  %s4314_s7 = smov 30  }
  0x33   :  { %5220 = sst [smem:[#allocation70_spill]] %s4465_s20 }
  0x34   :  { %s4485_s25 = sld [smem:[%s5171_s0 + %s4311_s15]]   ;;  %s4315_s15 = smov 31  }
  0x35   :  { %s4490_s21 = sld [smem:[%s5171_s0 + %s4312_s22]]   ;;  %s4316_s22 = smov 32  }
  0x36   :  { %s4495_s5 = sld [smem:[%s5171_s0 + %s4313_s28]]   ;;  %s4317_s28 = smov 33  }
  0x37   :  { %5222 = sst [smem:[#allocation72_spill]] %s4475_s3 }
  0x38   :  { %5223 = sst [smem:[#allocation73_spill]] %s4480_s14 }
  0x39   :  { %s4500_s17 = sld [smem:[%s5171_s0 + %s4314_s7]]   ;;  %s4318_s7 = smov 34  }
  0x3a   :  { %5224 = sst [smem:[#allocation74_spill]] %s4485_s25 }
  0x3b   :  { %5225 = sst [smem:[#allocation75_spill]] %s4490_s21 }
  0x3c   :  { %5226 = sst [smem:[#allocation76_spill]] %s4495_s5 }
  0x3d   :  { %s4505_s13 = sld [smem:[%s5171_s0 + %s4315_s15]]  }
  0x3e   :  { %s4510_s21 = sld [smem:[%s5171_s0 + %s4316_s22]]  }
  0x3f   :  { %5227 = sst [smem:[#allocation77_spill]] %s4500_s17 }
  0x40   :  { %s4515_s5 = sld [smem:[%s5171_s0 + %s4317_s28]]  }
  0x41   :  { %s4520_s17 = sld [smem:[%s5171_s0 + %s4318_s7]]  }
  0x43   :  { %5228 = sst [smem:[#allocation78_spill]] %s4505_s13 }
  0x44   :  { %5229 = sst [smem:[#allocation79_spill]] %s4510_s21 }
  0x46   :  { %5230 = sst [smem:[#allocation80_spill]] %s4515_s5 }
  0x47   :  { %5231 = sst [smem:[#allocation81_spill]] %s4520_s17 }
  0x48   :  { %75 = vsyncpa [#allocation3], 0 }
  0x49   :  { %77 = vsyncpa [#allocation3 + $0x1], 0 }
  0x4a   :  { %78 = vsyncpa [#allocation6], 0 }
  0x4b   :  { %80 = vsyncpa [#allocation6 + $0x1], 0 }
  0x4c   :  { %81 = vsyncpa [#allocation9], 0 }
  0x4d   :  { %82 = vsyncpa [#allocation12], 0 }
  0x4e   :  { %83 = vsyncpa [#allocation15], 0 }
  0x4f   :  { %84 = vsyncpa [#allocation18], 0 }
  0x50   :  { %85 = vsyncpa [#allocation21], 0 }
  0x51   :  { %86 = vsyncpa [#allocation24], 0 }
  0x52   :  { %87 = vsyncpa [#allocation27], 0 }
  0x53   :  { %88 = vsyncpa [#allocation4], 0 }
  0x54   :  { %90 = vsyncpa [#allocation4 + $0x1], 0 }
  0x55   :  { %91 = vsyncpa [#allocation30], 0 }
  0x56   :  { %93 = vsyncpa [#allocation30 + $0x1], 0 }
  0x57   :  { %94 = vsyncpa [#allocation33], 0 }
  0x58   :  { %96 = vsyncpa [#allocation33 + $0x1], 0  ;;  %s4522_s15 = smov 0   ;;  %s4524_s0 = smov 0  }
  0x59   :  { %s4526_s16 = smov 0   ;;  %s4528_s18 = smov 0  }
  0x5a LB: > { %s5232_s27 = sld [smem:[#allocation63_spill]]  ;;  %s4546_s23 = sadd.s32 4294967295, %s4283_s18   ;;  %s4271_s15 = sphi %s4522_s15, %s5282_s15   ;;  %s4283_s18 = sphi %s4528_s18, %s5285_s18   ;;  %s4279_s16 = sphi %s4526_s16, %s5284_s16   ;;  %s4275_s0 = sphi %s4524_s0, %s5283_s0  }
  0x5b   : > { %s5233_s25 = sld [smem:[#allocation74_spill]]  ;;  %p3070_p0 = scmp.ge.s32.totalorder %s4283_s18, 1 }
  0x5c   : > { %s5234_s24 = sld [smem:[#allocation71_spill]]  ;;  %p175_p1 = scmp.eq.s32.totalorder %s4546_s23, 0 }
  0x5d   : > { %s5235_s20 = sld [smem:[#allocation70_spill]]  ;;  %p887_p2 = scmp.lt.s32.totalorder %s4283_s18, 3 }
  0x5e   : > { %s5236_s19 = sld [smem:[#allocation58_spill]]  ;;  %s4319_s28 = smov [#allocation7]  }
  0x5f   : > { %s5237_s14 = sld [smem:[#allocation73_spill]]  ;;  %p4551_p3 = pnand %p3070_p0, %p887_p2 }
  0x60   : > { %s5238_s12 = sld [smem:[#allocation65_spill]]  ;;  %s4555_s1 = sshll.u32 %s4319_s28, 4  ;;  %s907_s1 = int_to_ptr.vmem [resolvable:$true] %s4555_s1 }
  0x61   : > { %s5239_s9 = sld [smem:[#allocation67_spill]]  ;;  %p3324_p4 = pneg %p4551_p3 }
  0x62   : > { %s5240_s8 = sld [smem:[#allocation56_spill]]  ;;  %s955_s10 = sshll.u32 %s4410_s30, 4  ;;  %s4591_s10 = int_to_ptr.hbm [resolvable:$true] %s955_s10 }
  0x63   : > { %s5241_s6 = sld [smem:[#allocation69_spill]]  ;;  %p4564_p6 = pnand %p3324_p4, %p175_p1 }
  0x64   : > { %s5242_s4 = sld [smem:[#allocation68_spill]]  ;;  %s4320_s11 = smov [#allocation8]  }
  0x65   : > { %s5243_s3 = sld [smem:[#allocation72_spill]]  ;;  %s4571_s28 = sshll.u32 %s4320_s11, 4  ;;  %s924_s28 = int_to_ptr.vmem [resolvable:$true] %s4571_s28 }
  0x66   : > { %s5244_s29 = sld [smem:[#allocation54_spill]]  ;;  %p4576_p8 = pneg %p4564_p6 }
  0x67   : > { %s5245_s26 = scalar_select %p4551_p3, 1, 0 }
  0x68   : > { %s921_s2 = sshll.u32 %s5240_s8, 4  ;;  %s4568_s2 = int_to_ptr.hbm [resolvable:$true] %s921_s2 }
  0x69   : > { %5246 = sst [smem:[#allocation82_spill]] %s5245_s26 }
  0x6c   : > { %s904_s22 = sshll.u32 %s5244_s29, 4  ;;  %s3588_s13 = scalar_lea.hbm %s5244_s29, 16  ;;  %s4543_s22 = int_to_ptr.hbm [resolvable:$true] %s904_s22 }
  0x6d   : > { %s3581_s17 = sshra.s32 %s4543_s22, 4  ;;  %s3582_s17 = int_to_ptr.hbm [resolvable:$true] %s3581_s17 }
  0x6e   : > { %s3583_s21 = scalar_lea.hbm %s3582_s17, 16  ;;  %p3589_p11 = scmp.lt.s32.totalorder %s3582_s17, %s5244_s29 }
  0x6f   : > { %p3584_p7 = scmp.ne.s32.totalorder %s3582_s17, %s3583_s21  ;;  %p3590_p12 = scmp.lt.s32.totalorder %s3588_s13, %s3583_s21 }
  0x71   : > { %p3586_p9 = pnand %p4576_p8, %p3584_p7  ;;  %p3591_p13 = por %p3590_p12, %p3589_p11 }
  0x73   : > { %p3587_p10 = pneg %p3586_p9 }
  0x75   : > { %p3592_p0 = pnand %p3591_p13, %p3587_p10 }
  0x77   : > { %3595 = shalt.err (!%p3592_p0)
}
  0x78   : > { %s4321_s11 = smov 64   ;;  %s4322_s26 = smov 4  }
  0x79   : > { %3327 = dma.hbm_to_vmem [thread:$0]  (!%p4564_p6), %s4543_s22, 256, %s907_s1, [#allocation6], %s4321_s11, %s4321_s11, %s4322_s26  }
  0x7a   : > { %s3611_s13 = sshra.s32 %s4568_s2, 4  ;;  %s3618_s21 = scalar_lea.hbm %s5240_s8, 16  ;;  %s3612_s13 = int_to_ptr.hbm [resolvable:$true] %s3611_s13 }
  0x7b   : > { %s3613_s17 = scalar_lea.hbm %s3612_s13, 16  ;;  %p3619_p9 = scmp.lt.s32.totalorder %s3612_s13, %s5240_s8 }
  0x7c   : > { %p3614_p2 = scmp.ne.s32.totalorder %s3612_s13, %s3613_s17  ;;  %p3620_p10 = scmp.lt.s32.totalorder %s3618_s21, %s3613_s17 }
  0x7e   : > { %p3616_p4 = pnand %p3614_p2, %p4576_p8  ;;  %p3621_p11 = por %p3620_p10, %p3619_p9 }
  0x80   : > { %p3617_p7 = pneg %p3616_p4 }
  0x82   : > { %p3622_p12 = pnand %p3621_p11, %p3617_p7 }
  0x84   : > { %3625 = shalt.err (!%p3622_p12)
}
  0x85   : > { %3330 = dma.hbm_to_vmem [thread:$0]  (!%p4564_p6), %s4568_s2, 256, %s924_s28, [#allocation9], %s4321_s11, %s4321_s11, %s4322_s26  }
  0x86   : > { %s995_s22 = sshll.u32 %s5238_s12, 4  ;;  %s4323_s1 = smov [#allocation11]   ;;  %s4605_s22 = int_to_ptr.hbm [resolvable:$true] %s995_s22 }
  0x87   : > { %s957_s29 = sshll.u32 %s4323_s1, 4  ;;  %s3641_s13 = sshra.s32 %s4591_s10, 4  ;;  %s958_s29 = int_to_ptr.vmem [resolvable:$true] %s957_s29  ;;  %s3642_s13 = int_to_ptr.hbm [resolvable:$true] %s3641_s13 }
  0x88   : > { %s3643_s17 = scalar_lea.hbm %s3642_s13, 16  ;;  %s3648_s21 = scalar_lea.hbm %s4410_s30, 16 }
  0x89   : > { %p3644_p13 = scmp.ne.s32.totalorder %s3642_s13, %s3643_s17  ;;  %p3649_p4 = scmp.lt.s32.totalorder %s3642_s13, %s4410_s30 }
  0x8a   : > { %p3650_p7 = scmp.lt.s32.totalorder %s3648_s21, %s3643_s17 }
  0x8b   : > { %p3646_p0 = pnand %p3644_p13, %p4576_p8 }
  0x8c   : > { %p3651_p9 = por %p3650_p7, %p3649_p4 }
  0x8d   : > { %p3647_p2 = pneg %p3646_p0 }
  0x8f   : > { %p3652_p10 = pnand %p3651_p9, %p3647_p2 }
  0x91   : > { %3655 = shalt.err (!%p3652_p10)
}
  0x92   : > { %3336 = dma.hbm_to_vmem [thread:$0]  (!%p4564_p6), %s4591_s10, 256, %s958_s29, [#allocation12], %s4321_s11, %s4321_s11, %s4322_s26  }
  0x93   : > { %s4324_s2 = smov [#allocation14]   ;;  %s1027_s1 = sshll.u32 %s5242_s4, 4  ;;  %s4619_s1 = int_to_ptr.hbm [resolvable:$true] %s1027_s1 }
  0x94   : > { %s997_s28 = sshll.u32 %s4324_s2, 4  ;;  %s3671_s13 = sshra.s32 %s4605_s22, 4  ;;  %s998_s28 = int_to_ptr.vmem [resolvable:$true] %s997_s28  ;;  %s3672_s13 = int_to_ptr.hbm [resolvable:$true] %s3671_s13 }
  0x95   : > { %s3673_s17 = scalar_lea.hbm %s3672_s13, 16  ;;  %s3678_s21 = scalar_lea.hbm %s5238_s12, 16 }
  0x96   : > { %p3674_p11 = scmp.ne.s32.totalorder %s3672_s13, %s3673_s17  ;;  %p3679_p0 = scmp.lt.s32.totalorder %s3672_s13, %s5238_s12 }
  0x97   : > { %p3680_p2 = scmp.lt.s32.totalorder %s3678_s21, %s3673_s17 }
  0x98   : > { %p3676_p12 = pnand %p3674_p11, %p4576_p8 }
  0x99   : > { %p3681_p4 = por %p3680_p2, %p3679_p0 }
  0x9a   : > { %p3677_p13 = pneg %p3676_p12 }
  0x9c   : > { %p3682_p7 = pnand %p3681_p4, %p3677_p13 }
  0x9e   : > { %3685 = shalt.err (!%p3682_p7)
}
  0x9f   : > { %3342 = dma.hbm_to_vmem [thread:$0]  (!%p4564_p6), %s4605_s22, 256, %s998_s28, [#allocation15], %s4321_s11, %s4321_s11, %s4322_s26  }
  0xa0   : > { %s1053_s29 = sshll.u32 %s5235_s20, 4  ;;  %s4325_s10 = smov [#allocation17]   ;;  %s4633_s29 = int_to_ptr.hbm [resolvable:$true] %s1053_s29 }
  0xa1   : > { %s1029_s2 = sshll.u32 %s4325_s10, 4  ;;  %s3701_s13 = sshra.s32 %s4619_s1, 4  ;;  %s1030_s2 = int_to_ptr.vmem [resolvable:$true] %s1029_s2  ;;  %s3702_s13 = int_to_ptr.hbm [resolvable:$true] %s3701_s13 }
  0xa2   : > { %s3703_s17 = scalar_lea.hbm %s3702_s13, 1  ;;  %s3708_s21 = scalar_lea.hbm %s5242_s4, 1 }
  0xa3   : > { %p3704_p9 = scmp.ne.s32.totalorder %s3702_s13, %s3703_s17  ;;  %p3709_p12 = scmp.lt.s32.totalorder %s3702_s13, %s5242_s4 }
  0xa4   : > { %p3710_p13 = scmp.lt.s32.totalorder %s3708_s21, %s3703_s17 }
  0xa5   : > { %p3706_p10 = pnand %p3704_p9, %p4576_p8 }
  0xa6   : > { %p3711_p0 = por %p3710_p13, %p3709_p12 }
  0xa7   : > { %p3707_p11 = pneg %p3706_p10 }
  0xa9   : > { %p3712_p2 = pnand %p3711_p0, %p3707_p11 }
  0xab   : > { %3715 = shalt.err (!%p3712_p2)
}
  0xac   : > { %3348 = dma.hbm_to_vmem [thread:$0]  (!%p4564_p6), %s4619_s1, 16, %s1030_s2, [#allocation18]  }
  0xad   : > { %s4326_s22 = smov [#allocation20]   ;;  %s1077_s10 = sshll.u32 %s5243_s3, 4  ;;  %s4644_s10 = int_to_ptr.hbm [resolvable:$true] %s1077_s10 }
  0xae   : > { %s1055_s28 = sshll.u32 %s4326_s22, 4  ;;  %s3731_s13 = sshra.s32 %s4633_s29, 4  ;;  %s1056_s28 = int_to_ptr.vmem [resolvable:$true] %s1055_s28  ;;  %s3732_s13 = int_to_ptr.hbm [resolvable:$true] %s3731_s13 }
  0xaf   : > { %s3733_s17 = scalar_lea.hbm %s3732_s13, 1  ;;  %s3738_s21 = scalar_lea.hbm %s5235_s20, 1 }
  0xb0   : > { %p3734_p4 = scmp.ne.s32.totalorder %s3732_s13, %s3733_s17  ;;  %p3739_p10 = scmp.lt.s32.totalorder %s3732_s13, %s5235_s20 }
  0xb1   : > { %p3740_p11 = scmp.lt.s32.totalorder %s3738_s21, %s3733_s17 }
  0xb2   : > { %p3736_p7 = pnand %p3734_p4, %p4576_p8 }
  0xb3   : > { %p3741_p12 = por %p3740_p11, %p3739_p10 }
  0xb4   : > { %p3737_p9 = pneg %p3736_p7 }
  0xb6   : > { %p3742_p13 = pnand %p3741_p12, %p3737_p9 }
  0xb8   : > { %3745 = shalt.err (!%p3742_p13)
}
  0xb9   : > { %3354 = dma.hbm_to_vmem [thread:$0]  (!%p4564_p6), %s4633_s29, 16, %s1056_s28, [#allocation21]  }
  0xba   : > { %s938_s1 = sshll.u32 %s5236_s19, 4  ;;  %s4327_s2 = smov [#allocation23]   ;;  %s4655_s1 = int_to_ptr.hbm [resolvable:$true] %s938_s1 }
  0xbb   : > { %s1079_s22 = sshll.u32 %s4327_s2, 4  ;;  %s3761_s13 = sshra.s32 %s4644_s10, 4  ;;  %s1080_s22 = int_to_ptr.vmem [resolvable:$true] %s1079_s22  ;;  %s3762_s13 = int_to_ptr.hbm [resolvable:$true] %s3761_s13 }
  0xbc   : > { %s3763_s17 = scalar_lea.hbm %s3762_s13, 1  ;;  %s3768_s21 = scalar_lea.hbm %s5243_s3, 1 }
  0xbd   : > { %p3764_p0 = scmp.ne.s32.totalorder %s3762_s13, %s3763_s17  ;;  %p3769_p7 = scmp.lt.s32.totalorder %s3762_s13, %s5243_s3 }
  0xbe   : > { %p3770_p9 = scmp.lt.s32.totalorder %s3768_s21, %s3763_s17 }
  0xbf   : > { %p3766_p2 = pnand %p3764_p0, %p4576_p8 }
  0xc0   : > { %p3771_p10 = por %p3770_p9, %p3769_p7 }
  0xc1   : > { %p3767_p4 = pneg %p3766_p2 }
  0xc3   : > { %p3772_p11 = pnand %p3771_p10, %p3767_p4 }
  0xc5   : > { %3775 = shalt.err (!%p3772_p11)
}
  0xc6   : > { %3360 = dma.hbm_to_vmem [thread:$0]  (!%p4564_p6), %s4644_s10, 16, %s1080_s22, [#allocation24]  }
  0xc7   : > { %s4328_s29 = smov [#allocation10]   ;;  %s978_s2 = sshll.u32 %s5232_s27, 4  ;;  %s4666_s2 = int_to_ptr.hbm [resolvable:$true] %s978_s2 }
  0xc8   : > { %s940_s28 = sshll.u32 %s4328_s29, 4  ;;  %s3791_s13 = sshra.s32 %s4655_s1, 4  ;;  %s941_s28 = int_to_ptr.vmem [resolvable:$true] %s940_s28  ;;  %s3792_s13 = int_to_ptr.hbm [resolvable:$true] %s3791_s13 }
  0xc9   : > { %s3793_s17 = scalar_lea.hbm %s3792_s13, 16  ;;  %s3798_s21 = scalar_lea.hbm %s5236_s19, 16 }
  0xca   : > { %p3794_p12 = scmp.ne.s32.totalorder %s3792_s13, %s3793_s17  ;;  %p3799_p2 = scmp.lt.s32.totalorder %s3792_s13, %s5236_s19 }
  0xcb   : > { %p3800_p4 = scmp.lt.s32.totalorder %s3798_s21, %s3793_s17 }
  0xcc   : > { %p3796_p13 = pnand %p3794_p12, %p4576_p8 }
  0xcd   : > { %p3801_p7 = por %p3800_p4, %p3799_p2 }
  0xce   : > { %p3797_p0 = pneg %p3796_p13 }
  0xd0   : > { %p3802_p9 = pnand %p3801_p7, %p3797_p0 }
  0xd2   : > { %3805 = shalt.err (!%p3802_p9)
}
  0xd3   : > { %3333 = dma.hbm_to_vmem [thread:$0]  (!%p4564_p6), %s4655_s1, 256, %s941_s28, [#allocation9], %s4321_s11, %s4321_s11, %s4322_s26  }
  0xd4   : > { %s1012_s10 = sshll.u32 %s5239_s9, 4  ;;  %s4329_s22 = smov [#allocation13]   ;;  %s4680_s10 = int_to_ptr.hbm [resolvable:$true] %s1012_s10 }
  0xd5   : > { %s980_s29 = sshll.u32 %s4329_s22, 4  ;;  %s3821_s13 = sshra.s32 %s4666_s2, 4  ;;  %s981_s29 = int_to_ptr.vmem [resolvable:$true] %s980_s29  ;;  %s3822_s13 = int_to_ptr.hbm [resolvable:$true] %s3821_s13 }
  0xd6   : > { %s3823_s17 = scalar_lea.hbm %s3822_s13, 16  ;;  %s3828_s21 = scalar_lea.hbm %s5232_s27, 16 }
  0xd7   : > { %p3824_p10 = scmp.ne.s32.totalorder %s3822_s13, %s3823_s17  ;;  %p3829_p13 = scmp.lt.s32.totalorder %s3822_s13, %s5232_s27 }
  0xd8   : > { %p3830_p0 = scmp.lt.s32.totalorder %s3828_s21, %s3823_s17 }
  0xd9   : > { %p3826_p11 = pnand %p3824_p10, %p4576_p8 }
  0xda   : > { %p3831_p2 = por %p3830_p0, %p3829_p13 }
  0xdb   : > { %p3827_p12 = pneg %p3826_p11 }
  0xdd   : > { %p3832_p4 = pnand %p3831_p2, %p3827_p12 }
  0xdf   : > { %3835 = shalt.err (!%p3832_p4)
}
  0xe0   : > { %3339 = dma.hbm_to_vmem [thread:$0]  (!%p4564_p6), %s4666_s2, 256, %s981_s29, [#allocation12], %s4321_s11, %s4321_s11, %s4322_s26  }
  0xe1   : > { %s4330_s1 = smov [#allocation16]   ;;  %s1038_s22 = sshll.u32 %s5241_s6, 4  ;;  %s4694_s22 = int_to_ptr.hbm [resolvable:$true] %s1038_s22 }
  0xe2   : > { %s1014_s28 = sshll.u32 %s4330_s1, 4  ;;  %s3851_s13 = sshra.s32 %s4680_s10, 4  ;;  %s1015_s28 = int_to_ptr.vmem [resolvable:$true] %s1014_s28  ;;  %s3852_s13 = int_to_ptr.hbm [resolvable:$true] %s3851_s13 }
  0xe3   : > { %s3853_s17 = scalar_lea.hbm %s3852_s13, 16  ;;  %s3858_s21 = scalar_lea.hbm %s5239_s9, 16 }
  0xe4   : > { %p3854_p7 = scmp.ne.s32.totalorder %s3852_s13, %s3853_s17  ;;  %p3859_p11 = scmp.lt.s32.totalorder %s3852_s13, %s5239_s9 }
  0xe5   : > { %p3860_p12 = scmp.lt.s32.totalorder %s3858_s21, %s3853_s17 }
  0xe6   : > { %p3856_p9 = pnand %p3854_p7, %p4576_p8 }
  0xe7   : > { %p3861_p13 = por %p3860_p12, %p3859_p11 }
  0xe8   : > { %p3857_p10 = pneg %p3856_p9 }
  0xea   : > { %p3862_p0 = pnand %p3861_p13, %p3857_p10 }
  0xec   : > { %3865 = shalt.err (!%p3862_p0)
}
  0xed   : > { %3345 = dma.hbm_to_vmem [thread:$0]  (!%p4564_p6), %s4680_s10, 256, %s1015_s28, [#allocation15], %s4321_s11, %s4321_s11, %s4322_s26  }
  0xee   : > { %s1065_s2 = sshll.u32 %s5234_s24, 4  ;;  %s4331_s29 = smov [#allocation19]   ;;  %s4708_s2 = int_to_ptr.hbm [resolvable:$true] %s1065_s2 }
  0xef   : > { %s1040_s1 = sshll.u32 %s4331_s29, 4  ;;  %s3881_s13 = sshra.s32 %s4694_s22, 4  ;;  %s1041_s1 = int_to_ptr.vmem [resolvable:$true] %s1040_s1  ;;  %s3882_s13 = int_to_ptr.hbm [resolvable:$true] %s3881_s13 }
  0xf0   : > { %s3883_s17 = scalar_lea.hbm %s3882_s13, 16  ;;  %s3888_s21 = scalar_lea.hbm %s5241_s6, 16 }
  0xf1   : > { %p3884_p2 = scmp.ne.s32.totalorder %s3882_s13, %s3883_s17  ;;  %p3889_p9 = scmp.lt.s32.totalorder %s3882_s13, %s5241_s6 }
  0xf2   : > { %p3890_p10 = scmp.lt.s32.totalorder %s3888_s21, %s3883_s17 }
  0xf3   : > { %p3886_p4 = pnand %p3884_p2, %p4576_p8 }
  0xf4   : > { %p3891_p11 = por %p3890_p10, %p3889_p9 }
  0xf5   : > { %p3887_p7 = pneg %p3886_p4 }
  0xf7   : > { %p3892_p12 = pnand %p3891_p11, %p3887_p7 }
  0xf9   : > { %3895 = shalt.err (!%p3892_p12)
}
  0xfa   : > { %3351 = dma.hbm_to_vmem [thread:$0]  (!%p4564_p6), %s4694_s22, 256, %s1041_s1, [#allocation18], %s4321_s11, %s4321_s11, %s4322_s26  }
  0xfb   : > { %s4332_s10 = smov [#allocation22]   ;;  %s1088_s29 = sshll.u32 %s5237_s14, 4  ;;  %s4722_s29 = int_to_ptr.hbm [resolvable:$true] %s1088_s29 }
  0xfc   : > { %s1067_s28 = sshll.u32 %s4332_s10, 4  ;;  %s3911_s13 = sshra.s32 %s4708_s2, 4  ;;  %s1068_s28 = int_to_ptr.vmem [resolvable:$true] %s1067_s28  ;;  %s3912_s13 = int_to_ptr.hbm [resolvable:$true] %s3911_s13 }
  0xfd   : > { %s3913_s17 = scalar_lea.hbm %s3912_s13, 1  ;;  %s3918_s21 = scalar_lea.hbm %s5234_s24, 1 }
  0xfe   : > { %p3914_p13 = scmp.ne.s32.totalorder %s3912_s13, %s3913_s17  ;;  %p3919_p4 = scmp.lt.s32.totalorder %s3912_s13, %s5234_s24 }
  0xff   : > { %p3920_p7 = scmp.lt.s32.totalorder %s3918_s21, %s3913_s17 }
 0x100   : > { %p3916_p0 = pnand %p3914_p13, %p4576_p8 }
 0x101   : > { %p3921_p9 = por %p3920_p7, %p3919_p4 }
 0x102   : > { %p3917_p2 = pneg %p3916_p0 }
 0x104   : > { %p3922_p10 = pnand %p3921_p9, %p3917_p2 }
 0x106   : > { %3925 = shalt.err (!%p3922_p10)
}
 0x107   : > { %3357 = dma.hbm_to_vmem [thread:$0]  (!%p4564_p6), %s4708_s2, 16, %s1068_s28, [#allocation21]  }
 0x108   : > { %s1103_s22 = sshll.u32 %s5233_s25, 4  ;;  %s4333_s1 = smov [#allocation25]   ;;  %s4733_s22 = int_to_ptr.hbm [resolvable:$true] %s1103_s22 }
 0x109   : > { %s1090_s10 = sshll.u32 %s4333_s1, 4  ;;  %s3941_s13 = sshra.s32 %s4722_s29, 4  ;;  %s1091_s10 = int_to_ptr.vmem [resolvable:$true] %s1090_s10  ;;  %s3942_s13 = int_to_ptr.hbm [resolvable:$true] %s3941_s13 }
 0x10a   : > { %s3943_s17 = scalar_lea.hbm %s3942_s13, 16  ;;  %s3948_s21 = scalar_lea.hbm %s5237_s14, 16 }
 0x10b   : > { %p3944_p11 = scmp.ne.s32.totalorder %s3942_s13, %s3943_s17  ;;  %p3949_p0 = scmp.lt.s32.totalorder %s3942_s13, %s5237_s14 }
 0x10c   : > { %p3950_p2 = scmp.lt.s32.totalorder %s3948_s21, %s3943_s17 }
 0x10d   : > { %p3946_p12 = pnand %p3944_p11, %p4576_p8 }
 0x10e   : > { %p3951_p4 = por %p3950_p2, %p3949_p0 }
 0x10f   : > { %p3947_p13 = pneg %p3946_p12 }
 0x111   : > { %p3952_p7 = pnand %p3951_p4, %p3947_p13 }
 0x113   : > { %3955 = shalt.err (!%p3952_p7)
}
 0x114   : > { %3363 = dma.hbm_to_vmem [thread:$0]  (!%p4564_p6), %s4722_s29, 256, %s1091_s10, [#allocation24], %s4321_s11, %s4321_s11, %s4322_s26  }
 0x115   : > { %s4334_s2 = smov [#allocation26]   ;;  %s3971_s1 = sshra.s32 %s4733_s22, 4  ;;  %s3972_s1 = int_to_ptr.hbm [resolvable:$true] %s3971_s1 }
 0x116   : > { %s1105_s28 = sshll.u32 %s4334_s2, 4  ;;  %s3973_s13 = scalar_lea.hbm %s3972_s1, 1  ;;  %s1106_s28 = int_to_ptr.vmem [resolvable:$true] %s1105_s28 }
 0x117   : > { %p3974_p9 = scmp.ne.s32.totalorder %s3972_s1, %s3973_s13  ;;  %s3978_s17 = scalar_lea.hbm %s5233_s25, 1 }
 0x118   : > { %p3979_p12 = scmp.lt.s32.totalorder %s3972_s1, %s5233_s25  ;;  %p3980_p13 = scmp.lt.s32.totalorder %s3978_s17, %s3973_s13 }
 0x119   : > { %p3976_p10 = pnand %p3974_p9, %p4576_p8 }
 0x11a   : > { %p3981_p0 = por %p3980_p13, %p3979_p12 }
 0x11b   : > { %p3977_p11 = pneg %p3976_p10 }
 0x11d   : > { %p3982_p2 = pnand %p3981_p0, %p3977_p11 }
 0x11f   : > { %3985 = shalt.err (!%p3982_p2)
}
 0x120   : > { %3366 = dma.hbm_to_vmem [thread:$0]  (!%p4564_p6), %s4733_s22, 16, %s1106_s28, [#allocation27]  }
 0x121   : > { %s5184_s5 = sadd.s32 4294967294, %s4283_s18   ;;  %s4756_s26 = sadd.s32 1, %s4283_s18  }
 0x122   : > { %s158_s7 = ssub.s32 %s4283_s18, %s4756_s26  ;;  %s161_s11 = sadd.s32 1, %s4279_s16 }
 0x123   : > { %s5249_s29 = sld [smem:[#allocation50_spill]]  ;;  %p159_p8 = scmp.eq.s32.totalorder %s158_s7, 0 }
 0x124   : > { %p168_p4 = scmp.ne.s32.totalorder %s4279_s16, %s4275_s0  ;;  %p169_p7 = scmp.eq.s32.totalorder %s4283_s18, 0 }
 0x125   : > { %p174_p9 = scmp.ne.s32.totalorder %s4275_s0, %s4271_s15  ;;  %s5252_s2 = sld [smem:[#allocation51_spill]] }
 0x126   : > { %s4767_s10 = scalar_select %p159_p8, %s4279_s16, %s161_s11  }
 0x127   : > { %p4769_p10 = por %p169_p7, %p168_p4  ;;  %p4775_p6 = por %p175_p1, %p174_p9 }
 0x128   : > { %p770_p11 = scmp.eq.s32.totalorder %s4546_s23, 1  ;;  %p776_p12 = scmp.eq.s32.totalorder %s5184_s5, 1 }
 0x129   : > { %p3404_p13 = scmp.lt.s32.totalorder %s4283_s18, 2  ;;  %s1137_s28 = sand.u32 1, %s4279_s16  }
 0x12a   : > { %p4784_p0 = por %p770_p11, %p168_p4  ;;  %p4788_p2 = por %p776_p12, %p174_p9 }
 0x12b   : > { %s4792_s17 = sshll.u32 %s1137_s28, 1  ;;  %s3087_s7 = sshll.u32 %s4283_s18, 1 }
 0x12c   : > { %s1145_s11 = scalar_lea.hbm %s5249_s29, %s3087_s7  ;;  %s1141_s3 = scalar_lea.vmem [#allocation2], %s4792_s17 }
 0x12d   : > { %s1149_s4 = sshll.u32 %s1141_s3, 4  ;;  %s1147_s5 = sshll.u32 %s1145_s11, 4  ;;  %s1150_s4 = int_to_ptr.vmem [resolvable:$true] %s1149_s4  ;;  %s1148_s5 = int_to_ptr.hbm [resolvable:$true] %s1147_s5 }
 0x12e   : > { %p4799_p8 = pnand %p3404_p13, %p4769_p10  ;;  %s1164_s8 = scalar_lea.hbm %s5252_s2, %s3087_s7 }
 0x12f   : > { %s1156_s9 = sand.u32 1, %s4283_s18   ;;  %s1138_s12 = scalar_lea.sflag [#allocation3], %s1137_s28 }
 0x130   : > { %s4001_s14 = sshra.s32 %s1148_s5, 4  ;;  %p4005_p7 = pneg %p4799_p8  ;;  %s4002_s14 = int_to_ptr.hbm [resolvable:$true] %s4001_s14 }
 0x131   : > { %s4003_s19 = scalar_lea.hbm %s4002_s14, 2  ;;  %s4008_s3 = scalar_lea.hbm %s5249_s29, 4 }
 0x132   : > { %p4004_p4 = scmp.ne.s32.totalorder %s4002_s14, %s4003_s19  ;;  %p4009_p10 = scmp.lt.s32.totalorder %s4002_s14, %s5249_s29 }
 0x133   : > { %p4010_p12 = scmp.lt.s32.totalorder %s4008_s3, %s4003_s19 }
 0x134   : > { %p4006_p9 = pnand %p4005_p7, %p4004_p4 }
 0x135   : > { %p4011_p13 = por %p4010_p12, %p4009_p10 }
 0x136   : > { %p4007_p11 = pneg %p4006_p9 }
 0x138   : > { %p4012_p5 = pnand %p4011_p13, %p4007_p11 }
 0x13a   : > { %4015 = shalt.err (!%p4012_p5)
}
 0x13b   : > { %3370 = dma.hbm_to_vmem [thread:$0]  (!%p4799_p8), %s1148_s5, 32, %s1150_s4, %s1138_s12  }
 0x13c   : > { %s1166_s21 = sshll.u32 %s1164_s8, 4  ;;  %s1160_s28 = scalar_lea.vmem [#allocation5], %s4792_s17  ;;  %s1167_s21 = int_to_ptr.hbm [resolvable:$true] %s1166_s21 }
 0x13d   : > { %s1168_s7 = sshll.u32 %s1160_s28, 4  ;;  %s1157_s11 = scalar_lea.sflag [#allocation6], %s1156_s9  ;;  %s1169_s7 = int_to_ptr.vmem [resolvable:$true] %s1168_s7 }
 0x13e   : > { %s4031_s20 = sshra.s32 %s1167_s21, 4  ;;  %s4038_s19 = scalar_lea.hbm %s5252_s2, 4  ;;  %s4032_s20 = int_to_ptr.hbm [resolvable:$true] %s4031_s20 }
 0x13f   : > { %s4033_s14 = scalar_lea.hbm %s4032_s20, 2  ;;  %p4039_p11 = scmp.lt.s32.totalorder %s4032_s20, %s5252_s2 }
 0x140   : > { %p4034_p4 = scmp.ne.s32.totalorder %s4032_s20, %s4033_s14  ;;  %p4040_p10 = scmp.lt.s32.totalorder %s4038_s19, %s4033_s14 }
 0x142   : > { %p4036_p5 = pnand %p4034_p4, %p4005_p7  ;;  %p4041_p12 = por %p4040_p10, %p4039_p11 }
 0x144   : > { %p4037_p9 = pneg %p4036_p5 }
 0x146   : > { %p4042_p13 = pnand %p4041_p12, %p4037_p9 }
 0x148   : > { %4045 = shalt.err (!%p4042_p13)
}
 0x149   : > { %3373 = dma.hbm_to_vmem [thread:$0]  (!%p4799_p8), %s1167_s21, 32, %s1169_s7, %s1157_s11  }
 0x14a   : > { %1177 = sbr.rel (%p4551_p3) target bundleno = 3046 (0xbe6), region = 140  ;;  %s4825_s9 = sand.u32 (!%p4551_p3), 1, %s4275_s0  }
 0x14b   : > { %s3091_s12 = sshll.u32 (!%p4551_p3), %s4825_s9, 1  ;;  %s1180_s4 = scalar_lea.sflag (!%p4551_p3), [#allocation3], %s4825_s9 }
 0x14c   : > { %s4829_s5 = scalar_lea.vmem (!%p4551_p3), [#allocation2], %s3091_s12 }
 0x14f   : > { %4218 = dma.done.wait (%p4775_p6), %s1180_s4, 32  }
 0x150   : > { %4220 = vsyncadd (%p4775_p6), %s1180_s4, 4294967264  ;;  %s4836_s6 = sand.u32 1, %s4546_s23   ;;  %s4839_s17 = scalar_lea.vmem [#allocation5], %s3091_s12 }
 0x151   : > { %s1190_s20 = scalar_lea.sflag [#allocation6], %s4836_s6 }
 0x152   : > { %4222 = dma.done.wait (%p4775_p6), %s1190_s20, 32  }
 0x153   : > { %4224 = vsyncadd (%p4775_p6), %s1190_s20, 4294967264 }
 0x154   : > { %4226 = dma.done.wait (%p175_p1), [#allocation6], 256  }
 0x155   : > { %4228 = vsyncadd (%p175_p1), [#allocation6], 4294967040 }
 0x156   : > { %4230 = dma.done.wait (%p175_p1), [#allocation9], 512  }
 0x157   : > { %4232 = vsyncadd (%p175_p1), [#allocation9], 4294966784 }
 0x158   : > { %4234 = dma.done.wait (%p175_p1), [#allocation12], 512  }
 0x159   : > { %4236 = vsyncadd (%p175_p1), [#allocation12], 4294966784 }
 0x15a   : > { %4238 = dma.done.wait (%p175_p1), [#allocation15], 512  }
 0x15b   : > { %4240 = vsyncadd (%p175_p1), [#allocation15], 4294966784 }
 0x15c   : > { %4242 = dma.done.wait (%p175_p1), [#allocation18], 272  }
 0x15d   : > { %4244 = vsyncadd (%p175_p1), [#allocation18], 4294967024 }
 0x15e   : > { %4246 = dma.done.wait (%p175_p1), [#allocation21], 32  }
 0x15f   : > { %4248 = vsyncadd (%p175_p1), [#allocation21], 4294967264 }
 0x160   : > { %4250 = dma.done.wait (%p175_p1), [#allocation24], 272  }
 0x161   : > { %4252 = vsyncadd (%p175_p1), [#allocation24], 4294967024 }
 0x162   : > { %4254 = dma.done.wait (%p175_p1), [#allocation27], 16  }
 0x163   : > { %4256 = vsyncadd (%p175_p1), [#allocation27], 4294967280  ;;  %s5257_s22 = sld [smem:[#allocation48_spill]]  ;;  %p1383_p3 = scmp.lt.s32.totalorder %s4546_s23, 1  ;;  %vm1404_vm0 = vcmask 261120   ;;  %v4335_v2 = vmov 32.0  }
 0x164   : > { %3525 = vrcp.f32 %v4335_v2  ;;  %v3235_v14 = vld [vmem:[#allocation7 + $0x8] sm:$0xff]  ;;  %v3237_v15 = vld [vmem:[#allocation8 + $0x8] sm:$0xff]  ;;  %v3234_v17 = vld [vmem:[#allocation7] sm:$0xff]  ;;  %s5258_s7 = sld [smem:[#allocation52_spill]]  ;;  %s3108_s12 = sshll.u32 %s4825_s9, 2  ;;  %vm1573_vm5 = vcmask 64512  }
 0x165   : > { %s4879_s3 = scalar_select %p1383_p3, %s4546_s23, 1  ;;  %v3239_v16 = vld [vmem:[#allocation10 + $0x8] sm:$0xff]  ;;  %1472 = vmatpush.bf16.msra.mxu0 %v3235_v14  ;;  %1505 = vmatpush.bf16.msra.mxu1 %v3237_v15  ;;  %v3236_v18 = vld [vmem:[#allocation8] sm:$0xff]  ;;  %v3238_v19 = vld [vmem:[#allocation10] sm:$0xff]  ;;  %vm1546_vm6 = vcmask 257024   ;;  %vm1722_vm7 = vcmask 1043456  }
 0x166   : > { %1538 = vmatpush.bf16.msra.mxu2 %v3239_v16  ;;  %s5259_s11 = sld [smem:[#allocation53_spill]]  ;;  %s4336_s4 = smov 112   ;;  %v1398_v62 = vld [vmem:[%s4829_s5] sm:$0x3]  ;;  %vm2186_vm15 = vcmask 130048  }
 0x167   : > { %s3112_s21 = sshll.u32 %s4879_s3, 3  ;;  %s5260_s14 = sld [smem:[#allocation57_spill]]  ;;  %vm1399_vm8 = vnez %v1398_v62 }
 0x168   : > { %s5261_s19 = sld [smem:[#allocation55_spill]]  ;;  %s4337_s20 = smov 120  }
 0x169   : > { %s1386_s28 = scalar_lea.vmem %s5257_s22, %s3112_s21  ;;  %1473 = vmatpush.bf16.msra.mxu0 %v3234_v17  ;;  %1506 = vmatpush.bf16.msra.mxu1 %v3236_v18  ;;  %s5262_s8 = sld [smem:[#allocation59_spill]] }
 0x16a   : > { %v4883_v0 = vld [vmem:[%s1386_s28] sm:$0xff]  ;;  %v3526_v3 = vpop.eup %3525  ;;  %1539 = vmatpush.bf16.msra.mxu2 %v3238_v19  ;;  %s4905_s22 = scalar_lea.vmem [#allocation29], %s3108_s12  ;;  %s4338_s21 = smov 104  }
 0x16b   : > { %v1405_v1 = vsel %vm1404_vm0, %v4883_v0, 0.0  ;;  %v1409_v4 = vmul.f32 32.0, %v3526_v3  ;;  %vm1413_vm1 = vweird.f32 %v3526_v3  ;;  %v3509_v29 = vld [vmem:[%s5258_s7] ss:$0 sm:$0xff]  ;;  %s4911_s28 = scalar_lea.vmem [#allocation31], %s3108_s12  ;;  %s5265_s5 = sld [smem:[#allocation60_spill]] }
 0x16c   : > { %1406 = vadd.xlane.f32.xlu0 %v1405_v1  ;;  %v3510_v32 = vld [vmem:[%s5259_s11] ss:$0 sm:$0xff]  ;;  %v4339_v1 = vmov 0   ;;  %s5266_s7 = sld [smem:[#allocation49_spill]]  ;;  %s3233_s11 = sshll.u32 %s4879_s3, 4 }
 0x16d   : > { %v1410_v5 = vsub.f32 1.0, %v1409_v4  ;;  %v3512_v36 = vld [vmem:[%s5260_s14] ss:$0 sm:$0xff]  ;;  %v1650_v2 = vsel %vm1399_vm8, 16843009, %v4339_v1  ;;  %s4985_s3 = sshll.u32 %s4825_s9, 3 }
 0x16e   : > { %v3511_v37 = vld [vmem:[%s5261_s19] ss:$0 sm:$0xff]  ;;  %s5267_s19 = sld [smem:[#allocation66_spill]]  ;;  %s2567_s2 = scalar_lea.sflag [#allocation30], %s4836_s6 }
 0x16f   : > { %v1411_v6 = vmul.f32 %v3526_v3, %v1410_v5  ;;  %v3513_v43 = vld [vmem:[%s5262_s8] ss:$0 sm:$0xff]  ;;  %s4990_s8 = scalar_lea.vmem [#allocation32], %s4985_s3  ;;  %s5268_s12 = sld [smem:[#allocation61_spill]] }
 0x170   : > { %v1854_v4 = vld [vmem:[#allocation11 + $0x8] sm:$0xf] }
 0x171   : > { %v1412_v7 = vadd.f32 %v3526_v3, %v1411_v6 }
 0x172   : > { %s1391_s14 = scalar_lea.vmem %s5266_s7, %s3233_s11  ;;  %s5270_s7 = sld [smem:[#allocation64_spill]] }
 0x173   : > { %v4887_v8 = vsel %vm1413_vm1, %v3526_v3, %v1412_v7  ;;  %v1651_v3 = vunpack.c.0.s8 %v1650_v2  ;;  %s5020_s11 = scalar_lea.vmem [#allocation34], %s4985_s3 }
 0x175   : > { %vm4927_vm9 = vcmp.ne.s32.totalorder %v1651_v3, 0 }
 0x1df   : > { %v1407_v9 = vpop.xlane.xlu0 %1406 }
 0x1e0   : > { %v1415_v10 = vmul.f32 %v4887_v8, %v1407_v9 }
 0x1e2   : > { %v1416_v11 = vsub.f32 %v4883_v0, %v1415_v10 }
 0x1e4   : > { %v1417_v12 = vmul.f32 %v1416_v11, %v1416_v11 }
 0x1e6   : > { %v1418_v13 = vsel %vm1404_vm0, %v1417_v12, 0.0 }
 0x1e7   : > { %1419 = vadd.xlane.f32.xlu0 %v1418_v13 }
 0x25a   : > { %v1420_v20 = vpop.xlane.xlu0 %1419 }
 0x25b   : > { %v1421_v21 = vmul.f32 %v1420_v20, %v4887_v8 }
 0x25d   : > { %v1422_v22 = vadd.f32 1e-06, %v1421_v21 }
 0x25f   : > { %3527 = vrsqrt.f32 %v1422_v22  ;;  %vm1429_vm3 = vweird.f32 %v1422_v22 }
 0x265   : > { %v3528_v23 = vpop.eup %3527 }
 0x266   : > { %v1424_v24 = vmul.f32 %v3528_v23, %v1422_v22  ;;  %vm1430_vm2 = vweird.f32 %v3528_v23 }
 0x267   : > { %vm1431_vm4 = vmor %vm1429_vm3, %vm1430_vm2 }
 0x268   : > { %v1425_v25 = vmul.f32 %v3528_v23, %v1424_v24 }
 0x26a   : > { %v1426_v26 = vmul.f32 0.5, %v1425_v25 }
 0x26c   : > { %v1427_v27 = vsub.f32 1.5, %v1426_v26 }
 0x26e   : > { %v1428_v28 = vmul.f32 %v3528_v23, %v1427_v27 }
 0x270   : > { %v1432_v30 = vsel %vm1431_vm4, %v3528_v23, %v1428_v28  ;;  %vm2537_vm4 = vcmask 523264  }
 0x271   : > { %v1433_v31 = vmul.f32 %v1432_v30, %v1416_v11 }
 0x273   : > { %v1437_v33 = vmul.f32 %v3509_v29, %v1433_v31 }
 0x275   : > { %v1441_v34 = vadd.f32 %v3510_v32, %v1437_v33 }
 0x277   : > { %v1442_v35 = vpack.c.bf16 %v1441_v34, %v1441_v34 }
 0x279   : > { %3123 = vmatmul.msk.bf16.vlgmr.msra.gmra.mxu0 %vm1404_vm0, %v1442_v35  ;;  %3132 = vmatmul.msk.bf16.vlgmr.msra.gmra.mxu1 %vm1404_vm0, %v1442_v35 }
 0x27a   : > { %3141 = vmatmul.msk.bf16.vlgmr.msra.gmra.mxu2 %vm1404_vm0, %v1442_v35 }
 0x2f6   : > { %v1475_v38 = vpop.f32.mrf.mxu0  ;;  %v1508_v39 = vpop.f32.mrf.mxu1 }
 0x2f7   : > { %v1509_v40 = vadd.f32 %v3512_v36, %v1508_v39  ;;  %v1476_v41 = vadd.f32 %v3511_v37, %v1475_v38 }
 0x2f9   : > { %v1545_v42 = vpack.c.bf16 %v1509_v40, %v1509_v40  ;;  %v1550_v45 = vmul.f32 0.35355338, %v1476_v41 }
 0x2fb   : > { %1562 = vrot.lane.b32.xlu0 %v1545_v42, %s4336_s4  ;;  %1560 = vrot.lane.b32.xlu2 %v1545_v42, %s4337_s20  ;;  %v1578_v44 = vsel %vm1573_vm5, %v1545_v42, 0  ;;  %1547 = vst.msk [vmem:[%s4905_s22] sm:$0xf] %vm1546_vm6, %v1545_v42  ;;  %v1551_v51 = vpack.c.bf16 %v1550_v45, %v1550_v45 }
 0x2fc   : > { %1564 = vrot.lane.b32.xlu1 %v1545_v42, %s4338_s21  ;;  %1587 = vmatpush.bf16.xpose.msra.mxu3 %v1578_v44 }
 0x2fd   : > { %v1541_v46 = vpop.f32.mrf.mxu2 }
 0x2fe   : > { %v1542_v47 = vadd.f32 %v3513_v43, %v1541_v46  ;;  %v1477_v48 = vpop.f32.mrf.mxu0  ;;  %v1510_v49 = vpop.f32.mrf.mxu1 }
 0x300   : > { %v1548_v50 = vpack.c.bf16 %v1542_v47, %v1542_v47 }
 0x302   : > { %v1724_v52 = vsel %vm1722_vm7, %v1548_v50, 0  ;;  %1549 = vst.msk [vmem:[%s4911_s28] sm:$0xf] %vm1546_vm6, %v1548_v50 }
 0x303   : > { %1553 = vrot.lane.b32.xlu2 %v1551_v51, %s4337_s20  ;;  %3142 = vmatmul.msk.bf16.vlgmr.msra.gmra.mxu3 %vm1573_vm5, %v1551_v51 }
 0x304   : > { %1733 = vmatpush.bf16.msrb.mxu3 %v1724_v52  ;;  %1557 = vrot.lane.b32.xlu1 %v1551_v51, %s4338_s21 }
 0x305   : > { %v1543_v53 = vpop.f32.mrf.mxu2 }
 0x30c   : > { %1555 = vrot.lane.b32.xlu1 %v1551_v51, %s4336_s4 }
 0x355   : > { %v1561_v54 = vpop.permute.xlu2 %1560 }
 0x356   : > { %v1597_v55 = vsel %vm1573_vm5, %v1561_v54, 0  ;;  %v1812_v54 = vld [vmem:[#allocation11] sm:$0xf] }
 0x357   : > { %1606 = vmatpush.bf16.xpose.msrb.mxu0 %v1597_v55  ;;  %v1838_v55 = vsel %vm1722_vm7, %v1812_v54, 0 }
 0x35d   : > { %v1554_v56 = vpop.permute.xlu2 %1553 }
 0x35e   : > { %3143 = vmatmul.msk.bf16.vlgmr.msrb.gmra.mxu0 %vm1573_vm5, %v1554_v56 }
 0x36d   : > { %v1563_v57 = vpop.permute.xlu0 %1562 }
 0x36e   : > { %v1565_v58 = vpop.permute.xlu1 %1564  ;;  %v1616_v59 = vsel %vm1573_vm5, %v1563_v57, 0 }
 0x36f   : > { %1625 = vmatpush.bf16.xpose.msrb.mxu1 %v1616_v59  ;;  %v1635_v60 = vsel %vm1573_vm5, %v1565_v58, 0 }
 0x370   : > { %1644 = vmatpush.bf16.xpose.msrb.mxu2 %v1635_v60 }
 0x376   : > { %v1558_v61 = vpop.permute.xlu1 %1557 }
 0x377   : > { %3145 = vmatmul.msk.bf16.vlgmr.msrb.gmra.mxu2 %vm1573_vm5, %v1558_v61 }
 0x37e   : > { %v1556_v63 = vpop.permute.xlu1 %1555 }
 0x37f   : > { %3144 = vmatmul.msk.bf16.vlgmr.msrb.gmra.mxu1 %vm1573_vm5, %v1556_v63 }
 0x386   : > { %v1589_v5 = vpop.f32.mrf.mxu3 }
 0x387   : > { %v1655_v6 = vsel %vm4927_vm9, %v1589_v5, -1e+09  ;;  %v1859_v5 = vsel %vm1722_vm7, %v1854_v4, 0 }
 0x388   : > { %v1659_v7 = vsel %vm1573_vm5, %v1655_v6, -inf }
 0x389   : > { %1660 = vmax.xlane.f32.xlu1 %v1659_v7  ;;  %v1876_v7 = vld [vmem:[#allocation11 + $0xc] sm:$0xf] }
 0x38e   : > { %v1591_v9 = vpop.f32.mrf.mxu3 }
 0x38f   : > { %v1881_v9 = vsel %vm1722_vm7, %v1876_v7, 0 }
 0x3db   : > { %v1608_v10 = vpop.f32.mrf.mxu0 }
 0x3dc   : > { %v1656_v11 = vsel %vm4927_vm9, %v1608_v10, -1e+09 }
 0x3dd   : > { %v1662_v12 = vsel %vm1573_vm5, %v1656_v11, -inf }
 0x3de   : > { %1663 = vmax.xlane.f32.xlu0 %v1662_v12 }
 0x3e3   : > { %v1610_v13 = vpop.f32.mrf.mxu0 }
 0x3f2   : > { %1569 = vrot.lane.b32.xlu0 %v1548_v50, %s4336_s4 }
 0x3fa   : > { %v1646_v14 = vpop.f32.mrf.mxu2 }
 0x3fb   : > { %v1658_v15 = vsel %vm4927_vm9, %v1646_v14, -1e+09  ;;  %v1814_v14 = vld [vmem:[#allocation11 + $0x4] sm:$0xf] }
 0x3fc   : > { %v1627_v16 = vpop.f32.mrf.mxu1  ;;  %v1668_v17 = vsel %vm1573_vm5, %v1658_v15, -inf  ;;  %v1661_v19 = vpop.xlane.xlu1 %1660 }
 0x3fd   : > { %v1657_v18 = vsel %vm4927_vm9, %v1627_v16, -1e+09  ;;  %1669 = vmax.xlane.f32.xlu2 %v1668_v17  ;;  %v1683_v20 = vsub.f32 %v1655_v6, %v1661_v19  ;;  %v1671_v56 = vsub.f32 -inf, %v1661_v19 }
 0x3fe   : > { %v1665_v21 = vsel %vm1573_vm5, %v1657_v18, -inf }
 0x3ff   : > { %1666 = vmax.xlane.f32.xlu1 %v1665_v21  ;;  %v1687_v22 = vmul.f32 1.442695, %v1683_v20  ;;  %v1675_v57 = vmul.f32 1.442695, %v1671_v56 }
 0x401   : > { %3529 = vpow2.f32 %v1687_v22 }
 0x402   : > { %v1648_v23 = vpop.f32.mrf.mxu2 }
 0x404   : > { %v1629_v24 = vpop.f32.mrf.mxu1 }
 0x407   : > { %v3530_v25 = vpop.eup %3529 }
 0x408   : > { %v1715_v26 = vpack.c.bf16 %v3530_v25, %v3530_v25  ;;  %v1699_v27 = vsel %vm1573_vm5, %v3530_v25, 0.0 }
 0x40a   : > { %3146 = vmatmul.msk.bf16.vlgmr.msrb.gmra.mxu3 %vm1573_vm5, %v1715_v26 }
 0x415   : > { %1571 = vrot.lane.b32.xlu2 %v1548_v50, %s4338_s21 }
 0x418   : > { %1567 = vrot.lane.b32.xlu1 %v1548_v50, %s4337_s20 }
 0x442   : > { %1700 = vadd.xlane.f32.xlu1 %v1699_v27 }
 0x451   : > { %v4948_v28 = vpop.xlane.xlu0 %1663 }
 0x452   : > { %v1684_v29 = vsub.f32 %v1656_v11, %v4948_v28  ;;  %v1672_v17 = vsub.f32 -inf, %v4948_v28 }
 0x454   : > { %v1689_v30 = vmul.f32 1.442695, %v1684_v29  ;;  %v1677_v21 = vmul.f32 1.442695, %v1672_v17 }
 0x456   : > { %3531 = vpow2.f32 %v1689_v30 }
 0x45c   : > { %v3532_v31 = vpop.eup %3531 }
 0x45d   : > { %v1702_v32 = vsel %vm1573_vm5, %v3532_v31, 0.0  ;;  %v1716_v51 = vpack.c.bf16 %v3532_v31, %v3532_v31 }
 0x45e   : > { %1703 = vadd.xlane.f32.xlu2 %v1702_v32 }
 0x464   : > { %v1570_v33 = vpop.permute.xlu0 %1569 }
 0x465   : > { %v1762_v34 = vsel %vm1722_vm7, %v1570_v33, 0 }
 0x466   : > { %1771 = vmatpush.bf16.msra.mxu1 %v1762_v34 }
 0x46a   : > { %1868 = vmatpush.bf16.msrb.mxu1 %v1859_v5 }
 0x470   : > { %v1670_v35 = vpop.xlane.xlu2 %1669 }
 0x471   : > { %v1686_v36 = vsub.f32 %v1658_v15, %v1670_v35  ;;  %v1674_v10 = vsub.f32 -inf, %v1670_v35  ;;  %v1819_v15 = vsel %vm1722_vm7, %v1814_v14, 0 }
 0x472   : > { %v1667_v37 = vpop.xlane.xlu1 %1666  ;;  %1828 = vmatpush.bf16.msra.mxu3 %v1819_v15 }
 0x473   : > { %v1693_v38 = vmul.f32 1.442695, %v1686_v36  ;;  %v1685_v39 = vsub.f32 %v1657_v18, %v1667_v37  ;;  %v1673_v6 = vsub.f32 -inf, %v1667_v37  ;;  %v1681_v12 = vmul.f32 1.442695, %v1674_v10  ;;  %v3241_v10 = vld [vmem:[#allocation13 + $0x8] sm:$0xff] }
 0x475   : > { %v1691_v40 = vmul.f32 1.442695, %v1685_v39  ;;  %3533 = vpow2.f32 %v1693_v38  ;;  %v1679_v11 = vmul.f32 1.442695, %v1673_v6 }
 0x476   : > { %1966 = vmatpush.bf16.msrb.mxu3 %v3241_v10 }
 0x477   : > { %3535 = vpow2.f32 %v1691_v40 }
 0x478   : > { %v1572_v41 = vpop.permute.xlu2 %1571  ;;  %3537 = vpow2.f32 %v1675_v57  ;;  %v3514_v57 = vld [vmem:[%s5265_s5] ss:$0 sm:$0xff]  ;;  %s5269_s5 = sld [smem:[#allocation62_spill]] }
 0x479   : > { %v1781_v42 = vsel %vm1722_vm7, %v1572_v41, 0 }
 0x47a   : > { %1790 = vmatpush.bf16.msra.mxu2 %v1781_v42 }
 0x47b   : > { %v3534_v43 = vpop.eup %3533 }
 0x47c   : > { %v1718_v44 = vpack.c.bf16 %v3534_v43, %v3534_v43  ;;  %v1708_v45 = vsel %vm1573_vm5, %v3534_v43, 0.0 }
 0x47d   : > { %v3536_v46 = vpop.eup %3535  ;;  %1709 = vadd.xlane.f32.xlu0 %v1708_v45 }
 0x47e   : > { %v1717_v47 = vpack.c.bf16 %v3536_v46, %v3536_v46  ;;  %3149 = vmatmul.msk.bf16.vlgmr.msra.gmra.mxu2 %vm1573_vm5, %v1718_v44  ;;  %v1705_v48 = vsel %vm1573_vm5, %v3536_v46, 0.0  ;;  %v3538_v58 = vpop.eup %3537 }
 0x47f   : > { %1706 = vadd.xlane.f32.xlu2 %v1705_v48  ;;  %v1695_v59 = vmul.f32 0.0, %v3538_v58  ;;  %1890 = vmatpush.bf16.msrb.mxu2 %v1881_v9 }
 0x480   : > { %3148 = vmatmul.msk.bf16.vlgmr.msra.gmra.mxu1 %vm1573_vm5, %v1717_v47 }
 0x48a   : > { %v1568_v49 = vpop.permute.xlu1 %1567 }
 0x48b   : > { %v1743_v50 = vsel %vm1722_vm7, %v1568_v49, 0 }
 0x48c   : > { %1752 = vmatpush.bf16.msra.mxu0 %v1743_v50 }
 0x48d   : > { %v1735_v52 = vpop.f32.mrf.mxu3 }
 0x48e   : > { %v1796_v62 = vadd.f32 %v1735_v52, %v1695_v59 }
 0x48f   : > { %3147 = vmatmul.msk.bf16.vlgmr.msra.gmra.mxu0 %vm1573_vm5, %v1716_v51 }
 0x490   : > { %1847 = vmatpush.bf16.msrb.mxu0 %v1838_v55 }
 0x495   : > { %v1737_v53 = vpop.f32.mrf.mxu3 }
 0x4b5   : > { %v1701_v60 = vpop.xlane.xlu1 %1700 }
 0x4b6   : > { %v1711_v61 = vadd.f32 %v1701_v60, %v1695_v59 }
 0x4b8   : > { %3539 = vrcp.f32 %v1711_v61 }
 0x4b9   : > { %3541 = vpow2.f32 %v1679_v11  ;;  %v3240_v11 = vld [vmem:[#allocation13] sm:$0xff] }
 0x4ba   : > { %3543 = vpow2.f32 %v1681_v12  ;;  %1967 = vmatpush.bf16.msrb.mxu3 %v3240_v11  ;;  %v3517_v12 = vld [vmem:[%s5267_s19] ss:$0 sm:$0xff]  ;;  %v1400_v11 = vld [vmem:[%s4839_s17] sm:$0x3]  ;;  %s5273_s17 = sld [smem:[#allocation75_spill]]  ;;  %s5087_s19 = sshll.u32 %s4546_s23, 3 }
 0x4bb   : > { %3545 = vpow2.f32 %v1677_v21  ;;  %vm1401_vm13 = vnez %v1400_v11 }
 0x4be   : > { %v3540_v63 = vpop.eup %3539 }
 0x4bf   : > { %v1804_v2 = vmul.f32 %v3540_v63, %v1796_v62  ;;  %v3542_v16 = vpop.eup %3541  ;;  %v3243_v62 = vld [vmem:[#allocation14 + $0x8] sm:$0xff] }
 0x4c0   : > { %v1697_v19 = vmul.f32 0.0, %v3542_v16  ;;  %v3544_v20 = vpop.eup %3543  ;;  %v1396_v63 = vld [vmem:[%s1391_s14] sm:$0xff]  ;;  %2002 = vmatpush.bf16.msra.mxu0 %v3243_v62 }
 0x4c1   : > { %v1808_v3 = vpack.c.bf16 %v1804_v2, %v1804_v2  ;;  %v1698_v24 = vmul.f32 0.0, %v3544_v20  ;;  %v3546_v27 = vpop.eup %3545  ;;  %v1397_v2 = vld [vmem:[%s1391_s14 + $0x8] sm:$0xff] }
 0x4c2   : > { %v1696_v32 = vmul.f32 0.0, %v3546_v27  ;;  %v4977_v4 = vpack.c.bf16 %v1397_v2, %v1396_v63 }
 0x4c3   : > { %3151 = vmatmul.msk.bf16.vlgmr.msrb.gmra.mxu0 %vm1573_vm5, %v1808_v3  ;;  %v3242_v3 = vld [vmem:[#allocation14] sm:$0xff] }
 0x4c4   : > { %2003 = vmatpush.bf16.msra.mxu0 %v3242_v3 }
 0x4d1   : > { %v1704_v13 = vpop.xlane.xlu2 %1703 }
 0x4d2   : > { %v1712_v36 = vadd.f32 %v1704_v13, %v1696_v32 }
 0x4d3   : > { %3171 = vmatmul.msk.bf16.vlgmr.msra.gmra.mxu0 %vm1404_vm0, %v4977_v4 }
 0x4f0   : > { %v1710_v23 = vpop.xlane.xlu0 %1709 }
 0x4f1   : > { %v1714_v25 = vadd.f32 %v1710_v23, %v1698_v24 }
 0x4f2   : > { %v1707_v18 = vpop.xlane.xlu2 %1706 }
 0x4f3   : > { %v1713_v22 = vadd.f32 %v1707_v18, %v1697_v19 }
 0x4f5   : > { %3547 = vrcp.f32 %v1713_v22 }
 0x4f6   : > { %3549 = vrcp.f32 %v1714_v25 }
 0x4f7   : > { %3551 = vrcp.f32 %v1712_v36 }
 0x4fb   : > { %v3548_v30 = vpop.eup %3547 }
 0x4fc   : > { %v3550_v35 = vpop.eup %3549 }
 0x4fd   : > { %v1773_v26 = vpop.f32.mrf.mxu1  ;;  %v3552_v43 = vpop.eup %3551 }
 0x4fe   : > { %v1798_v29 = vadd.f32 %v1773_v26, %v1697_v19 }
 0x500   : > { %v1806_v31 = vmul.f32 %v3548_v30, %v1798_v29 }
 0x501   : > { %v1792_v33 = vpop.f32.mrf.mxu2 }
 0x502   : > { %v1810_v28 = vpack.c.bf16 %v1806_v31, %v1806_v31  ;;  %v1799_v34 = vadd.f32 %v1792_v33, %v1698_v24  ;;  %v3515_v33 = vld [vmem:[%s5268_s12] ss:$0 sm:$0xff]  ;;  %s2608_s12 = sshll.u32 %s4905_s22, 4  ;;  %s2609_s12 = int_to_ptr.vmem [resolvable:$true] %s2608_s12 }
 0x504   : > { %v1807_v37 = vmul.f32 %v3550_v35, %v1799_v34  ;;  %3152 = vmatmul.msk.bf16.vlgmr.msrb.gmra.mxu1 %vm1573_vm5, %v1810_v28  ;;  %v3516_v35 = vld [vmem:[%s5269_s5] ss:$0 sm:$0xff] }
 0x505   : > { %v1775_v38 = vpop.f32.mrf.mxu1 }
 0x506   : > { %v1811_v39 = vpack.c.bf16 %v1807_v37, %v1807_v37 }
 0x508   : > { %3153 = vmatmul.msk.bf16.vlgmr.msrb.gmra.mxu2 %vm1573_vm5, %v1811_v39  ;;  %v3245_v39 = vld [vmem:[#allocation16 + $0x8] sm:$0xff] }
 0x509   : > { %v1794_v40 = vpop.f32.mrf.mxu2  ;;  %2036 = vmatpush.bf16.msra.mxu1 %v3245_v39 }
 0x50c   : > { %v1754_v41 = vpop.f32.mrf.mxu0 }
 0x50d   : > { %v1797_v42 = vadd.f32 %v1754_v41, %v1696_v32 }
 0x50f   : > { %v1805_v44 = vmul.f32 %v3552_v43, %v1797_v42 }
 0x511   : > { %v1809_v45 = vpack.c.bf16 %v1805_v44, %v1805_v44  ;;  %v3244_v44 = vld [vmem:[#allocation16] sm:$0xff] }
 0x512   : > { %2037 = vmatpush.bf16.msra.mxu1 %v3244_v44 }
 0x513   : > { %3150 = vmatmul.msk.bf16.vlgmr.msra.gmra.mxu3 %vm1573_vm5, %v1809_v45 }
 0x514   : > { %v1756_v46 = vpop.f32.mrf.mxu0 }
 0x515   : > { %3180 = vmatmul.msk.bf16.vlgmr.msra.gmra.mxu1 %vm1404_vm0, %v4977_v4 }
 0x540   : > { %v1849_v47 = vpop.f32.mrf.mxu0 }
 0x548   : > { %v1851_v48 = vpop.f32.mrf.mxu0 }
 0x550   : > { %v2005_v13 = vpop.f32.mrf.mxu0 }
 0x551   : > { %v2006_v16 = vadd.f32 %v3517_v12, %v2005_v13 }
 0x553   : > { %v2044_v18 = vpack.c.bf16 %v2006_v16, %v2006_v16  ;;  %v2177_v16 = vsel %vm1401_vm13, 16843009, %v4339_v1 }
 0x555   : > { %2046 = vst.msk [vmem:[%s4990_s8] sm:$0xf] %vm1546_vm6, %v2044_v18  ;;  %2063 = vrot.lane.b32.xlu0 %v2044_v18, %s4337_s20  ;;  %v2089_v22 = vunpack.c.l.b16 %v2044_v18 }
 0x558   : > { %v2007_v19 = vpop.f32.mrf.mxu0 }
 0x559   : > { %v2008_v20 = vadd.f32 %v3517_v12, %v2007_v19 }
 0x55b   : > { %v2045_v21 = vpack.c.bf16 %v2008_v20, %v2008_v20 }
 0x55d   : > { %2047 = vst.msk [vmem:[%s4990_s8 + $0x4] sm:$0xf] %vm1546_vm6, %v2045_v21  ;;  %2065 = vrot.lane.b32.xlu1 %v2045_v21, %s4337_s20  ;;  %v2090_v25 = vunpack.c.l.b16 %v2045_v21  ;;  %2067 = vrot.lane.b32.xlu0 %v2044_v18, %s4336_s4 }
 0x55f   : > { %v2091_v27 = vpack.c.b16 %v2090_v25, %v2089_v22 }
 0x561   : > { %v2096_v30 = vsel %vm1573_vm5, %v2091_v27, 0 }
 0x562   : > { %2105 = vmatpush.bf16.xpose.msra.mxu2 %v2096_v30 }
 0x565   : > { %2069 = vrot.lane.b32.xlu1 %v2045_v21, %s4336_s4  ;;  %2071 = vrot.lane.b32.xlu0 %v2044_v18, %s4338_s21  ;;  %v2178_v18 = vunpack.c.0.s8 %v2177_v16 }
 0x567   : > { %vm5031_vm14 = vcmp.ne.s32.totalorder %v2178_v18, 0 }
 0x581   : > { %v1870_v49 = vpop.f32.mrf.mxu1 }
 0x589   : > { %v1872_v50 = vpop.f32.mrf.mxu1 }
 0x58b   : > { %v1892_v51 = vpop.f32.mrf.mxu2 }
 0x593   : > { %v1894_v52 = vpop.f32.mrf.mxu2 }
 0x594   : > { %v3518_v52 = vld [vmem:[%s5270_s7] ss:$0 sm:$0xff] }
 0x596   : > { %v1830_v53 = vpop.f32.mrf.mxu3 }
 0x597   : > { %v1850_v54 = vadd.f32 %v1849_v47, %v1830_v53 }
 0x599   : > { %v1874_v55 = vadd.f32 %v1870_v49, %v1850_v54 }
 0x59b   : > { %v1896_v56 = vadd.f32 %v1892_v51, %v1874_v55 }
 0x59d   : > { %v1897_v58 = vadd.f32 %v1896_v56, %v4883_v0 }
 0x59e   : > { %v1832_v59 = vpop.f32.mrf.mxu3 }
 0x59f   : > { %v4971_v60 = vadd.f32 %v3514_v57, %v1897_v58 }
 0x5a1   : > { %v1905_v61 = vsel %vm1404_vm0, %v4971_v60, 0.0 }
 0x5a2   : > { %1906 = vadd.xlane.f32.xlu2 %v1905_v61 }
 0x5c7   : > { %v2064_v40 = vpop.permute.xlu0 %2063 }
 0x5c8   : > { %v2111_v42 = vunpack.c.l.b16 %v2064_v40 }
 0x5cf   : > { %v2066_v41 = vpop.permute.xlu1 %2065  ;;  %v2068_v47 = vpop.permute.xlu0 %2067 }
 0x5d0   : > { %v2112_v43 = vunpack.c.l.b16 %v2066_v41  ;;  %v2133_v49 = vunpack.c.l.b16 %v2068_v47 }
 0x5d2   : > { %v2113_v45 = vpack.c.b16 %v2112_v43, %v2111_v42 }
 0x5d4   : > { %v2118_v46 = vsel %vm1573_vm5, %v2113_v45, 0 }
 0x5d5   : > { %2127 = vmatpush.bf16.xpose.msra.mxu3 %v2118_v46 }
 0x5d7   : > { %v2070_v48 = vpop.permute.xlu1 %2069  ;;  %v2072_v61 = vpop.permute.xlu0 %2071 }
 0x5d8   : > { %v2134_v50 = vunpack.c.l.b16 %v2070_v48  ;;  %v2155_v63 = vunpack.c.l.b16 %v2072_v61 }
 0x5da   : > { %v2135_v51 = vpack.c.b16 %v2134_v50, %v2133_v49 }
 0x5dc   : > { %v2140_v53 = vsel %vm1573_vm5, %v2135_v51, 0 }
 0x5dd   : > { %2149 = vmatpush.bf16.xpose.msrb.mxu0 %v2140_v53 }
 0x615   : > { %v1907_v0 = vpop.xlane.xlu2 %1906 }
 0x616   : > { %v1908_v5 = vmul.f32 %v1907_v0, %v4887_v8  ;;  %v3519_v0 = vld [vmem:[#allocation17] ss:$0 sm:$0xff] }
 0x618   : > { %v1909_v6 = vsub.f32 %v4971_v60, %v1908_v5  ;;  %v2039_v5 = vpop.f32.mrf.mxu1 }
 0x61a   : > { %v1910_v7 = vmul.f32 %v1909_v6, %v1909_v6 }
 0x61c   : > { %v1911_v9 = vsel %vm1404_vm0, %v1910_v7, 0.0 }
 0x61d   : > { %1912 = vadd.xlane.f32.xlu2 %v1911_v9 }
 0x620   : > { %v2041_v12 = vpop.f32.mrf.mxu1 }
 0x621   : > { %v2042_v13 = vadd.f32 %v3519_v0, %v2041_v12 }
 0x690   : > { %v1913_v14 = vpop.xlane.xlu2 %1912 }
 0x691   : > { %v1914_v15 = vmul.f32 %v1913_v14, %v4887_v8  ;;  %v2049_v14 = vpack.c.bf16 %v2042_v13, %v2042_v13 }
 0x693   : > { %v1915_v17 = vadd.f32 1e-06, %v1914_v15  ;;  %2051 = vst.msk [vmem:[%s5020_s11 + $0x4] sm:$0xf] %vm1546_vm6, %v2049_v14 }
 0x695   : > { %3553 = vrsqrt.f32 %v1915_v17  ;;  %vm1922_vm11 = vweird.f32 %v1915_v17 }
 0x69b   : > { %v3554_v23 = vpop.eup %3553 }
 0x69c   : > { %v1917_v24 = vmul.f32 %v3554_v23, %v1915_v17  ;;  %vm1923_vm10 = vweird.f32 %v3554_v23  ;;  %v2248_v17 = vunpack.c.l.b16 %v2049_v14 }
 0x69d   : > { %vm1924_vm12 = vmor %vm1922_vm11, %vm1923_vm10 }
 0x69e   : > { %v1918_v26 = vmul.f32 %v3554_v23, %v1917_v24 }
 0x6a0   : > { %v1919_v29 = vmul.f32 0.5, %v1918_v26 }
 0x6a2   : > { %v1920_v31 = vsub.f32 1.5, %v1919_v29 }
 0x6a4   : > { %v1921_v32 = vmul.f32 %v3554_v23, %v1920_v31 }
 0x6a6   : > { %v1925_v28 = vsel %vm1924_vm12, %v3554_v23, %v1921_v32 }
 0x6a7   : > { %v1926_v34 = vmul.f32 %v1925_v28, %v1909_v6  ;;  %v2040_v6 = vadd.f32 %v3519_v0, %v2039_v5 }
 0x6a9   : > { %v1930_v36 = vmul.f32 %v3515_v33, %v1926_v34  ;;  %v2048_v10 = vpack.c.bf16 %v2040_v6, %v2040_v6 }
 0x6ab   : > { %v1934_v37 = vadd.f32 %v3516_v35, %v1930_v36  ;;  %2050 = vst.msk [vmem:[%s5020_s11] sm:$0xf] %vm1546_vm6, %v2048_v10  ;;  %v2247_v15 = vunpack.c.l.b16 %v2048_v10 }
 0x6ad   : > { %v1935_v38 = vpack.c.bf16 %v1934_v37, %v1934_v37  ;;  %v2249_v19 = vpack.c.b16 %v2248_v17, %v2247_v15  ;;  %v2343_v15 = vld [vmem:[#allocation19] sm:$0xf] }
 0x6ae   : > { %v2369_v17 = vsel %vm1722_vm7, %v2343_v15, 0 }
 0x6af   : > { %3162 = vmatmul.msk.bf16.vlgmr.msrb.gmra.mxu3 %vm1404_vm0, %v1935_v38  ;;  %2261 = vmatpush.bf16.msrb.mxu2 %v2249_v19 }
 0x732   : > { %v1969_v54 = vpop.f32.mrf.mxu3 }
 0x733   : > { %v1970_v55 = vadd.f32 %v3518_v52, %v1969_v54 }
 0x735   : > { %v2052_v56 = vmul.f32 0.35355338, %v1970_v55 }
 0x737   : > { %v2053_v57 = vpack.c.bf16 %v2052_v56, %v2052_v56 }
 0x739   : > { %2059 = vrot.lane.b32.xlu0 %v2053_v57, %s4338_s21  ;;  %2057 = vrot.lane.b32.xlu1 %v2053_v57, %s4336_s4 }
 0x73a   : > { %2055 = vrot.lane.b32.xlu2 %v2053_v57, %s4337_s20  ;;  %3181 = vmatmul.msk.bf16.vlgmr.msra.gmra.mxu2 %vm1573_vm5, %v2053_v57  ;;  %v1971_v58 = vpop.f32.mrf.mxu3 }
 0x741   : > { %2081 = vrot.lane.b32.xlu1 %v2048_v10, %s4336_s4  ;;  %2077 = vrot.lane.b32.xlu0 %v2048_v10, %s4337_s20 }
 0x742   : > { %2073 = vrot.lane.b32.xlu2 %v2045_v21, %s4338_s21 }
 0x749   : > { %2079 = vrot.lane.b32.xlu0 %v2049_v14, %s4337_s20  ;;  %s5275_s20 = sld [smem:[#allocation80_spill]] }
 0x74f   : > { %s2635_s7 = scalar_lea.hbm %s5275_s20, %s5087_s19 }
 0x794   : > { %v2056_v59 = vpop.permute.xlu2 %2055 }
 0x795   : > { %3182 = vmatmul.msk.bf16.vlgmr.msra.gmra.mxu3 %vm1573_vm5, %v2056_v59 }
 0x79c   : > { %v2074_v62 = vpop.permute.xlu2 %2073 }
 0x79d   : > { %v2156_v2 = vunpack.c.l.b16 %v2074_v62 }
 0x79f   : > { %v2157_v3 = vpack.c.b16 %v2156_v2, %v2155_v63 }
 0x7a1   : > { %v2162_v4 = vsel %vm1573_vm5, %v2157_v3, 0 }
 0x7a2   : > { %2171 = vmatpush.bf16.xpose.msrb.mxu1 %v2162_v4 }
 0x7ab   : > { %v2060_v7 = vpop.permute.xlu0 %2059  ;;  %v2058_v9 = vpop.permute.xlu1 %2057 }
 0x7ac   : > { %3183 = vmatmul.msk.bf16.vlgmr.msrb.gmra.mxu0 %vm1573_vm5, %v2058_v9  ;;  %3184 = vmatmul.msk.bf16.vlgmr.msrb.gmra.mxu1 %vm1573_vm5, %v2060_v7 }
 0x7b3   : > { %v2078_v29 = vpop.permute.xlu0 %2077  ;;  %v2082_v47 = vpop.permute.xlu1 %2081 }
 0x7b4   : > { %v2267_v35 = vunpack.c.l.b16 %v2078_v29  ;;  %v2287_v62 = vunpack.c.l.b16 %v2082_v47 }
 0x7bb   : > { %v2080_v36 = vpop.permute.xlu0 %2079 }
 0x7bc   : > { %v2268_v37 = vunpack.c.l.b16 %v2080_v36 }
 0x7bd   : > { %v2107_v21 = vpop.f32.mrf.mxu2 }
 0x7be   : > { %v2182_v22 = vsel %vm5031_vm14, %v2107_v21, -1e+09  ;;  %v2269_v38 = vpack.c.b16 %v2268_v37, %v2267_v35 }
 0x7bf   : > { %v2187_v23 = vsel %vm2186_vm15, %v2182_v22, -inf }
 0x7c0   : > { %2188 = vmax.xlane.f32.xlu2 %v2187_v23  ;;  %2281 = vmatpush.bf16.msrb.mxu3 %v2269_v38 }
 0x7c4   : > { %2378 = vmatpush.bf16.msra.mxu3 %v2369_v17 }
 0x7c5   : > { %v2109_v1 = vpop.f32.mrf.mxu2 }
 0x818   : > { %v2129_v24 = vpop.f32.mrf.mxu3 }
 0x819   : > { %v2183_v25 = vsel %vm5031_vm14, %v2129_v24, -1e+09 }
 0x81a   : > { %v2190_v26 = vsel %vm2186_vm15, %v2183_v25, -inf }
 0x81b   : > { %2191 = vmax.xlane.f32.xlu1 %v2190_v26 }
 0x820   : > { %v2131_v27 = vpop.f32.mrf.mxu3 }
 0x821   : > { %v2345_v27 = vld [vmem:[#allocation19 + $0x4] sm:$0xf] }
 0x822   : > { %v2350_v29 = vsel %vm1722_vm7, %v2345_v27, 0  ;;  %v3247_v27 = vld [vmem:[#allocation25 + $0x8] sm:$0xff] }
 0x823   : > { %2359 = vmatpush.bf16.msra.mxu2 %v2350_v29  ;;  %v3251_v29 = vld [vmem:[%s5273_s17 + $0x18] sm:$0xff] }
 0x829   : > { %v2151_v30 = vpop.f32.mrf.mxu0  ;;  %v2173_v31 = vpop.f32.mrf.mxu1 }
 0x82a   : > { %v2184_v32 = vsel %vm5031_vm14, %v2151_v30, -1e+09  ;;  %v2185_v33 = vsel %vm5031_vm14, %v2173_v31, -1e+09 }
 0x82b   : > { %v2193_v28 = vsel %vm2186_vm15, %v2184_v32, -inf  ;;  %v2196_v34 = vsel %vm2186_vm15, %v2185_v33, -inf }
 0x82c   : > { %2194 = vmax.xlane.f32.xlu0 %v2193_v28  ;;  %2197 = vmax.xlane.f32.xlu2 %v2196_v34 }
 0x831   : > { %v2153_v39 = vpop.f32.mrf.mxu0  ;;  %v2175_v40 = vpop.f32.mrf.mxu1 }
 0x832   : > { %v2407_v40 = vld [vmem:[#allocation19 + $0xc] sm:$0xf] }
 0x833   : > { %v2189_v41 = vpop.xlane.xlu2 %2188 }
 0x834   : > { %v2211_v42 = vsub.f32 %v2182_v22, %v2189_v41  ;;  %2087 = vrot.lane.b32.xlu1 %v2049_v14, %s4338_s21  ;;  %v2199_v18 = vsub.f32 -inf, %v2189_v41  ;;  %v2412_v41 = vsel %vm1722_vm7, %v2407_v40, 0 }
 0x836   : > { %v2215_v43 = vmul.f32 1.442695, %v2211_v42  ;;  %v2203_v19 = vmul.f32 1.442695, %v2199_v18  ;;  %v3520_v18 = vld [vmem:[#allocation20] ss:$0 sm:$0xff] }
 0x838   : > { %3555 = vpow2.f32 %v2215_v43 }
 0x83e   : > { %v3556_v44 = vpop.eup %3555 }
 0x83f   : > { %v2243_v45 = vpack.c.bf16 %v3556_v44, %v3556_v44  ;;  %v2227_v46 = vsel %vm2186_vm15, %v3556_v44, 0.0 }
 0x840   : > { %2085 = vrot.lane.b32.xlu0 %v2048_v10, %s4338_s21  ;;  %s3225_s21 = sshll.u32 %s4546_s23, 2 }
 0x841   : > { %3185 = vmatmul.msk.bf16.vlgmr.msrb.gmra.mxu2 %vm2186_vm15, %v2243_v45 }
 0x842   : > { %2496 = vmatpush.bf16.msrb.mxu2 %v3247_v27 }
 0x844   : > { %2083 = vrot.lane.b32.xlu2 %v2049_v14, %s4336_s4  ;;  %s5274_s4 = sld [smem:[#allocation78_spill]] }
 0x84a   : > { %s2606_s14 = scalar_lea.hbm %s5274_s4, %s3225_s21  ;;  %s4081_s25 = scalar_lea.hbm %s5274_s4, 8 }
 0x84b   : > { %s2610_s5 = sshll.u32 %s2606_s14, 4  ;;  %s2611_s5 = int_to_ptr.hbm [resolvable:$true] %s2610_s5 }
 0x86d   : > { %2228 = vadd.xlane.f32.xlu2 %v2227_v46 }
 0x88e   : > { %v2192_v48 = vpop.xlane.xlu1 %2191 }
 0x88f   : > { %v2212_v49 = vsub.f32 %v2183_v25, %v2192_v48  ;;  %v2200_v30 = vsub.f32 -inf, %v2192_v48 }
 0x891   : > { %v2217_v50 = vmul.f32 1.442695, %v2212_v49  ;;  %v2205_v31 = vmul.f32 1.442695, %v2200_v30 }
 0x893   : > { %3557 = vpow2.f32 %v2217_v50 }
 0x899   : > { %v3558_v51 = vpop.eup %3557 }
 0x89a   : > { %v2244_v52 = vpack.c.bf16 %v3558_v51, %v3558_v51  ;;  %v2230_v53 = vsel %vm2186_vm15, %v3558_v51, 0.0 }
 0x89b   : > { %2231 = vadd.xlane.f32.xlu1 %v2230_v53 }
 0x89c   : > { %3186 = vmatmul.msk.bf16.vlgmr.msrb.gmra.mxu3 %vm2186_vm15, %v2244_v52 }
 0x89d   : > { %2545 = vmatpush.bf16.msrb.mxu3 %v3251_v29 }
 0x89f   : > { %v2195_v54 = vpop.xlane.xlu0 %2194  ;;  %v5054_v55 = vpop.xlane.xlu2 %2197 }
 0x8a0   : > { %v2213_v56 = vsub.f32 %v2184_v32, %v2195_v54  ;;  %v2214_v57 = vsub.f32 %v2185_v33, %v5054_v55  ;;  %v2201_v32 = vsub.f32 -inf, %v2195_v54  ;;  %v2385_v33 = vld [vmem:[#allocation19 + $0x8] sm:$0xf]  ;;  %v2202_v39 = vsub.f32 -inf, %v5054_v55 }
 0x8a1   : > { %v2390_v28 = vsel %vm1722_vm7, %v2385_v33, 0 }
 0x8a2   : > { %v2219_v58 = vmul.f32 1.442695, %v2213_v56  ;;  %v2221_v59 = vmul.f32 1.442695, %v2214_v57  ;;  %v2207_v35 = vmul.f32 1.442695, %v2201_v32 }
 0x8a3   : > { %v2209_v43 = vmul.f32 1.442695, %v2202_v39  ;;  %v3250_v32 = vld [vmem:[%s5273_s17 + $0x10] sm:$0xff]  ;;  %v3521_v39 = vld [vmem:[#allocation22] ss:$0 sm:$0xff] }
 0x8a4   : > { %3559 = vpow2.f32 %v2219_v58  ;;  %2546 = vmatpush.bf16.msrb.mxu3 %v3250_v32 }
 0x8a5   : > { %3561 = vpow2.f32 %v2221_v59 }
 0x8a6   : > { %v2088_v7 = vpop.permute.xlu1 %2087  ;;  %3563 = vpow2.f32 %v2203_v19 }
 0x8a7   : > { %v2084_v61 = vpop.permute.xlu2 %2083  ;;  %v2308_v10 = vunpack.c.l.b16 %v2088_v7 }
 0x8a8   : > { %v2288_v63 = vunpack.c.l.b16 %v2084_v61 }
 0x8aa   : > { %v2289_v2 = vpack.c.b16 %v2288_v63, %v2287_v62  ;;  %v3560_v3 = vpop.eup %3559 }
 0x8ab   : > { %v2233_v4 = vsel %vm2186_vm15, %v3560_v3, 0.0  ;;  %v3562_v0 = vpop.eup %3561  ;;  %v2245_v5 = vpack.c.bf16 %v3560_v3, %v3560_v3 }
 0x8ac   : > { %2301 = vmatpush.bf16.msra.mxu0 %v2289_v2  ;;  %2234 = vadd.xlane.f32.xlu0 %v2233_v4  ;;  %v2236_v6 = vsel %vm2186_vm15, %v3562_v0, 0.0  ;;  %v2246_v13 = vpack.c.bf16 %v3562_v0, %v3562_v0  ;;  %v3564_v20 = vpop.eup %3563 }
 0x8ad   : > { %2237 = vadd.xlane.f32.xlu2 %v2236_v6  ;;  %v2223_v21 = vmul.f32 0.0, %v3564_v20 }
 0x8af   : > { %3187 = vmatmul.msk.bf16.vlgmr.msra.gmra.mxu0 %vm2186_vm15, %v2245_v5 }
 0x8b0   : > { %2399 = vmatpush.bf16.msrb.mxu0 %v2390_v28 }
 0x8b2   : > { %v2086_v9 = vpop.permute.xlu0 %2085 }
 0x8b3   : > { %v2307_v11 = vunpack.c.l.b16 %v2086_v9 }
 0x8b5   : > { %v2309_v12 = vpack.c.b16 %v2308_v10, %v2307_v11 }
 0x8b7   : > { %2321 = vmatpush.bf16.msra.mxu1 %v2309_v12 }
 0x8ba   : > { %3188 = vmatmul.msk.bf16.vlgmr.msra.gmra.mxu1 %vm2186_vm15, %v2246_v13 }
 0x8bb   : > { %2421 = vmatpush.bf16.msrb.mxu1 %v2412_v41 }
 0x8c4   : > { %v2263_v14 = vpop.f32.mrf.mxu2 }
 0x8c5   : > { %v2327_v1 = vadd.f32 %v2263_v14, %v2223_v21 }
 0x8cc   : > { %v2265_v16 = vpop.f32.mrf.mxu2 }
 0x8e0   : > { %v2229_v22 = vpop.xlane.xlu2 %2228 }
 0x8e1   : > { %v2239_v23 = vadd.f32 %v2229_v22, %v2223_v21 }
 0x8e3   : > { %3565 = vrcp.f32 %v2239_v23 }
 0x8e4   : > { %3567 = vpow2.f32 %v2205_v31 }
 0x8e5   : > { %3569 = vpow2.f32 %v2207_v35 }
 0x8e9   : > { %v3566_v24 = vpop.eup %3565 }
 0x8ea   : > { %v2335_v25 = vmul.f32 %v3566_v24, %v2327_v1  ;;  %v3568_v34 = vpop.eup %3567 }
 0x8eb   : > { %v2224_v37 = vmul.f32 0.0, %v3568_v34  ;;  %v3570_v42 = vpop.eup %3569 }
 0x8ec   : > { %v2339_v26 = vpack.c.bf16 %v2335_v25, %v2335_v25  ;;  %v2225_v48 = vmul.f32 0.0, %v3570_v42 }
 0x8ee   : > { %3190 = vmatmul.msk.bf16.vlgmr.msra.gmra.mxu3 %vm1573_vm5, %v2339_v26 }
 0x90e   : > { %v2232_v36 = vpop.xlane.xlu1 %2231 }
 0x90f   : > { %v2240_v38 = vadd.f32 %v2232_v36, %v2224_v37 }
 0x911   : > { %3571 = vrcp.f32 %v2240_v38 }
 0x912   : > { %3573 = vpow2.f32 %v2209_v43 }
 0x917   : > { %v3572_v47 = vpop.eup %3571 }
 0x918   : > { %v3574_v53 = vpop.eup %3573 }
 0x919   : > { %v2226_v56 = vmul.f32 0.0, %v3574_v53 }
 0x91f   : > { %v2283_v44 = vpop.f32.mrf.mxu3  ;;  %v2235_v46 = vpop.xlane.xlu0 %2234 }
 0x920   : > { %v2328_v45 = vadd.f32 %v2283_v44, %v2224_v37  ;;  %v2241_v50 = vadd.f32 %v2235_v46, %v2225_v48  ;;  %v2238_v54 = vpop.xlane.xlu2 %2237  ;;  %v3248_v46 = vld [vmem:[%s5273_s17] sm:$0xff] }
 0x921   : > { %v2242_v59 = vadd.f32 %v2238_v54, %v2226_v56 }
 0x922   : > { %v2336_v49 = vmul.f32 %v3572_v47, %v2328_v45  ;;  %3575 = vrcp.f32 %v2241_v50  ;;  %v3249_v45 = vld [vmem:[%s5273_s17 + $0x8] sm:$0xff]  ;;  %v3523_v47 = vld [vmem:[#allocation26] ss:$0 sm:$0xff]  ;;  %s4075_s17 = sshra.s32 %s2611_s5, 4  ;;  %s4076_s17 = int_to_ptr.hbm [resolvable:$true] %s4075_s17 }
 0x923   : > { %3577 = vrcp.f32 %v2242_v59  ;;  %2547 = vmatpush.bf16.msrb.mxu3 %v3249_v45  ;;  %s4077_s24 = scalar_lea.hbm %s4076_s17, 4  ;;  %p4082_p7 = scmp.lt.s32.totalorder %s4076_s17, %s5274_s4 }
 0x924   : > { %v2340_v51 = vpack.c.bf16 %v2336_v49, %v2336_v49  ;;  %p4078_p1 = scmp.ne.s32.totalorder %s4076_s17, %s4077_s24  ;;  %p4083_p4 = scmp.lt.s32.totalorder %s4081_s25, %s4077_s24 }
 0x926   : > { %3189 = vmatmul.msk.bf16.vlgmr.msra.gmra.mxu2 %vm1573_vm5, %v2340_v51  ;;  %p4079_p6 = pnand %p4078_p1, %p4784_p0  ;;  %p4084_p5 = por %p4083_p4, %p4082_p7 }
 0x927   : > { %v2285_v52 = vpop.f32.mrf.mxu3  ;;  %2548 = vmatpush.bf16.msrb.mxu3 %v3248_v46 }
 0x928   : > { %v3576_v58 = vpop.eup %3575  ;;  %p4080_p8 = pneg %p4079_p6 }
 0x929   : > { %v3578_v4 = vpop.eup %3577 }
 0x92a   : > { %p4085_p9 = pnand %p4084_p5, %p4080_p8 }
 0x92c   : > { %v2303_v55 = vpop.f32.mrf.mxu0 }
 0x92d   : > { %v2329_v57 = vadd.f32 %v2303_v55, %v2225_v48 }
 0x92f   : > { %v2337_v61 = vmul.f32 %v3576_v58, %v2329_v57 }
 0x931   : > { %v2341_v62 = vpack.c.bf16 %v2337_v61, %v2337_v61 }
 0x933   : > { %3191 = vmatmul.msk.bf16.vlgmr.msrb.gmra.mxu0 %vm1573_vm5, %v2341_v62 }
 0x934   : > { %v2305_v63 = vpop.f32.mrf.mxu0 }
 0x937   : > { %v2323_v2 = vpop.f32.mrf.mxu1 }
 0x938   : > { %v2330_v3 = vadd.f32 %v2323_v2, %v2226_v56 }
 0x93a   : > { %v2338_v0 = vmul.f32 %v3578_v4, %v2330_v3 }
 0x93c   : > { %v2342_v5 = vpack.c.bf16 %v2338_v0, %v2338_v0 }
 0x93e   : > { %3192 = vmatmul.msk.bf16.vlgmr.msrb.gmra.mxu1 %vm1573_vm5, %v2342_v5 }
 0x93f   : > { %v2325_v6 = vpop.f32.mrf.mxu1 }
 0x971   : > { %v2380_v7 = vpop.f32.mrf.mxu3 }
 0x979   : > { %v2382_v9 = vpop.f32.mrf.mxu3 }
 0x9a9   : > { %v2361_v10 = vpop.f32.mrf.mxu2 }
 0x9aa   : > { %v2381_v13 = vadd.f32 %v2380_v7, %v2361_v10 }
 0x9b0   : > { %v2401_v11 = vpop.f32.mrf.mxu0 }
 0x9b1   : > { %v2363_v12 = vpop.f32.mrf.mxu2  ;;  %v2405_v15 = vadd.f32 %v2401_v11, %v2381_v13 }
 0x9b8   : > { %v2403_v14 = vpop.f32.mrf.mxu0 }
 0x9bb   : > { %v2423_v16 = vpop.f32.mrf.mxu1 }
 0x9bc   : > { %v2427_v17 = vadd.f32 %v2423_v16, %v2405_v15 }
 0x9be   : > { %v2428_v19 = vadd.f32 %v2427_v17, %v4971_v60  ;;  %v3246_v60 = vld [vmem:[#allocation25] sm:$0xff] }
 0x9bf   : > { %2497 = vmatpush.bf16.msrb.mxu2 %v3246_v60 }
 0x9c0   : > { %v5071_v20 = vadd.f32 %v3520_v18, %v2428_v19 }
 0x9c2   : > { %v2436_v21 = vsel %vm1404_vm0, %v5071_v20, 0.0 }
 0x9c3   : > { %v2425_v22 = vpop.f32.mrf.mxu1  ;;  %2437 = vadd.xlane.f32.xlu1 %v2436_v21 }
 0xa36   : > { %v2438_v23 = vpop.xlane.xlu1 %2437 }
 0xa37   : > { %v2439_v1 = vmul.f32 %v2438_v23, %v4887_v8 }
 0xa39   : > { %v2440_v24 = vsub.f32 %v5071_v20, %v2439_v1 }
 0xa3b   : > { %v2441_v25 = vmul.f32 %v2440_v24, %v2440_v24 }
 0xa3d   : > { %v2442_v26 = vsel %vm1404_vm0, %v2441_v25, 0.0 }
 0xa3e   : > { %2443 = vadd.xlane.f32.xlu2 %v2442_v26 }
 0xab1   : > { %v2444_v30 = vpop.xlane.xlu2 %2443 }
 0xab2   : > { %v2445_v31 = vmul.f32 %v2444_v30, %v4887_v8  ;;  %v3522_v8 = vld [vmem:[#allocation23] ss:$0 sm:$0xff] }
 0xab4   : > { %v2446_v33 = vadd.f32 1e-06, %v2445_v31 }
 0xab6   : > { %3579 = vrsqrt.f32 %v2446_v33  ;;  %vm2453_vm2 = vweird.f32 %v2446_v33 }
 0xabc   : > { %v3580_v28 = vpop.eup %3579 }
 0xabd   : > { %v2448_v34 = vmul.f32 %v3580_v28, %v2446_v33  ;;  %vm2454_vm1 = vweird.f32 %v3580_v28 }
 0xabe   : > { %vm2455_vm3 = vmor %vm2453_vm2, %vm2454_vm1 }
 0xabf   : > { %v2449_v35 = vmul.f32 %v3580_v28, %v2448_v34 }
 0xac1   : > { %v2450_v36 = vmul.f32 0.5, %v2449_v35 }
 0xac3   : > { %v2451_v37 = vsub.f32 1.5, %v2450_v36 }
 0xac5   : > { %v2452_v38 = vmul.f32 %v3580_v28, %v2451_v37 }
 0xac7   : > { %v2456_v40 = vsel %vm2455_vm3, %v3580_v28, %v2452_v38 }
 0xac8   : > { %v2457_v41 = vmul.f32 %v2456_v40, %v2440_v24 }
 0xaca   : > { %v2461_v42 = vmul.f32 %v3521_v39, %v2457_v41 }
 0xacc   : > { %v2465_v43 = vadd.f32 %v3522_v8, %v2461_v42 }
 0xace   : > { %v2466_v44 = vpack.c.bf16 %v2465_v43, %v2465_v43 }
 0xad0   : > { %3201 = vmatmul.msk.bf16.vlgmr.msrb.gmra.mxu2 %vm1404_vm0, %v2466_v44 }
 0xb53   : > { %v2499_v48 = vpop.f32.mrf.mxu2 }
 0xb54   : > { %v2500_v49 = vadd.f32 %v3523_v47, %v2499_v48 }
 0xb56   : > { %v2503_v50 = vmax.f32 %v2500_v49, 0.0 }
 0xb58   : > { %v2504_v51 = vpack.c.bf16 %v2503_v50, %v2503_v50 }
 0xb5a   : > { %3218 = vmatmul.msk.bf16.vlgmr.msrb.gmra.mxu3 %vm2537_vm4, %v2504_v51 }
 0xb5b   : > { %v2501_v52 = vpop.f32.mrf.mxu2 }
 0xb5c   : > { %4088 = shalt.err (!%p4085_p9)
}
 0xb5d   : > { %s5276_s23 = sld [smem:[#allocation79_spill]]  ;;  %s2636_s14 = sshll.u32 %s4990_s8, 4  ;;  %s2637_s14 = int_to_ptr.vmem [resolvable:$true] %s2636_s14 }
 0xb5e   : > { %3315 = dma.vmem_to_hbm [thread:$0]  (%p4784_p0), %s2609_s12, 64, %s2611_s5, %s2567_s2  }
 0xb5f   : > { %s2638_s27 = sshll.u32 %s2635_s7, 4  ;;  %s2577_s25 = scalar_lea.sflag [#allocation33], %s4836_s6  ;;  %s2639_s27 = int_to_ptr.hbm [resolvable:$true] %s2638_s27 }
 0xb60   : > { %s4103_s24 = sshra.s32 %s2639_s27, 4  ;;  %s4109_s4 = scalar_lea.hbm %s5275_s20, 16  ;;  %s4104_s24 = int_to_ptr.hbm [resolvable:$true] %s4103_s24 }
 0xb61   : > { %s4105_s17 = scalar_lea.hbm %s4104_s24, 8  ;;  %p4110_p13 = scmp.lt.s32.totalorder %s4104_s24, %s5275_s20 }
 0xb62   : > { %p4106_p11 = scmp.ne.s32.totalorder %s4104_s24, %s4105_s17  ;;  %p4111_p3 = scmp.lt.s32.totalorder %s4109_s4, %s4105_s17 }
 0xb63   : > { %s2620_s22 = scalar_lea.hbm %s5276_s23, %s3225_s21 }
 0xb64   : > { %p4107_p10 = pnand %p4106_p11, %p4784_p0  ;;  %p4112_p1 = por %p4111_p3, %p4110_p13 }
 0xb66   : > { %p4108_p12 = pneg %p4107_p10 }
 0xb68   : > { %p4113_p6 = pnand %p4112_p1, %p4108_p12 }
 0xb6a   : > { %4116 = shalt.err (!%p4113_p6)
}
 0xb6b   : > { %s4340_s12 = smov 64   ;;  %s4341_s8 = smov 4  }
 0xb6c   : > { %3317 = dma.vmem_to_hbm [thread:$0]  (%p4784_p0), %s2637_s14, 128, %s2639_s27, %s2577_s25, %s4340_s12, %s4340_s12, %s4341_s8  }
 0xb6d   : > { %s2624_s21 = sshll.u32 %s2620_s22, 4  ;;  %s2653_s4 = sshll.u32 %s5020_s11, 4  ;;  %s2625_s21 = int_to_ptr.hbm [resolvable:$true] %s2624_s21  ;;  %s2654_s4 = int_to_ptr.vmem [resolvable:$true] %s2653_s4 }
 0xb6e   : > { %s2622_s5 = sshll.u32 %s4911_s28, 4  ;;  %s4131_s7 = sshra.s32 %s2625_s21, 4  ;;  %s2623_s5 = int_to_ptr.vmem [resolvable:$true] %s2622_s5  ;;  %s4132_s7 = int_to_ptr.hbm [resolvable:$true] %s4131_s7 }
 0xb6f   : > { %s4133_s24 = scalar_lea.hbm %s4132_s7, 4  ;;  %s4137_s17 = scalar_lea.hbm %s5276_s23, 8 }
 0xb70   : > { %p4134_p8 = scmp.ne.s32.totalorder %s4132_s7, %s4133_s24  ;;  %p4138_p5 = scmp.lt.s32.totalorder %s4132_s7, %s5276_s23 }
 0xb71   : > { %p4139_p9 = scmp.lt.s32.totalorder %s4137_s17, %s4133_s24 }
 0xb72   : > { %p4135_p7 = pnand %p4134_p8, %p4784_p0 }
 0xb73   : > { %p4140_p11 = por %p4139_p9, %p4138_p5 }
 0xb74   : > { %p4136_p4 = pneg %p4135_p7 }
 0xb76   : > { %p4141_p10 = pnand %p4140_p11, %p4136_p4 }
 0xb78   : > { %4144 = shalt.err (!%p4141_p10)
}
 0xb79   : > { %s5277_s27 = sld [smem:[#allocation81_spill]] }
 0xb7a   : > { %3316 = dma.vmem_to_hbm [thread:$0]  (%p4784_p0), %s2623_s5, 64, %s2625_s21, %s2567_s2  }
 0xb7f   : > { %s2652_s28 = scalar_lea.hbm %s5277_s27, %s5087_s19  ;;  %s4165_s7 = scalar_lea.hbm %s5277_s27, 16 }
 0xb80   : > { %s2655_s11 = sshll.u32 %s2652_s28, 4  ;;  %s2656_s11 = int_to_ptr.hbm [resolvable:$true] %s2655_s11 }
 0xb81   : > { %s4159_s22 = sshra.s32 %s2656_s11, 4  ;;  %s4160_s22 = int_to_ptr.hbm [resolvable:$true] %s4159_s22 }
 0xb82   : > { %s4161_s14 = scalar_lea.hbm %s4160_s22, 8  ;;  %p4166_p1 = scmp.lt.s32.totalorder %s4160_s22, %s5277_s27 }
 0xb83   : > { %p4162_p12 = scmp.ne.s32.totalorder %s4160_s22, %s4161_s14  ;;  %p4167_p6 = scmp.lt.s32.totalorder %s4165_s7, %s4161_s14 }
 0xb85   : > { %p4163_p13 = pnand %p4162_p12, %p4784_p0  ;;  %p4168_p8 = por %p4167_p6, %p4166_p1 }
 0xb87   : > { %p4164_p3 = pneg %p4163_p13 }
 0xb89   : > { %p4169_p7 = pnand %p4168_p8, %p4164_p3 }
 0xb8b   : > { %4172 = shalt.err (!%p4169_p7)
}
 0xb8c   : > { %s5278_s2 = sld [smem:[#allocation77_spill]]  ;;  %s1354_s24 = scalar_lea.vmem [#allocation28], %s4985_s3 }
 0xb8d   : > { %s5279_s21 = sld [smem:[#allocation76_spill]]  ;;  %s2594_s17 = sshll.u32 %s1354_s24, 4  ;;  %s2595_s17 = int_to_ptr.vmem [resolvable:$true] %s2594_s17 }
 0xb8e   : > { %3318 = dma.vmem_to_hbm [thread:$0]  (%p4784_p0), %s2654_s4, 128, %s2656_s11, %s2577_s25, %s4340_s12, %s4340_s12, %s4341_s8  }
 0xb8f   : > { %s2562_s6 = scalar_lea.sflag [#allocation4], %s4825_s9 }
 0xb92   : > { %s2592_s5 = scalar_lea.hbm %s5278_s2, %s5087_s19  ;;  %s4193_s19 = scalar_lea.hbm %s5278_s2, 16 }
 0xb93   : > { %v3524_v53 = vld [vmem:[%s5279_s21] ss:$0 sm:$0xff]  ;;  %s2596_s28 = sshll.u32 %s2592_s5, 4  ;;  %s2597_s28 = int_to_ptr.hbm [resolvable:$true] %s2596_s28 }
 0xb94   : > { %s4187_s22 = sshra.s32 %s2597_s28, 4  ;;  %s4188_s22 = int_to_ptr.hbm [resolvable:$true] %s4187_s22 }
 0xb95   : > { %s4189_s25 = scalar_lea.hbm %s4188_s22, 8  ;;  %p4194_p11 = scmp.lt.s32.totalorder %s4188_s22, %s5278_s2 }
 0xb96   : > { %p4190_p4 = scmp.ne.s32.totalorder %s4188_s22, %s4189_s25  ;;  %p4195_p10 = scmp.lt.s32.totalorder %s4193_s19, %s4189_s25 }
 0xb98   : > { %p4191_p5 = pnand %p4190_p4, %p4784_p0  ;;  %p4196_p12 = por %p4195_p10, %p4194_p11 }
 0xb9a   : > { %p4192_p9 = pneg %p4191_p5 }
 0xb9c   : > { %p4197_p13 = pnand %p4196_p12, %p4192_p9 }
 0xbdd   : > { %v2550_v54 = vpop.f32.mrf.mxu3 }
 0xbde   : > { %v2554_v55 = vadd.f32 %v2550_v54, %v5071_v20 }
 0xbe0   : > { %v2559_v56 = vadd.f32 %v3524_v53, %v2554_v55 }
 0xbe2   : > { %2560 = vst.msk [vmem:[%s1354_s24] sm:$0xff] %vm1404_vm0, %v2559_v56 }
 0xbe3   : > { %4200 = shalt.err (!%p4197_p13)
}
 0xbe4   : > { %3314 = dma.vmem_to_hbm [thread:$0]  (%p4784_p0), %s2595_s17, 128, %s2597_s28, %s2562_s6  }
 0xbe5   : > { %v2552_v57 = vpop.f32.mrf.mxu3 }
 0xbe6 PF: > { %s2670_s9 = sand.u32 1, %s4271_s15   ;;  %p5280_p3 = scmp.ge.s32.totalorder %s4283_s18, 2 }
 0xbe7   : > { %s2671_s3 = scalar_lea.sflag [#allocation4], %s2670_s9 }
 0xbe8   : > { %p3375_p1 = pnand %p5280_p3, %p4788_p2 }
 0xbea   : > { %p3376_p6 = pneg %p3375_p1 }
 0xbec   : > { %4258 = dma.done.wait (%p3376_p6), %s2671_s3, 128  }
 0xbed   : > { %4260 = vsyncadd (%p3376_p6), %s2671_s3, 4294967168  ;;  %s5281_s12 = sadd.s32 4294967294, %s4283_s18  }
 0xbee   : > { %s2680_s8 = sand.u32 1, %s5281_s12  }
 0xbef   : > { %s2681_s4 = scalar_lea.sflag [#allocation30], %s2680_s8 }
 0xbf0   : > { %4262 = dma.done.wait (%p3376_p6), %s2681_s4, 128  }
 0xbf1   : > { %4264 = vsyncadd (%p3376_p6), %s2681_s4, 4294967168  ;;  %s2701_s1 = scalar_lea.sflag [#allocation33], %s2680_s8 }
 0xbf2   : > { %4266 = dma.done.wait (%p3376_p6), %s2701_s1, 256  }
 0xbf3   : > { %4268 = vsyncadd (%p3376_p6), %s2701_s1, 4294967040  ;;  %p99_p0 = scmp.ge.s32.totalorder %s4756_s26, 4   ;;  %s5282_s15 = smov %s4275_s0 }
 0xbf4   : > { %s5283_s0 = smov %s4279_s16  ;;  %s5284_s16 = smov %s4767_s10 }
 0xbf5   : > { %s5285_s18 = smov %s4756_s26  ;;  %101 = sbr.rel (!%p99_p0) target bundleno = 90 (0x5a), region = 364 }
 0xbfa   :  { %2717 = vsyncpa [#allocation3], 1 }
 0xbfb   :  { %2719 = vsyncpa [#allocation3 + $0x1], 1 }
 0xbfc   :  { %2720 = vsyncpa [#allocation6], 1 }
 0xbfd   :  { %2722 = vsyncpa [#allocation6 + $0x1], 1 }
 0xbfe   :  { %2723 = vsyncpa [#allocation9], 1 }
 0xbff   :  { %2724 = vsyncpa [#allocation12], 1 }
 0xc00   :  { %2725 = vsyncpa [#allocation15], 1 }
 0xc01   :  { %2726 = vsyncpa [#allocation18], 1 }
 0xc02   :  { %2727 = vsyncpa [#allocation21], 1 }
 0xc03   :  { %2728 = vsyncpa [#allocation24], 1 }
 0xc04   :  { %2729 = vsyncpa [#allocation27], 1 }
 0xc05   :  { %2730 = vsyncpa [#allocation4], 1 }
 0xc06   :  { %2732 = vsyncpa [#allocation4 + $0x1], 1 }
 0xc07   :  { %2733 = vsyncpa [#allocation30], 1 }
 0xc08   :  { %2735 = vsyncpa [#allocation30 + $0x1], 1 }
 0xc09   :  { %2736 = vsyncpa [#allocation33], 1 }
 0xc0a   :  { %2738 = vsyncpa [#allocation33 + $0x1], 1 }

</bundles_post_ra>
